<compile_context>
chip_gen: v6e
topology: v6e:2x2x1
jax: 0.10.0
libtpu: 0.0.40
codegen_flags: <defaults>
</compile_context>

<pallas_src>
import functools

import numpy as np
import jax
import jax.numpy as jnp
from jax.experimental import pallas as pl
from jax.experimental.pallas import tpu as pltpu


def _spatial_attention_kernel(x_ref, wm_max_ref, wm_mean_ref, b_ref, out_ref,
                              *, width, ksize):
    """One group of BT images per grid step.

    x_ref      : (1, C, BT, HW) VMEM — channels lead, BT on sublanes, HW on lanes
    wm_max_ref : (k*k, HW)      VMEM — conv weight (max channel)  * boundary mask per tap
    wm_mean_ref: (k*k, HW)      VMEM — conv weight (mean channel) * boundary mask per tap
    b_ref      : (1,)           SMEM — conv bias
    out_ref    : (1, BT, HW)    VMEM
    """
    hw = x_ref.shape[-1]
    half = ksize // 2

    x = x_ref[0]                                   # (C, BT, HW)
    ch_max = jnp.max(x, axis=0)                    # (BT, HW): elementwise over leading dim
    ch_mean = jnp.mean(x, axis=0)                  # (BT, HW)

    acc = jnp.zeros_like(ch_max)
    for kh in range(ksize):
        for kw in range(ksize):
            t = kh * ksize + kw
            # output pixel p = h*W + w reads input pixel p + off (when inside the image)
            off = (kh - half) * width + (kw - half)
            shift = (-off) % hw
            if shift == 0:
                r_max, r_mean = ch_max, ch_mean
            else:
                r_max = pltpu.roll(ch_max, shift=shift, axis=1)
                r_mean = pltpu.roll(ch_mean, shift=shift, axis=1)
            acc = (acc
                   + wm_max_ref[t:t + 1, :] * r_max
                   + wm_mean_ref[t:t + 1, :] * r_mean)

    z = acc + b_ref[0]
    e = jnp.exp(-z)                                                 # EUP
    out_ref[0] = pl.reciprocal(1.0 + e, approx=False).astype(out_ref.dtype)


def _build_masks(height, width, ksize):
    """(k*k, H*W) f32 masks: 1 where the tap reads inside the image, 0 in the halo."""
    half = ksize // 2
    hh, ww = np.meshgrid(np.arange(height), np.arange(width), indexing="ij")
    rows = []
    for kh in range(ksize):
        for kw in range(ksize):
            dh, dw = kh - half, kw - half
            valid = ((hh + dh >= 0) & (hh + dh < height)
                     & (ww + dw >= 0) & (ww + dw < width))
            rows.append(valid.reshape(-1))
    return jnp.asarray(np.stack(rows).astype(np.float32))


_VMEM_BUDGET = 40 << 20   # working-set budget: fits v7x's 64 MiB physical with headroom


def _working_set_bytes(bt, c, hw, ksize):
    inp = 2 * c * bt * hw * 4                 # input block, double-buffered
    wmask = 2 * 2 * ksize * ksize * hw * 4    # two folded weight-mask planes, 2 buffers
    out = 2 * bt * hw * 4                     # output block, double-buffered
    return inp + wmask + out


def _choose_bt(batch, c, hw, ksize):
    """Largest BT<=8 that divides batch, keeps grid >=2 (v7x megacore) and fits VMEM."""
    bt = 1
    for cand in (8, 4, 2):
        if batch % cand == 0 and batch // cand >= 2:
            bt = cand
            break
    while bt > 1 and _working_set_bytes(bt, c, hw, ksize) > _VMEM_BUDGET:
        bt //= 2
    # TODO(synk): if even BT=1 exceeds the budget (huge C*HW), tile the channel reduce.
    return bt


def spatial_attention(x_nchw, params, *, ksize=7):
    weight, bias = params                     # weight: (1, 2, k, k), bias: (1,)
    assert ksize % 2 == 1, "roll+mask scheme assumes odd kernel size (pad = k//2)"
    B, C, H, W = x_nchw.shape
    HW = H * W

    BT = _choose_bt(B, C, HW, ksize)
    G = B // BT

    # (B, C, H, W) -> (G, C, BT, HW): one relayout pass, amortized over the whole kernel.
    x_blk = (x_nchw.astype(jnp.float32)
             .reshape(G, BT, C, HW)
             .transpose(0, 2, 1, 3))          # (G, C, BT, HW)

    masks = _build_masks(H, W, ksize)                              # (k*k, HW)
    w2d = weight.reshape(2, ksize * ksize).astype(jnp.float32)     # (2, k*k)
    wm_max = w2d[0][:, None] * masks                               # (k*k, HW)
    wm_mean = w2d[1][:, None] * masks                              # (k*k, HW)
    b1 = bias.reshape(1).astype(jnp.float32)

    kernel = functools.partial(_spatial_attention_kernel, width=W, ksize=ksize)

    out_blk = pl.pallas_call(
        kernel,
        out_shape=jax.ShapeDtypeStruct((G, BT, HW), jnp.float32),
        grid=(G,),
        in_specs=[
            pl.BlockSpec((1, C, BT, HW), lambda g: (g, 0, 0, 0)),
            pl.BlockSpec((ksize * ksize, HW), lambda g: (0, 0)),
            pl.BlockSpec((ksize * ksize, HW), lambda g: (0, 0)),
            pl.BlockSpec(memory_space=pltpu.MemorySpace.SMEM),
        ],
        out_specs=pl.BlockSpec((1, BT, HW), lambda g: (g, 0, 0)),
        compiler_params=pltpu.CompilerParams(
            dimension_semantics=("parallel",),
            vmem_limit_bytes=48 << 20),
    )(x_blk, wm_max, wm_mean, b1)

    return out_blk.reshape(B, 1, H, W)


def init_params(key, ksize=7):
    """Deterministic Conv2d(2, 1, k, 1, k//2) parameters (PyTorch-style uniform init)."""
    kw_, kb_ = jax.random.split(key)
    fan_in = 2 * ksize * ksize
    bound = 1.0 / np.sqrt(fan_in)
    weight = jax.random.uniform(kw_, (1, 2, ksize, ksize), jnp.float32, -bound, bound)
    bias = jax.random.uniform(kb_, (1,), jnp.float32, -bound, bound)
    return weight, bias


def reference_forward(x_nchw, params):
    """Pure-JAX reference matching torch SpatialAttention.forward."""
    weight, bias = params
    mx = jnp.max(x_nchw, axis=1, keepdims=True)
    mn = jnp.mean(x_nchw, axis=1, keepdims=True)
    feat = jnp.concatenate([mx, mn], axis=1)                 # (B, 2, H, W)
    out = jax.lax.conv_general_dilated(
        feat, weight, window_strides=(1, 1), padding=[(3, 3), (3, 3)],
        dimension_numbers=("NCHW", "OIHW", "NCHW"),
        precision=jax.lax.Precision.HIGHEST)
    return 1.0 / (1.0 + jnp.exp(-(out + bias[0])))


if __name__ == "__main__":
    key = jax.random.PRNGKey(0)
    kx, kx2, kp = jax.random.split(key, 3)
    params = init_params(kp)

    # Primary small case (B=2 -> BT=1, grid=(2,)): matches the module's toy shapes.
    B, C, H, W = 2, 4, 16, 16
    x = jax.random.normal(kx, (B, C, H, W), jnp.float32)
    out = jax.block_until_ready(spatial_attention(x, params))
    assert out.shape == (B, 1, H, W)
    ref = reference_forward(x, params)
    np.testing.assert_allclose(np.asarray(out), np.asarray(ref), rtol=1e-5, atol=1e-5)

    # Sublane-packed path (B=16 -> BT=8, grid=(2,)): exercises the batched layout.
    x2 = jax.random.normal(kx2, (16, C, H, W), jnp.float32)
    out2 = jax.block_until_ready(spatial_attention(x2, params))
    ref2 = reference_forward(x2, params)
    np.testing.assert_allclose(np.asarray(out2), np.asarray(ref2), rtol=1e-5, atol=1e-5)

    print("KERNEL_OK")
</pallas_src>

<mosaic_0001>
module attributes {stable_mosaic.version = 11 : i64} {
  func.func @_spatial_attention_kernel(%arg0: i32, %arg1: memref<1x4x1x256xf32, #tpu.memory_space<vmem>>, %arg2: memref<49x256xf32, #tpu.memory_space<vmem>>, %arg3: memref<49x256xf32, #tpu.memory_space<vmem>>, %arg4: memref<1xf32, #tpu.memory_space<smem>>, %arg5: memref<1x1x256xf32, #tpu.memory_space<vmem>>) attributes {dimension_semantics = [#tpu.dimension_semantics<parallel>], iteration_bounds = array<i64: 2>, scalar_prefetch = 0 : i64, scratch_operands = 0 : i64, tpu.core_type = #tpu.core_type<tc>, window_params = [{transform_indices = @transform_0, window_bounds = array<i64: 1, 4, 1, 256>}, {pipeline_mode = #tpu.pipeline_mode<synchronous>, transform_indices = @transform_1, window_bounds = array<i64: 49, 256>}, {pipeline_mode = #tpu.pipeline_mode<synchronous>, transform_indices = @transform_2, window_bounds = array<i64: 49, 256>}, {transform_indices = @transform_3, window_bounds = array<i64: 1>}, {transform_indices = @transform_4, window_bounds = array<i64: 1, 1, 256>}]} {
    %c0 = arith.constant 0 : index
    %c0_0 = arith.constant 0 : index
    %c0_1 = arith.constant 0 : index
    %c0_2 = arith.constant 0 : index
    %0 = vector.load %arg1[%c0, %c0_0, %c0_1, %c0_2] : memref<1x4x1x256xf32, #tpu.memory_space<vmem>>, vector<1x4x1x256xf32>
    %1 = vector.shape_cast %0 : vector<1x4x1x256xf32> to vector<4x1x256xf32>
    %cst = arith.constant dense<0xFF800000> : vector<1x256xf32>
    %2 = vector.multi_reduction <maximumf>, %1, %cst [0] : vector<4x1x256xf32> to vector<1x256xf32>
    %cst_3 = arith.constant dense<0.000000e+00> : vector<1x256xf32>
    %3 = vector.multi_reduction <add>, %1, %cst_3 [0] : vector<4x1x256xf32> to vector<1x256xf32>
    %cst_4 = arith.constant 4.000000e+00 : f32
    %4 = vector.broadcast %cst_4 : f32 to vector<1x256xf32>
    %5 = arith.divf %3, %4 : vector<1x256xf32>
    %cst_5 = arith.constant 0.000000e+00 : f32
    %6 = vector.broadcast %cst_5 : f32 to vector<1x256xf32>
    %c51_i32 = arith.constant 51 : i32
    %7 = tpu.dynamic_rotate %2 by %c51_i32 dim 1 : vector<1x256xf32>, i32 -> vector<1x256xf32>
    %c51_i32_6 = arith.constant 51 : i32
    %8 = tpu.dynamic_rotate %5 by %c51_i32_6 dim 1 : vector<1x256xf32>, i32 -> vector<1x256xf32>
    %c0_7 = arith.constant 0 : index
    %c0_8 = arith.constant 0 : index
    %9 = vector.load %arg2[%c0_7, %c0_8] : memref<49x256xf32, #tpu.memory_space<vmem>>, vector<1x256xf32>
    %10 = arith.mulf %9, %7 : vector<1x256xf32>
    %11 = arith.addf %6, %10 : vector<1x256xf32>
    %c0_9 = arith.constant 0 : index
    %c0_10 = arith.constant 0 : index
    %12 = vector.load %arg3[%c0_9, %c0_10] : memref<49x256xf32, #tpu.memory_space<vmem>>, vector<1x256xf32>
    %13 = arith.mulf %12, %8 : vector<1x256xf32>
    %14 = arith.addf %11, %13 : vector<1x256xf32>
    %c50_i32 = arith.constant 50 : i32
    %15 = tpu.dynamic_rotate %2 by %c50_i32 dim 1 : vector<1x256xf32>, i32 -> vector<1x256xf32>
    %c50_i32_11 = arith.constant 50 : i32
    %16 = tpu.dynamic_rotate %5 by %c50_i32_11 dim 1 : vector<1x256xf32>, i32 -> vector<1x256xf32>
    %c1 = arith.constant 1 : index
    %c0_12 = arith.constant 0 : index
    %17 = vector.load %arg2[%c1, %c0_12] : memref<49x256xf32, #tpu.memory_space<vmem>>, vector<1x256xf32>
    %18 = arith.mulf %17, %15 : vector<1x256xf32>
    %19 = arith.addf %14, %18 : vector<1x256xf32>
    %c1_13 = arith.constant 1 : index
    %c0_14 = arith.constant 0 : index
    %20 = vector.load %arg3[%c1_13, %c0_14] : memref<49x256xf32, #tpu.memory_space<vmem>>, vector<1x256xf32>
    %21 = arith.mulf %20, %16 : vector<1x256xf32>
    %22 = arith.addf %19, %21 : vector<1x256xf32>
    %c49_i32 = arith.constant 49 : i32
    %23 = tpu.dynamic_rotate %2 by %c49_i32 dim 1 : vector<1x256xf32>, i32 -> vector<1x256xf32>
    %c49_i32_15 = arith.constant 49 : i32
    %24 = tpu.dynamic_rotate %5 by %c49_i32_15 dim 1 : vector<1x256xf32>, i32 -> vector<1x256xf32>
    %c2 = arith.constant 2 : index
    %c0_16 = arith.constant 0 : index
    %25 = vector.load %arg2[%c2, %c0_16] : memref<49x256xf32, #tpu.memory_space<vmem>>, vector<1x256xf32>
    %26 = arith.mulf %25, %23 : vector<1x256xf32>
    %27 = arith.addf %22, %26 : vector<1x256xf32>
    %c2_17 = arith.constant 2 : index
    %c0_18 = arith.constant 0 : index
    %28 = vector.load %arg3[%c2_17, %c0_18] : memref<49x256xf32, #tpu.memory_space<vmem>>, vector<1x256xf32>
    %29 = arith.mulf %28, %24 : vector<1x256xf32>
    %30 = arith.addf %27, %29 : vector<1x256xf32>
    %c48_i32 = arith.constant 48 : i32
    %31 = tpu.dynamic_rotate %2 by %c48_i32 dim 1 : vector<1x256xf32>, i32 -> vector<1x256xf32>
    %c48_i32_19 = arith.constant 48 : i32
    %32 = tpu.dynamic_rotate %5 by %c48_i32_19 dim 1 : vector<1x256xf32>, i32 -> vector<1x256xf32>
    %c3 = arith.constant 3 : index
    %c0_20 = arith.constant 0 : index
    %33 = vector.load %arg2[%c3, %c0_20] : memref<49x256xf32, #tpu.memory_space<vmem>>, vector<1x256xf32>
    %34 = arith.mulf %33, %31 : vector<1x256xf32>
    %35 = arith.addf %30, %34 : vector<1x256xf32>
    %c3_21 = arith.constant 3 : index
    %c0_22 = arith.constant 0 : index
    %36 = vector.load %arg3[%c3_21, %c0_22] : memref<49x256xf32, #tpu.memory_space<vmem>>, vector<1x256xf32>
    %37 = arith.mulf %36, %32 : vector<1x256xf32>
    %38 = arith.addf %35, %37 : vector<1x256xf32>
    %c47_i32 = arith.constant 47 : i32
    %39 = tpu.dynamic_rotate %2 by %c47_i32 dim 1 : vector<1x256xf32>, i32 -> vector<1x256xf32>
    %c47_i32_23 = arith.constant 47 : i32
    %40 = tpu.dynamic_rotate %5 by %c47_i32_23 dim 1 : vector<1x256xf32>, i32 -> vector<1x256xf32>
    %c4 = arith.constant 4 : index
    %c0_24 = arith.constant 0 : index
    %41 = vector.load %arg2[%c4, %c0_24] : memref<49x256xf32, #tpu.memory_space<vmem>>, vector<1x256xf32>
    %42 = arith.mulf %41, %39 : vector<1x256xf32>
    %43 = arith.addf %38, %42 : vector<1x256xf32>
    %c4_25 = arith.constant 4 : index
    %c0_26 = arith.constant 0 : index
    %44 = vector.load %arg3[%c4_25, %c0_26] : memref<49x256xf32, #tpu.memory_space<vmem>>, vector<1x256xf32>
    %45 = arith.mulf %44, %40 : vector<1x256xf32>
    %46 = arith.addf %43, %45 : vector<1x256xf32>
    %c46_i32 = arith.constant 46 : i32
    %47 = tpu.dynamic_rotate %2 by %c46_i32 dim 1 : vector<1x256xf32>, i32 -> vector<1x256xf32>
    %c46_i32_27 = arith.constant 46 : i32
    %48 = tpu.dynamic_rotate %5 by %c46_i32_27 dim 1 : vector<1x256xf32>, i32 -> vector<1x256xf32>
    %c5 = arith.constant 5 : index
    %c0_28 = arith.constant 0 : index
    %49 = vector.load %arg2[%c5, %c0_28] : memref<49x256xf32, #tpu.memory_space<vmem>>, vector<1x256xf32>
    %50 = arith.mulf %49, %47 : vector<1x256xf32>
    %51 = arith.addf %46, %50 : vector<1x256xf32>
    %c5_29 = arith.constant 5 : index
    %c0_30 = arith.constant 0 : index
    %52 = vector.load %arg3[%c5_29, %c0_30] : memref<49x256xf32, #tpu.memory_space<vmem>>, vector<1x256xf32>
    %53 = arith.mulf %52, %48 : vector<1x256xf32>
    %54 = arith.addf %51, %53 : vector<1x256xf32>
    %c45_i32 = arith.constant 45 : i32
    %55 = tpu.dynamic_rotate %2 by %c45_i32 dim 1 : vector<1x256xf32>, i32 -> vector<1x256xf32>
    %c45_i32_31 = arith.constant 45 : i32
    %56 = tpu.dynamic_rotate %5 by %c45_i32_31 dim 1 : vector<1x256xf32>, i32 -> vector<1x256xf32>
    %c6 = arith.constant 6 : index
    %c0_32 = arith.constant 0 : index
    %57 = vector.load %arg2[%c6, %c0_32] : memref<49x256xf32, #tpu.memory_space<vmem>>, vector<1x256xf32>
    %58 = arith.mulf %57, %55 : vector<1x256xf32>
    %59 = arith.addf %54, %58 : vector<1x256xf32>
    %c6_33 = arith.constant 6 : index
    %c0_34 = arith.constant 0 : index
    %60 = vector.load %arg3[%c6_33, %c0_34] : memref<49x256xf32, #tpu.memory_space<vmem>>, vector<1x256xf32>
    %61 = arith.mulf %60, %56 : vector<1x256xf32>
    %62 = arith.addf %59, %61 : vector<1x256xf32>
    %c35_i32 = arith.constant 35 : i32
    %63 = tpu.dynamic_rotate %2 by %c35_i32 dim 1 : vector<1x256xf32>, i32 -> vector<1x256xf32>
    %c35_i32_35 = arith.constant 35 : i32
    %64 = tpu.dynamic_rotate %5 by %c35_i32_35 dim 1 : vector<1x256xf32>, i32 -> vector<1x256xf32>
    %c7 = arith.constant 7 : index
    %c0_36 = arith.constant 0 : index
    %65 = vector.load %arg2[%c7, %c0_36] : memref<49x256xf32, #tpu.memory_space<vmem>>, vector<1x256xf32>
    %66 = arith.mulf %65, %63 : vector<1x256xf32>
    %67 = arith.addf %62, %66 : vector<1x256xf32>
    %c7_37 = arith.constant 7 : index
    %c0_38 = arith.constant 0 : index
    %68 = vector.load %arg3[%c7_37, %c0_38] : memref<49x256xf32, #tpu.memory_space<vmem>>, vector<1x256xf32>
    %69 = arith.mulf %68, %64 : vector<1x256xf32>
    %70 = arith.addf %67, %69 : vector<1x256xf32>
    %c34_i32 = arith.constant 34 : i32
    %71 = tpu.dynamic_rotate %2 by %c34_i32 dim 1 : vector<1x256xf32>, i32 -> vector<1x256xf32>
    %c34_i32_39 = arith.constant 34 : i32
    %72 = tpu.dynamic_rotate %5 by %c34_i32_39 dim 1 : vector<1x256xf32>, i32 -> vector<1x256xf32>
    %c8 = arith.constant 8 : index
    %c0_40 = arith.constant 0 : index
    %73 = vector.load %arg2[%c8, %c0_40] : memref<49x256xf32, #tpu.memory_space<vmem>>, vector<1x256xf32>
    %74 = arith.mulf %73, %71 : vector<1x256xf32>
    %75 = arith.addf %70, %74 : vector<1x256xf32>
    %c8_41 = arith.constant 8 : index
    %c0_42 = arith.constant 0 : index
    %76 = vector.load %arg3[%c8_41, %c0_42] : memref<49x256xf32, #tpu.memory_space<vmem>>, vector<1x256xf32>
    %77 = arith.mulf %76, %72 : vector<1x256xf32>
    %78 = arith.addf %75, %77 : vector<1x256xf32>
    %c33_i32 = arith.constant 33 : i32
    %79 = tpu.dynamic_rotate %2 by %c33_i32 dim 1 : vector<1x256xf32>, i32 -> vector<1x256xf32>
    %c33_i32_43 = arith.constant 33 : i32
    %80 = tpu.dynamic_rotate %5 by %c33_i32_43 dim 1 : vector<1x256xf32>, i32 -> vector<1x256xf32>
    %c9 = arith.constant 9 : index
    %c0_44 = arith.constant 0 : index
    %81 = vector.load %arg2[%c9, %c0_44] : memref<49x256xf32, #tpu.memory_space<vmem>>, vector<1x256xf32>
    %82 = arith.mulf %81, %79 : vector<1x256xf32>
    %83 = arith.addf %78, %82 : vector<1x256xf32>
    %c9_45 = arith.constant 9 : index
    %c0_46 = arith.constant 0 : index
    %84 = vector.load %arg3[%c9_45, %c0_46] : memref<49x256xf32, #tpu.memory_space<vmem>>, vector<1x256xf32>
    %85 = arith.mulf %84, %80 : vector<1x256xf32>
    %86 = arith.addf %83, %85 : vector<1x256xf32>
    %c32_i32 = arith.constant 32 : i32
    %87 = tpu.dynamic_rotate %2 by %c32_i32 dim 1 : vector<1x256xf32>, i32 -> vector<1x256xf32>
    %c32_i32_47 = arith.constant 32 : i32
    %88 = tpu.dynamic_rotate %5 by %c32_i32_47 dim 1 : vector<1x256xf32>, i32 -> vector<1x256xf32>
    %c10 = arith.constant 10 : index
    %c0_48 = arith.constant 0 : index
    %89 = vector.load %arg2[%c10, %c0_48] : memref<49x256xf32, #tpu.memory_space<vmem>>, vector<1x256xf32>
    %90 = arith.mulf %89, %87 : vector<1x256xf32>
    %91 = arith.addf %86, %90 : vector<1x256xf32>
    %c10_49 = arith.constant 10 : index
    %c0_50 = arith.constant 0 : index
    %92 = vector.load %arg3[%c10_49, %c0_50] : memref<49x256xf32, #tpu.memory_space<vmem>>, vector<1x256xf32>
    %93 = arith.mulf %92, %88 : vector<1x256xf32>
    %94 = arith.addf %91, %93 : vector<1x256xf32>
    %c31_i32 = arith.constant 31 : i32
    %95 = tpu.dynamic_rotate %2 by %c31_i32 dim 1 : vector<1x256xf32>, i32 -> vector<1x256xf32>
    %c31_i32_51 = arith.constant 31 : i32
    %96 = tpu.dynamic_rotate %5 by %c31_i32_51 dim 1 : vector<1x256xf32>, i32 -> vector<1x256xf32>
    %c11 = arith.constant 11 : index
    %c0_52 = arith.constant 0 : index
    %97 = vector.load %arg2[%c11, %c0_52] : memref<49x256xf32, #tpu.memory_space<vmem>>, vector<1x256xf32>
    %98 = arith.mulf %97, %95 : vector<1x256xf32>
    %99 = arith.addf %94, %98 : vector<1x256xf32>
    %c11_53 = arith.constant 11 : index
    %c0_54 = arith.constant 0 : index
    %100 = vector.load %arg3[%c11_53, %c0_54] : memref<49x256xf32, #tpu.memory_space<vmem>>, vector<1x256xf32>
    %101 = arith.mulf %100, %96 : vector<1x256xf32>
    %102 = arith.addf %99, %101 : vector<1x256xf32>
    %c30_i32 = arith.constant 30 : i32
    %103 = tpu.dynamic_rotate %2 by %c30_i32 dim 1 : vector<1x256xf32>, i32 -> vector<1x256xf32>
    %c30_i32_55 = arith.constant 30 : i32
    %104 = tpu.dynamic_rotate %5 by %c30_i32_55 dim 1 : vector<1x256xf32>, i32 -> vector<1x256xf32>
    %c12 = arith.constant 12 : index
    %c0_56 = arith.constant 0 : index
    %105 = vector.load %arg2[%c12, %c0_56] : memref<49x256xf32, #tpu.memory_space<vmem>>, vector<1x256xf32>
    %106 = arith.mulf %105, %103 : vector<1x256xf32>
    %107 = arith.addf %102, %106 : vector<1x256xf32>
    %c12_57 = arith.constant 12 : index
    %c0_58 = arith.constant 0 : index
    %108 = vector.load %arg3[%c12_57, %c0_58] : memref<49x256xf32, #tpu.memory_space<vmem>>, vector<1x256xf32>
    %109 = arith.mulf %108, %104 : vector<1x256xf32>
    %110 = arith.addf %107, %109 : vector<1x256xf32>
    %c29_i32 = arith.constant 29 : i32
    %111 = tpu.dynamic_rotate %2 by %c29_i32 dim 1 : vector<1x256xf32>, i32 -> vector<1x256xf32>
    %c29_i32_59 = arith.constant 29 : i32
    %112 = tpu.dynamic_rotate %5 by %c29_i32_59 dim 1 : vector<1x256xf32>, i32 -> vector<1x256xf32>
    %c13 = arith.constant 13 : index
    %c0_60 = arith.constant 0 : index
    %113 = vector.load %arg2[%c13, %c0_60] : memref<49x256xf32, #tpu.memory_space<vmem>>, vector<1x256xf32>
    %114 = arith.mulf %113, %111 : vector<1x256xf32>
    %115 = arith.addf %110, %114 : vector<1x256xf32>
    %c13_61 = arith.constant 13 : index
    %c0_62 = arith.constant 0 : index
    %116 = vector.load %arg3[%c13_61, %c0_62] : memref<49x256xf32, #tpu.memory_space<vmem>>, vector<1x256xf32>
    %117 = arith.mulf %116, %112 : vector<1x256xf32>
    %118 = arith.addf %115, %117 : vector<1x256xf32>
    %c19_i32 = arith.constant 19 : i32
    %119 = tpu.dynamic_rotate %2 by %c19_i32 dim 1 : vector<1x256xf32>, i32 -> vector<1x256xf32>
    %c19_i32_63 = arith.constant 19 : i32
    %120 = tpu.dynamic_rotate %5 by %c19_i32_63 dim 1 : vector<1x256xf32>, i32 -> vector<1x256xf32>
    %c14 = arith.constant 14 : index
    %c0_64 = arith.constant 0 : index
    %121 = vector.load %arg2[%c14, %c0_64] : memref<49x256xf32, #tpu.memory_space<vmem>>, vector<1x256xf32>
    %122 = arith.mulf %121, %119 : vector<1x256xf32>
    %123 = arith.addf %118, %122 : vector<1x256xf32>
    %c14_65 = arith.constant 14 : index
    %c0_66 = arith.constant 0 : index
    %124 = vector.load %arg3[%c14_65, %c0_66] : memref<49x256xf32, #tpu.memory_space<vmem>>, vector<1x256xf32>
    %125 = arith.mulf %124, %120 : vector<1x256xf32>
    %126 = arith.addf %123, %125 : vector<1x256xf32>
    %c18_i32 = arith.constant 18 : i32
    %127 = tpu.dynamic_rotate %2 by %c18_i32 dim 1 : vector<1x256xf32>, i32 -> vector<1x256xf32>
    %c18_i32_67 = arith.constant 18 : i32
    %128 = tpu.dynamic_rotate %5 by %c18_i32_67 dim 1 : vector<1x256xf32>, i32 -> vector<1x256xf32>
    %c15 = arith.constant 15 : index
    %c0_68 = arith.constant 0 : index
    %129 = vector.load %arg2[%c15, %c0_68] : memref<49x256xf32, #tpu.memory_space<vmem>>, vector<1x256xf32>
    %130 = arith.mulf %129, %127 : vector<1x256xf32>
    %131 = arith.addf %126, %130 : vector<1x256xf32>
    %c15_69 = arith.constant 15 : index
    %c0_70 = arith.constant 0 : index
    %132 = vector.load %arg3[%c15_69, %c0_70] : memref<49x256xf32, #tpu.memory_space<vmem>>, vector<1x256xf32>
    %133 = arith.mulf %132, %128 : vector<1x256xf32>
    %134 = arith.addf %131, %133 : vector<1x256xf32>
    %c17_i32 = arith.constant 17 : i32
    %135 = tpu.dynamic_rotate %2 by %c17_i32 dim 1 : vector<1x256xf32>, i32 -> vector<1x256xf32>
    %c17_i32_71 = arith.constant 17 : i32
    %136 = tpu.dynamic_rotate %5 by %c17_i32_71 dim 1 : vector<1x256xf32>, i32 -> vector<1x256xf32>
    %c16 = arith.constant 16 : index
    %c0_72 = arith.constant 0 : index
    %137 = vector.load %arg2[%c16, %c0_72] : memref<49x256xf32, #tpu.memory_space<vmem>>, vector<1x256xf32>
    %138 = arith.mulf %137, %135 : vector<1x256xf32>
    %139 = arith.addf %134, %138 : vector<1x256xf32>
    %c16_73 = arith.constant 16 : index
    %c0_74 = arith.constant 0 : index
    %140 = vector.load %arg3[%c16_73, %c0_74] : memref<49x256xf32, #tpu.memory_space<vmem>>, vector<1x256xf32>
    %141 = arith.mulf %140, %136 : vector<1x256xf32>
    %142 = arith.addf %139, %141 : vector<1x256xf32>
    %c16_i32 = arith.constant 16 : i32
    %143 = tpu.dynamic_rotate %2 by %c16_i32 dim 1 : vector<1x256xf32>, i32 -> vector<1x256xf32>
    %c16_i32_75 = arith.constant 16 : i32
    %144 = tpu.dynamic_rotate %5 by %c16_i32_75 dim 1 : vector<1x256xf32>, i32 -> vector<1x256xf32>
    %c17 = arith.constant 17 : index
    %c0_76 = arith.constant 0 : index
    %145 = vector.load %arg2[%c17, %c0_76] : memref<49x256xf32, #tpu.memory_space<vmem>>, vector<1x256xf32>
    %146 = arith.mulf %145, %143 : vector<1x256xf32>
    %147 = arith.addf %142, %146 : vector<1x256xf32>
    %c17_77 = arith.constant 17 : index
    %c0_78 = arith.constant 0 : index
    %148 = vector.load %arg3[%c17_77, %c0_78] : memref<49x256xf32, #tpu.memory_space<vmem>>, vector<1x256xf32>
    %149 = arith.mulf %148, %144 : vector<1x256xf32>
    %150 = arith.addf %147, %149 : vector<1x256xf32>
    %c15_i32 = arith.constant 15 : i32
    %151 = tpu.dynamic_rotate %2 by %c15_i32 dim 1 : vector<1x256xf32>, i32 -> vector<1x256xf32>
    %c15_i32_79 = arith.constant 15 : i32
    %152 = tpu.dynamic_rotate %5 by %c15_i32_79 dim 1 : vector<1x256xf32>, i32 -> vector<1x256xf32>
    %c18 = arith.constant 18 : index
    %c0_80 = arith.constant 0 : index
    %153 = vector.load %arg2[%c18, %c0_80] : memref<49x256xf32, #tpu.memory_space<vmem>>, vector<1x256xf32>
    %154 = arith.mulf %153, %151 : vector<1x256xf32>
    %155 = arith.addf %150, %154 : vector<1x256xf32>
    %c18_81 = arith.constant 18 : index
    %c0_82 = arith.constant 0 : index
    %156 = vector.load %arg3[%c18_81, %c0_82] : memref<49x256xf32, #tpu.memory_space<vmem>>, vector<1x256xf32>
    %157 = arith.mulf %156, %152 : vector<1x256xf32>
    %158 = arith.addf %155, %157 : vector<1x256xf32>
    %c14_i32 = arith.constant 14 : i32
    %159 = tpu.dynamic_rotate %2 by %c14_i32 dim 1 : vector<1x256xf32>, i32 -> vector<1x256xf32>
    %c14_i32_83 = arith.constant 14 : i32
    %160 = tpu.dynamic_rotate %5 by %c14_i32_83 dim 1 : vector<1x256xf32>, i32 -> vector<1x256xf32>
    %c19 = arith.constant 19 : index
    %c0_84 = arith.constant 0 : index
    %161 = vector.load %arg2[%c19, %c0_84] : memref<49x256xf32, #tpu.memory_space<vmem>>, vector<1x256xf32>
    %162 = arith.mulf %161, %159 : vector<1x256xf32>
    %163 = arith.addf %158, %162 : vector<1x256xf32>
    %c19_85 = arith.constant 19 : index
    %c0_86 = arith.constant 0 : index
    %164 = vector.load %arg3[%c19_85, %c0_86] : memref<49x256xf32, #tpu.memory_space<vmem>>, vector<1x256xf32>
    %165 = arith.mulf %164, %160 : vector<1x256xf32>
    %166 = arith.addf %163, %165 : vector<1x256xf32>
    %c13_i32 = arith.constant 13 : i32
    %167 = tpu.dynamic_rotate %2 by %c13_i32 dim 1 : vector<1x256xf32>, i32 -> vector<1x256xf32>
    %c13_i32_87 = arith.constant 13 : i32
    %168 = tpu.dynamic_rotate %5 by %c13_i32_87 dim 1 : vector<1x256xf32>, i32 -> vector<1x256xf32>
    %c20 = arith.constant 20 : index
    %c0_88 = arith.constant 0 : index
    %169 = vector.load %arg2[%c20, %c0_88] : memref<49x256xf32, #tpu.memory_space<vmem>>, vector<1x256xf32>
    %170 = arith.mulf %169, %167 : vector<1x256xf32>
    %171 = arith.addf %166, %170 : vector<1x256xf32>
    %c20_89 = arith.constant 20 : index
    %c0_90 = arith.constant 0 : index
    %172 = vector.load %arg3[%c20_89, %c0_90] : memref<49x256xf32, #tpu.memory_space<vmem>>, vector<1x256xf32>
    %173 = arith.mulf %172, %168 : vector<1x256xf32>
    %174 = arith.addf %171, %173 : vector<1x256xf32>
    %c3_i32 = arith.constant 3 : i32
    %175 = tpu.dynamic_rotate %2 by %c3_i32 dim 1 : vector<1x256xf32>, i32 -> vector<1x256xf32>
    %c3_i32_91 = arith.constant 3 : i32
    %176 = tpu.dynamic_rotate %5 by %c3_i32_91 dim 1 : vector<1x256xf32>, i32 -> vector<1x256xf32>
    %c21 = arith.constant 21 : index
    %c0_92 = arith.constant 0 : index
    %177 = vector.load %arg2[%c21, %c0_92] : memref<49x256xf32, #tpu.memory_space<vmem>>, vector<1x256xf32>
    %178 = arith.mulf %177, %175 : vector<1x256xf32>
    %179 = arith.addf %174, %178 : vector<1x256xf32>
    %c21_93 = arith.constant 21 : index
    %c0_94 = arith.constant 0 : index
    %180 = vector.load %arg3[%c21_93, %c0_94] : memref<49x256xf32, #tpu.memory_space<vmem>>, vector<1x256xf32>
    %181 = arith.mulf %180, %176 : vector<1x256xf32>
    %182 = arith.addf %179, %181 : vector<1x256xf32>
    %c2_i32 = arith.constant 2 : i32
    %183 = tpu.dynamic_rotate %2 by %c2_i32 dim 1 : vector<1x256xf32>, i32 -> vector<1x256xf32>
    %c2_i32_95 = arith.constant 2 : i32
    %184 = tpu.dynamic_rotate %5 by %c2_i32_95 dim 1 : vector<1x256xf32>, i32 -> vector<1x256xf32>
    %c22 = arith.constant 22 : index
    %c0_96 = arith.constant 0 : index
    %185 = vector.load %arg2[%c22, %c0_96] : memref<49x256xf32, #tpu.memory_space<vmem>>, vector<1x256xf32>
    %186 = arith.mulf %185, %183 : vector<1x256xf32>
    %187 = arith.addf %182, %186 : vector<1x256xf32>
    %c22_97 = arith.constant 22 : index
    %c0_98 = arith.constant 0 : index
    %188 = vector.load %arg3[%c22_97, %c0_98] : memref<49x256xf32, #tpu.memory_space<vmem>>, vector<1x256xf32>
    %189 = arith.mulf %188, %184 : vector<1x256xf32>
    %190 = arith.addf %187, %189 : vector<1x256xf32>
    %c1_i32 = arith.constant 1 : i32
    %191 = tpu.dynamic_rotate %2 by %c1_i32 dim 1 : vector<1x256xf32>, i32 -> vector<1x256xf32>
    %c1_i32_99 = arith.constant 1 : i32
    %192 = tpu.dynamic_rotate %5 by %c1_i32_99 dim 1 : vector<1x256xf32>, i32 -> vector<1x256xf32>
    %c23 = arith.constant 23 : index
    %c0_100 = arith.constant 0 : index
    %193 = vector.load %arg2[%c23, %c0_100] : memref<49x256xf32, #tpu.memory_space<vmem>>, vector<1x256xf32>
    %194 = arith.mulf %193, %191 : vector<1x256xf32>
    %195 = arith.addf %190, %194 : vector<1x256xf32>
    %c23_101 = arith.constant 23 : index
    %c0_102 = arith.constant 0 : index
    %196 = vector.load %arg3[%c23_101, %c0_102] : memref<49x256xf32, #tpu.memory_space<vmem>>, vector<1x256xf32>
    %197 = arith.mulf %196, %192 : vector<1x256xf32>
    %198 = arith.addf %195, %197 : vector<1x256xf32>
    %c24 = arith.constant 24 : index
    %c0_103 = arith.constant 0 : index
    %199 = vector.load %arg2[%c24, %c0_103] : memref<49x256xf32, #tpu.memory_space<vmem>>, vector<1x256xf32>
    %200 = arith.mulf %199, %2 : vector<1x256xf32>
    %201 = arith.addf %198, %200 : vector<1x256xf32>
    %c24_104 = arith.constant 24 : index
    %c0_105 = arith.constant 0 : index
    %202 = vector.load %arg3[%c24_104, %c0_105] : memref<49x256xf32, #tpu.memory_space<vmem>>, vector<1x256xf32>
    %203 = arith.mulf %202, %5 : vector<1x256xf32>
    %204 = arith.addf %201, %203 : vector<1x256xf32>
    %c255_i32 = arith.constant 255 : i32
    %205 = tpu.dynamic_rotate %2 by %c255_i32 dim 1 : vector<1x256xf32>, i32 -> vector<1x256xf32>
    %c255_i32_106 = arith.constant 255 : i32
    %206 = tpu.dynamic_rotate %5 by %c255_i32_106 dim 1 : vector<1x256xf32>, i32 -> vector<1x256xf32>
    %c25 = arith.constant 25 : index
    %c0_107 = arith.constant 0 : index
    %207 = vector.load %arg2[%c25, %c0_107] : memref<49x256xf32, #tpu.memory_space<vmem>>, vector<1x256xf32>
    %208 = arith.mulf %207, %205 : vector<1x256xf32>
    %209 = arith.addf %204, %208 : vector<1x256xf32>
    %c25_108 = arith.constant 25 : index
    %c0_109 = arith.constant 0 : index
    %210 = vector.load %arg3[%c25_108, %c0_109] : memref<49x256xf32, #tpu.memory_space<vmem>>, vector<1x256xf32>
    %211 = arith.mulf %210, %206 : vector<1x256xf32>
    %212 = arith.addf %209, %211 : vector<1x256xf32>
    %c254_i32 = arith.constant 254 : i32
    %213 = tpu.dynamic_rotate %2 by %c254_i32 dim 1 : vector<1x256xf32>, i32 -> vector<1x256xf32>
    %c254_i32_110 = arith.constant 254 : i32
    %214 = tpu.dynamic_rotate %5 by %c254_i32_110 dim 1 : vector<1x256xf32>, i32 -> vector<1x256xf32>
    %c26 = arith.constant 26 : index
    %c0_111 = arith.constant 0 : index
    %215 = vector.load %arg2[%c26, %c0_111] : memref<49x256xf32, #tpu.memory_space<vmem>>, vector<1x256xf32>
    %216 = arith.mulf %215, %213 : vector<1x256xf32>
    %217 = arith.addf %212, %216 : vector<1x256xf32>
    %c26_112 = arith.constant 26 : index
    %c0_113 = arith.constant 0 : index
    %218 = vector.load %arg3[%c26_112, %c0_113] : memref<49x256xf32, #tpu.memory_space<vmem>>, vector<1x256xf32>
    %219 = arith.mulf %218, %214 : vector<1x256xf32>
    %220 = arith.addf %217, %219 : vector<1x256xf32>
    %c253_i32 = arith.constant 253 : i32
    %221 = tpu.dynamic_rotate %2 by %c253_i32 dim 1 : vector<1x256xf32>, i32 -> vector<1x256xf32>
    %c253_i32_114 = arith.constant 253 : i32
    %222 = tpu.dynamic_rotate %5 by %c253_i32_114 dim 1 : vector<1x256xf32>, i32 -> vector<1x256xf32>
    %c27 = arith.constant 27 : index
    %c0_115 = arith.constant 0 : index
    %223 = vector.load %arg2[%c27, %c0_115] : memref<49x256xf32, #tpu.memory_space<vmem>>, vector<1x256xf32>
    %224 = arith.mulf %223, %221 : vector<1x256xf32>
    %225 = arith.addf %220, %224 : vector<1x256xf32>
    %c27_116 = arith.constant 27 : index
    %c0_117 = arith.constant 0 : index
    %226 = vector.load %arg3[%c27_116, %c0_117] : memref<49x256xf32, #tpu.memory_space<vmem>>, vector<1x256xf32>
    %227 = arith.mulf %226, %222 : vector<1x256xf32>
    %228 = arith.addf %225, %227 : vector<1x256xf32>
    %c243_i32 = arith.constant 243 : i32
    %229 = tpu.dynamic_rotate %2 by %c243_i32 dim 1 : vector<1x256xf32>, i32 -> vector<1x256xf32>
    %c243_i32_118 = arith.constant 243 : i32
    %230 = tpu.dynamic_rotate %5 by %c243_i32_118 dim 1 : vector<1x256xf32>, i32 -> vector<1x256xf32>
    %c28 = arith.constant 28 : index
    %c0_119 = arith.constant 0 : index
    %231 = vector.load %arg2[%c28, %c0_119] : memref<49x256xf32, #tpu.memory_space<vmem>>, vector<1x256xf32>
    %232 = arith.mulf %231, %229 : vector<1x256xf32>
    %233 = arith.addf %228, %232 : vector<1x256xf32>
    %c28_120 = arith.constant 28 : index
    %c0_121 = arith.constant 0 : index
    %234 = vector.load %arg3[%c28_120, %c0_121] : memref<49x256xf32, #tpu.memory_space<vmem>>, vector<1x256xf32>
    %235 = arith.mulf %234, %230 : vector<1x256xf32>
    %236 = arith.addf %233, %235 : vector<1x256xf32>
    %c242_i32 = arith.constant 242 : i32
    %237 = tpu.dynamic_rotate %2 by %c242_i32 dim 1 : vector<1x256xf32>, i32 -> vector<1x256xf32>
    %c242_i32_122 = arith.constant 242 : i32
    %238 = tpu.dynamic_rotate %5 by %c242_i32_122 dim 1 : vector<1x256xf32>, i32 -> vector<1x256xf32>
    %c29 = arith.constant 29 : index
    %c0_123 = arith.constant 0 : index
    %239 = vector.load %arg2[%c29, %c0_123] : memref<49x256xf32, #tpu.memory_space<vmem>>, vector<1x256xf32>
    %240 = arith.mulf %239, %237 : vector<1x256xf32>
    %241 = arith.addf %236, %240 : vector<1x256xf32>
    %c29_124 = arith.constant 29 : index
    %c0_125 = arith.constant 0 : index
    %242 = vector.load %arg3[%c29_124, %c0_125] : memref<49x256xf32, #tpu.memory_space<vmem>>, vector<1x256xf32>
    %243 = arith.mulf %242, %238 : vector<1x256xf32>
    %244 = arith.addf %241, %243 : vector<1x256xf32>
    %c241_i32 = arith.constant 241 : i32
    %245 = tpu.dynamic_rotate %2 by %c241_i32 dim 1 : vector<1x256xf32>, i32 -> vector<1x256xf32>
    %c241_i32_126 = arith.constant 241 : i32
    %246 = tpu.dynamic_rotate %5 by %c241_i32_126 dim 1 : vector<1x256xf32>, i32 -> vector<1x256xf32>
    %c30 = arith.constant 30 : index
    %c0_127 = arith.constant 0 : index
    %247 = vector.load %arg2[%c30, %c0_127] : memref<49x256xf32, #tpu.memory_space<vmem>>, vector<1x256xf32>
    %248 = arith.mulf %247, %245 : vector<1x256xf32>
    %249 = arith.addf %244, %248 : vector<1x256xf32>
    %c30_128 = arith.constant 30 : index
    %c0_129 = arith.constant 0 : index
    %250 = vector.load %arg3[%c30_128, %c0_129] : memref<49x256xf32, #tpu.memory_space<vmem>>, vector<1x256xf32>
    %251 = arith.mulf %250, %246 : vector<1x256xf32>
    %252 = arith.addf %249, %251 : vector<1x256xf32>
    %c240_i32 = arith.constant 240 : i32
    %253 = tpu.dynamic_rotate %2 by %c240_i32 dim 1 : vector<1x256xf32>, i32 -> vector<1x256xf32>
    %c240_i32_130 = arith.constant 240 : i32
    %254 = tpu.dynamic_rotate %5 by %c240_i32_130 dim 1 : vector<1x256xf32>, i32 -> vector<1x256xf32>
    %c31 = arith.constant 31 : index
    %c0_131 = arith.constant 0 : index
    %255 = vector.load %arg2[%c31, %c0_131] : memref<49x256xf32, #tpu.memory_space<vmem>>, vector<1x256xf32>
    %256 = arith.mulf %255, %253 : vector<1x256xf32>
    %257 = arith.addf %252, %256 : vector<1x256xf32>
    %c31_132 = arith.constant 31 : index
    %c0_133 = arith.constant 0 : index
    %258 = vector.load %arg3[%c31_132, %c0_133] : memref<49x256xf32, #tpu.memory_space<vmem>>, vector<1x256xf32>
    %259 = arith.mulf %258, %254 : vector<1x256xf32>
    %260 = arith.addf %257, %259 : vector<1x256xf32>
    %c239_i32 = arith.constant 239 : i32
    %261 = tpu.dynamic_rotate %2 by %c239_i32 dim 1 : vector<1x256xf32>, i32 -> vector<1x256xf32>
    %c239_i32_134 = arith.constant 239 : i32
    %262 = tpu.dynamic_rotate %5 by %c239_i32_134 dim 1 : vector<1x256xf32>, i32 -> vector<1x256xf32>
    %c32 = arith.constant 32 : index
    %c0_135 = arith.constant 0 : index
    %263 = vector.load %arg2[%c32, %c0_135] : memref<49x256xf32, #tpu.memory_space<vmem>>, vector<1x256xf32>
    %264 = arith.mulf %263, %261 : vector<1x256xf32>
    %265 = arith.addf %260, %264 : vector<1x256xf32>
    %c32_136 = arith.constant 32 : index
    %c0_137 = arith.constant 0 : index
    %266 = vector.load %arg3[%c32_136, %c0_137] : memref<49x256xf32, #tpu.memory_space<vmem>>, vector<1x256xf32>
    %267 = arith.mulf %266, %262 : vector<1x256xf32>
    %268 = arith.addf %265, %267 : vector<1x256xf32>
    %c238_i32 = arith.constant 238 : i32
    %269 = tpu.dynamic_rotate %2 by %c238_i32 dim 1 : vector<1x256xf32>, i32 -> vector<1x256xf32>
    %c238_i32_138 = arith.constant 238 : i32
    %270 = tpu.dynamic_rotate %5 by %c238_i32_138 dim 1 : vector<1x256xf32>, i32 -> vector<1x256xf32>
    %c33 = arith.constant 33 : index
    %c0_139 = arith.constant 0 : index
    %271 = vector.load %arg2[%c33, %c0_139] : memref<49x256xf32, #tpu.memory_space<vmem>>, vector<1x256xf32>
    %272 = arith.mulf %271, %269 : vector<1x256xf32>
    %273 = arith.addf %268, %272 : vector<1x256xf32>
    %c33_140 = arith.constant 33 : index
    %c0_141 = arith.constant 0 : index
    %274 = vector.load %arg3[%c33_140, %c0_141] : memref<49x256xf32, #tpu.memory_space<vmem>>, vector<1x256xf32>
    %275 = arith.mulf %274, %270 : vector<1x256xf32>
    %276 = arith.addf %273, %275 : vector<1x256xf32>
    %c237_i32 = arith.constant 237 : i32
    %277 = tpu.dynamic_rotate %2 by %c237_i32 dim 1 : vector<1x256xf32>, i32 -> vector<1x256xf32>
    %c237_i32_142 = arith.constant 237 : i32
    %278 = tpu.dynamic_rotate %5 by %c237_i32_142 dim 1 : vector<1x256xf32>, i32 -> vector<1x256xf32>
    %c34 = arith.constant 34 : index
    %c0_143 = arith.constant 0 : index
    %279 = vector.load %arg2[%c34, %c0_143] : memref<49x256xf32, #tpu.memory_space<vmem>>, vector<1x256xf32>
    %280 = arith.mulf %279, %277 : vector<1x256xf32>
    %281 = arith.addf %276, %280 : vector<1x256xf32>
    %c34_144 = arith.constant 34 : index
    %c0_145 = arith.constant 0 : index
    %282 = vector.load %arg3[%c34_144, %c0_145] : memref<49x256xf32, #tpu.memory_space<vmem>>, vector<1x256xf32>
    %283 = arith.mulf %282, %278 : vector<1x256xf32>
    %284 = arith.addf %281, %283 : vector<1x256xf32>
    %c227_i32 = arith.constant 227 : i32
    %285 = tpu.dynamic_rotate %2 by %c227_i32 dim 1 : vector<1x256xf32>, i32 -> vector<1x256xf32>
    %c227_i32_146 = arith.constant 227 : i32
    %286 = tpu.dynamic_rotate %5 by %c227_i32_146 dim 1 : vector<1x256xf32>, i32 -> vector<1x256xf32>
    %c35 = arith.constant 35 : index
    %c0_147 = arith.constant 0 : index
    %287 = vector.load %arg2[%c35, %c0_147] : memref<49x256xf32, #tpu.memory_space<vmem>>, vector<1x256xf32>
    %288 = arith.mulf %287, %285 : vector<1x256xf32>
    %289 = arith.addf %284, %288 : vector<1x256xf32>
    %c35_148 = arith.constant 35 : index
    %c0_149 = arith.constant 0 : index
    %290 = vector.load %arg3[%c35_148, %c0_149] : memref<49x256xf32, #tpu.memory_space<vmem>>, vector<1x256xf32>
    %291 = arith.mulf %290, %286 : vector<1x256xf32>
    %292 = arith.addf %289, %291 : vector<1x256xf32>
    %c226_i32 = arith.constant 226 : i32
    %293 = tpu.dynamic_rotate %2 by %c226_i32 dim 1 : vector<1x256xf32>, i32 -> vector<1x256xf32>
    %c226_i32_150 = arith.constant 226 : i32
    %294 = tpu.dynamic_rotate %5 by %c226_i32_150 dim 1 : vector<1x256xf32>, i32 -> vector<1x256xf32>
    %c36 = arith.constant 36 : index
    %c0_151 = arith.constant 0 : index
    %295 = vector.load %arg2[%c36, %c0_151] : memref<49x256xf32, #tpu.memory_space<vmem>>, vector<1x256xf32>
    %296 = arith.mulf %295, %293 : vector<1x256xf32>
    %297 = arith.addf %292, %296 : vector<1x256xf32>
    %c36_152 = arith.constant 36 : index
    %c0_153 = arith.constant 0 : index
    %298 = vector.load %arg3[%c36_152, %c0_153] : memref<49x256xf32, #tpu.memory_space<vmem>>, vector<1x256xf32>
    %299 = arith.mulf %298, %294 : vector<1x256xf32>
    %300 = arith.addf %297, %299 : vector<1x256xf32>
    %c225_i32 = arith.constant 225 : i32
    %301 = tpu.dynamic_rotate %2 by %c225_i32 dim 1 : vector<1x256xf32>, i32 -> vector<1x256xf32>
    %c225_i32_154 = arith.constant 225 : i32
    %302 = tpu.dynamic_rotate %5 by %c225_i32_154 dim 1 : vector<1x256xf32>, i32 -> vector<1x256xf32>
    %c37 = arith.constant 37 : index
    %c0_155 = arith.constant 0 : index
    %303 = vector.load %arg2[%c37, %c0_155] : memref<49x256xf32, #tpu.memory_space<vmem>>, vector<1x256xf32>
    %304 = arith.mulf %303, %301 : vector<1x256xf32>
    %305 = arith.addf %300, %304 : vector<1x256xf32>
    %c37_156 = arith.constant 37 : index
    %c0_157 = arith.constant 0 : index
    %306 = vector.load %arg3[%c37_156, %c0_157] : memref<49x256xf32, #tpu.memory_space<vmem>>, vector<1x256xf32>
    %307 = arith.mulf %306, %302 : vector<1x256xf32>
    %308 = arith.addf %305, %307 : vector<1x256xf32>
    %c224_i32 = arith.constant 224 : i32
    %309 = tpu.dynamic_rotate %2 by %c224_i32 dim 1 : vector<1x256xf32>, i32 -> vector<1x256xf32>
    %c224_i32_158 = arith.constant 224 : i32
    %310 = tpu.dynamic_rotate %5 by %c224_i32_158 dim 1 : vector<1x256xf32>, i32 -> vector<1x256xf32>
    %c38 = arith.constant 38 : index
    %c0_159 = arith.constant 0 : index
    %311 = vector.load %arg2[%c38, %c0_159] : memref<49x256xf32, #tpu.memory_space<vmem>>, vector<1x256xf32>
    %312 = arith.mulf %311, %309 : vector<1x256xf32>
    %313 = arith.addf %308, %312 : vector<1x256xf32>
    %c38_160 = arith.constant 38 : index
    %c0_161 = arith.constant 0 : index
    %314 = vector.load %arg3[%c38_160, %c0_161] : memref<49x256xf32, #tpu.memory_space<vmem>>, vector<1x256xf32>
    %315 = arith.mulf %314, %310 : vector<1x256xf32>
    %316 = arith.addf %313, %315 : vector<1x256xf32>
    %c223_i32 = arith.constant 223 : i32
    %317 = tpu.dynamic_rotate %2 by %c223_i32 dim 1 : vector<1x256xf32>, i32 -> vector<1x256xf32>
    %c223_i32_162 = arith.constant 223 : i32
    %318 = tpu.dynamic_rotate %5 by %c223_i32_162 dim 1 : vector<1x256xf32>, i32 -> vector<1x256xf32>
    %c39 = arith.constant 39 : index
    %c0_163 = arith.constant 0 : index
    %319 = vector.load %arg2[%c39, %c0_163] : memref<49x256xf32, #tpu.memory_space<vmem>>, vector<1x256xf32>
    %320 = arith.mulf %319, %317 : vector<1x256xf32>
    %321 = arith.addf %316, %320 : vector<1x256xf32>
    %c39_164 = arith.constant 39 : index
    %c0_165 = arith.constant 0 : index
    %322 = vector.load %arg3[%c39_164, %c0_165] : memref<49x256xf32, #tpu.memory_space<vmem>>, vector<1x256xf32>
    %323 = arith.mulf %322, %318 : vector<1x256xf32>
    %324 = arith.addf %321, %323 : vector<1x256xf32>
    %c222_i32 = arith.constant 222 : i32
    %325 = tpu.dynamic_rotate %2 by %c222_i32 dim 1 : vector<1x256xf32>, i32 -> vector<1x256xf32>
    %c222_i32_166 = arith.constant 222 : i32
    %326 = tpu.dynamic_rotate %5 by %c222_i32_166 dim 1 : vector<1x256xf32>, i32 -> vector<1x256xf32>
    %c40 = arith.constant 40 : index
    %c0_167 = arith.constant 0 : index
    %327 = vector.load %arg2[%c40, %c0_167] : memref<49x256xf32, #tpu.memory_space<vmem>>, vector<1x256xf32>
    %328 = arith.mulf %327, %325 : vector<1x256xf32>
    %329 = arith.addf %324, %328 : vector<1x256xf32>
    %c40_168 = arith.constant 40 : index
    %c0_169 = arith.constant 0 : index
    %330 = vector.load %arg3[%c40_168, %c0_169] : memref<49x256xf32, #tpu.memory_space<vmem>>, vector<1x256xf32>
    %331 = arith.mulf %330, %326 : vector<1x256xf32>
    %332 = arith.addf %329, %331 : vector<1x256xf32>
    %c221_i32 = arith.constant 221 : i32
    %333 = tpu.dynamic_rotate %2 by %c221_i32 dim 1 : vector<1x256xf32>, i32 -> vector<1x256xf32>
    %c221_i32_170 = arith.constant 221 : i32
    %334 = tpu.dynamic_rotate %5 by %c221_i32_170 dim 1 : vector<1x256xf32>, i32 -> vector<1x256xf32>
    %c41 = arith.constant 41 : index
    %c0_171 = arith.constant 0 : index
    %335 = vector.load %arg2[%c41, %c0_171] : memref<49x256xf32, #tpu.memory_space<vmem>>, vector<1x256xf32>
    %336 = arith.mulf %335, %333 : vector<1x256xf32>
    %337 = arith.addf %332, %336 : vector<1x256xf32>
    %c41_172 = arith.constant 41 : index
    %c0_173 = arith.constant 0 : index
    %338 = vector.load %arg3[%c41_172, %c0_173] : memref<49x256xf32, #tpu.memory_space<vmem>>, vector<1x256xf32>
    %339 = arith.mulf %338, %334 : vector<1x256xf32>
    %340 = arith.addf %337, %339 : vector<1x256xf32>
    %c211_i32 = arith.constant 211 : i32
    %341 = tpu.dynamic_rotate %2 by %c211_i32 dim 1 : vector<1x256xf32>, i32 -> vector<1x256xf32>
    %c211_i32_174 = arith.constant 211 : i32
    %342 = tpu.dynamic_rotate %5 by %c211_i32_174 dim 1 : vector<1x256xf32>, i32 -> vector<1x256xf32>
    %c42 = arith.constant 42 : index
    %c0_175 = arith.constant 0 : index
    %343 = vector.load %arg2[%c42, %c0_175] : memref<49x256xf32, #tpu.memory_space<vmem>>, vector<1x256xf32>
    %344 = arith.mulf %343, %341 : vector<1x256xf32>
    %345 = arith.addf %340, %344 : vector<1x256xf32>
    %c42_176 = arith.constant 42 : index
    %c0_177 = arith.constant 0 : index
    %346 = vector.load %arg3[%c42_176, %c0_177] : memref<49x256xf32, #tpu.memory_space<vmem>>, vector<1x256xf32>
    %347 = arith.mulf %346, %342 : vector<1x256xf32>
    %348 = arith.addf %345, %347 : vector<1x256xf32>
    %c210_i32 = arith.constant 210 : i32
    %349 = tpu.dynamic_rotate %2 by %c210_i32 dim 1 : vector<1x256xf32>, i32 -> vector<1x256xf32>
    %c210_i32_178 = arith.constant 210 : i32
    %350 = tpu.dynamic_rotate %5 by %c210_i32_178 dim 1 : vector<1x256xf32>, i32 -> vector<1x256xf32>
    %c43 = arith.constant 43 : index
    %c0_179 = arith.constant 0 : index
    %351 = vector.load %arg2[%c43, %c0_179] : memref<49x256xf32, #tpu.memory_space<vmem>>, vector<1x256xf32>
    %352 = arith.mulf %351, %349 : vector<1x256xf32>
    %353 = arith.addf %348, %352 : vector<1x256xf32>
    %c43_180 = arith.constant 43 : index
    %c0_181 = arith.constant 0 : index
    %354 = vector.load %arg3[%c43_180, %c0_181] : memref<49x256xf32, #tpu.memory_space<vmem>>, vector<1x256xf32>
    %355 = arith.mulf %354, %350 : vector<1x256xf32>
    %356 = arith.addf %353, %355 : vector<1x256xf32>
    %c209_i32 = arith.constant 209 : i32
    %357 = tpu.dynamic_rotate %2 by %c209_i32 dim 1 : vector<1x256xf32>, i32 -> vector<1x256xf32>
    %c209_i32_182 = arith.constant 209 : i32
    %358 = tpu.dynamic_rotate %5 by %c209_i32_182 dim 1 : vector<1x256xf32>, i32 -> vector<1x256xf32>
    %c44 = arith.constant 44 : index
    %c0_183 = arith.constant 0 : index
    %359 = vector.load %arg2[%c44, %c0_183] : memref<49x256xf32, #tpu.memory_space<vmem>>, vector<1x256xf32>
    %360 = arith.mulf %359, %357 : vector<1x256xf32>
    %361 = arith.addf %356, %360 : vector<1x256xf32>
    %c44_184 = arith.constant 44 : index
    %c0_185 = arith.constant 0 : index
    %362 = vector.load %arg3[%c44_184, %c0_185] : memref<49x256xf32, #tpu.memory_space<vmem>>, vector<1x256xf32>
    %363 = arith.mulf %362, %358 : vector<1x256xf32>
    %364 = arith.addf %361, %363 : vector<1x256xf32>
    %c208_i32 = arith.constant 208 : i32
    %365 = tpu.dynamic_rotate %2 by %c208_i32 dim 1 : vector<1x256xf32>, i32 -> vector<1x256xf32>
    %c208_i32_186 = arith.constant 208 : i32
    %366 = tpu.dynamic_rotate %5 by %c208_i32_186 dim 1 : vector<1x256xf32>, i32 -> vector<1x256xf32>
    %c45 = arith.constant 45 : index
    %c0_187 = arith.constant 0 : index
    %367 = vector.load %arg2[%c45, %c0_187] : memref<49x256xf32, #tpu.memory_space<vmem>>, vector<1x256xf32>
    %368 = arith.mulf %367, %365 : vector<1x256xf32>
    %369 = arith.addf %364, %368 : vector<1x256xf32>
    %c45_188 = arith.constant 45 : index
    %c0_189 = arith.constant 0 : index
    %370 = vector.load %arg3[%c45_188, %c0_189] : memref<49x256xf32, #tpu.memory_space<vmem>>, vector<1x256xf32>
    %371 = arith.mulf %370, %366 : vector<1x256xf32>
    %372 = arith.addf %369, %371 : vector<1x256xf32>
    %c207_i32 = arith.constant 207 : i32
    %373 = tpu.dynamic_rotate %2 by %c207_i32 dim 1 : vector<1x256xf32>, i32 -> vector<1x256xf32>
    %c207_i32_190 = arith.constant 207 : i32
    %374 = tpu.dynamic_rotate %5 by %c207_i32_190 dim 1 : vector<1x256xf32>, i32 -> vector<1x256xf32>
    %c46 = arith.constant 46 : index
    %c0_191 = arith.constant 0 : index
    %375 = vector.load %arg2[%c46, %c0_191] : memref<49x256xf32, #tpu.memory_space<vmem>>, vector<1x256xf32>
    %376 = arith.mulf %375, %373 : vector<1x256xf32>
    %377 = arith.addf %372, %376 : vector<1x256xf32>
    %c46_192 = arith.constant 46 : index
    %c0_193 = arith.constant 0 : index
    %378 = vector.load %arg3[%c46_192, %c0_193] : memref<49x256xf32, #tpu.memory_space<vmem>>, vector<1x256xf32>
    %379 = arith.mulf %378, %374 : vector<1x256xf32>
    %380 = arith.addf %377, %379 : vector<1x256xf32>
    %c206_i32 = arith.constant 206 : i32
    %381 = tpu.dynamic_rotate %2 by %c206_i32 dim 1 : vector<1x256xf32>, i32 -> vector<1x256xf32>
    %c206_i32_194 = arith.constant 206 : i32
    %382 = tpu.dynamic_rotate %5 by %c206_i32_194 dim 1 : vector<1x256xf32>, i32 -> vector<1x256xf32>
    %c47 = arith.constant 47 : index
    %c0_195 = arith.constant 0 : index
    %383 = vector.load %arg2[%c47, %c0_195] : memref<49x256xf32, #tpu.memory_space<vmem>>, vector<1x256xf32>
    %384 = arith.mulf %383, %381 : vector<1x256xf32>
    %385 = arith.addf %380, %384 : vector<1x256xf32>
    %c47_196 = arith.constant 47 : index
    %c0_197 = arith.constant 0 : index
    %386 = vector.load %arg3[%c47_196, %c0_197] : memref<49x256xf32, #tpu.memory_space<vmem>>, vector<1x256xf32>
    %387 = arith.mulf %386, %382 : vector<1x256xf32>
    %388 = arith.addf %385, %387 : vector<1x256xf32>
    %c205_i32 = arith.constant 205 : i32
    %389 = tpu.dynamic_rotate %2 by %c205_i32 dim 1 : vector<1x256xf32>, i32 -> vector<1x256xf32>
    %c205_i32_198 = arith.constant 205 : i32
    %390 = tpu.dynamic_rotate %5 by %c205_i32_198 dim 1 : vector<1x256xf32>, i32 -> vector<1x256xf32>
    %c48 = arith.constant 48 : index
    %c0_199 = arith.constant 0 : index
    %391 = vector.load %arg2[%c48, %c0_199] : memref<49x256xf32, #tpu.memory_space<vmem>>, vector<1x256xf32>
    %392 = arith.mulf %391, %389 : vector<1x256xf32>
    %393 = arith.addf %388, %392 : vector<1x256xf32>
    %c48_200 = arith.constant 48 : index
    %c0_201 = arith.constant 0 : index
    %394 = vector.load %arg3[%c48_200, %c0_201] : memref<49x256xf32, #tpu.memory_space<vmem>>, vector<1x256xf32>
    %395 = arith.mulf %394, %390 : vector<1x256xf32>
    %396 = arith.addf %393, %395 : vector<1x256xf32>
    %c0_202 = arith.constant 0 : index
    %397 = memref.load %arg4[%c0_202] : memref<1xf32, #tpu.memory_space<smem>>
    %398 = vector.broadcast %397 : f32 to vector<1x256xf32>
    %399 = arith.addf %396, %398 : vector<1x256xf32>
    %cst_203 = arith.constant 0.000000e+00 : f32
    %400 = vector.broadcast %cst_203 : f32 to vector<1x256xf32>
    %401 = arith.subf %400, %399 : vector<1x256xf32>
    %402 = math.exp %401 : vector<1x256xf32>
    %cst_204 = arith.constant 1.000000e+00 : f32
    %403 = vector.broadcast %cst_204 : f32 to vector<1x256xf32>
    %404 = arith.addf %403, %402 : vector<1x256xf32>
    %405 = tpu.reciprocal %404 : vector<1x256xf32> -> vector<1x256xf32>
    %c0_205 = arith.constant 0 : index
    %c0_206 = arith.constant 0 : index
    %c0_207 = arith.constant 0 : index
    %406 = vector.load %arg5[%c0_205, %c0_206, %c0_207] : memref<1x1x256xf32, #tpu.memory_space<vmem>>, vector<1x1x256xf32>
    %407 = vector.shape_cast %406 : vector<1x1x256xf32> to vector<1x256xf32>
    %408 = vector.shape_cast %405 : vector<1x256xf32> to vector<1x1x256xf32>
    tpu.vector_store %arg5[%c0_205, %c0_206, %c0_207], %408 {strides = array<i32>} : memref<1x1x256xf32, #tpu.memory_space<vmem>>, vector<1x1x256xf32>,
    return
  }
  func.func @transform_0(%arg0: i32) -> (i32, i32, i32, i32) {
    %c0_i32 = arith.constant 0 : i32
    %c0_i32_0 = arith.constant 0 : i32
    %c0_i32_1 = arith.constant 0 : i32
    %c0_i32_2 = arith.constant 0 : i32
    return %arg0, %c0_i32, %c0_i32_0, %c0_i32_1 : i32, i32, i32, i32
  }
  func.func @transform_1(%arg0: i32) -> (i32, i32) {
    %c0_i32 = arith.constant 0 : i32
    %c0_i32_0 = arith.constant 0 : i32
    %c0_i32_1 = arith.constant 0 : i32
    return %c0_i32, %c0_i32_0 : i32, i32
  }
  func.func @transform_2(%arg0: i32) -> (i32, i32) {
    %c0_i32 = arith.constant 0 : i32
    %c0_i32_0 = arith.constant 0 : i32
    %c0_i32_1 = arith.constant 0 : i32
    return %c0_i32, %c0_i32_0 : i32, i32
  }
  func.func @transform_3(%arg0: i32) -> i32 {
    %c0_i32 = arith.constant 0 : i32
    %c0_i32_0 = arith.constant 0 : i32
    return %c0_i32 : i32
  }
  func.func @transform_4(%arg0: i32) -> (i32, i32, i32) {
    %c0_i32 = arith.constant 0 : i32
    %c0_i32_0 = arith.constant 0 : i32
    %c0_i32_1 = arith.constant 0 : i32
    return %arg0, %c0_i32, %c0_i32_0 : i32, i32, i32
  }
}

</mosaic_0001>

<bundles_post_ra>
// kernel: tpu_custom_call.1
= control target key start
LH: loop header
LB: loop body
LE: loop exit
PB: predicated region body
PF: predicated region fallthrough
CT: control target
= control target key end

     0   :  { %s4971_s0 = inlined_call_operand.hbm [shape: f32[2,4,1,256], index: 0, kind: input, shape index: {}]   ;;  %s4972_s1 = inlined_call_operand.hbm [shape: f32[49,256], index: 1, kind: input, shape index: {}]   ;;  %s4973_s2 = inlined_call_operand.hbm [shape: f32[49,256], index: 2, kind: input, shape index: {}]   ;;  %s4974_s3 = inlined_call_operand.<no memory space> [shape: f32[1], index: 3, kind: input, shape index: {}]   ;;  %s4975_s4 = inlined_call_operand.hbm [shape: f32[2,1,256], index: 4, kind: output, shape index: {}]  }
   0x1   :  { %9 = sst [smem:[#allocation2]] %s4974_s3 }
   0x2   :  { %10 = vsyncpa [#allocation4], 0 }
   0x3   :  { %12 = vsyncpa [#allocation4 + $0x1], 0 }
   0x4   :  { %13 = vsyncpa [#allocation7], 0 }
   0x5   :  { %14 = vsyncpa [#allocation5], 0 }
   0x6   :  { %16 = vsyncpa [#allocation5 + $0x1], 0  ;;  %s3588_s17 = smov 0   ;;  %s3590_s18 = smov 0  }
   0x7   :  { %s3592_s19 = smov 0   ;;  %s3594_s20 = smov 0  }
   0x8 LB: > { %s3609_s3 = sadd.s32 4294967295, %s3501_s20   ;;  %s3209_s21 = sadd.s32 4294967294, %s3501_s20   ;;  %s3501_s20 = sphi %s3594_s20, %s4999_s20   ;;  %s3497_s19 = sphi %s3592_s19, %s4998_s19   ;;  %s3493_s18 = sphi %s3590_s18, %s4997_s18   ;;  %s3489_s17 = sphi %s3588_s17, %s4996_s17  }
   0x9   : > { %p42_p0 = scmp.ne.s32.totalorder %s3493_s18, %s3489_s17  ;;  %p4976_p1 = scmp.eq.s32.totalorder %s3609_s3, 0 }
   0xa   : > { %p135_p3 = scmp.eq.s32.totalorder %s3209_s21, 1  ;;  %p3210_p5 = scmp.ge.s32.totalorder %s3501_s20, 1 }
   0xb   : > { %p3618_p4 = por %p4976_p1, %p42_p0  ;;  %p142_p7 = scmp.lt.s32.totalorder %s3501_s20, 3 }
   0xc   : > { %p3623_p6 = por %p135_p3, %p42_p0  ;;  %s3503_s25 = smov [#allocation6]  }
   0xd   : > { %s4980_s22 = scalar_select %p3618_p4, 1, 0 }
   0xe   : > { %s4981_s23 = scalar_select %p3623_p6, 1, 0 }
   0xf   : > { %p3628_p8 = pnand %p3210_p5, %p142_p7  ;;  %s154_s26 = sshll.u32 %s3503_s25, 4  ;;  %s155_s26 = int_to_ptr.vmem [resolvable:$true] %s154_s26 }
  0x10   : > { %s3504_s28 = smov [#allocation8]   ;;  %s3364_s30 = scalar_lea.vmem %s155_s26, 1792 }
  0x11   : > { %s4982_s24 = scalar_select %p3628_p8, 1, 0 }
  0x12   : > { %p3241_p9 = pneg %p3628_p8  ;;  %s167_s29 = sshll.u32 %s3504_s28, 4  ;;  %s168_s29 = int_to_ptr.vmem [resolvable:$true] %s167_s29 }
  0x13   : > { %p3365_p13 = scmp.ne.s32.totalorder %s155_s26, %s3364_s30  ;;  %p3372_p5 = scmp.lt.s32.totalorder %s155_s26, %s155_s26 }
  0x14   : > { %p3637_p11 = pnand %p3241_p9, %p4976_p1  ;;  %p3373_p7 = scmp.lt.s32.totalorder %s3364_s30, %s3364_s30 }
  0x16   : > { %p3355_p12 = pneg %p3637_p11  ;;  %p3374_p10 = por %p3373_p7, %p3372_p5 }
  0x18   : > { %p3367_p0 = pnand %p3365_p13, %p3355_p12 }
  0x1a   : > { %p3368_p3 = pneg %p3367_p0 }
  0x1c   : > { %p3375_p9 = pnand %p3374_p10, %p3368_p3 }
  0x1e   : > { %3378 = shalt.err (!%p3375_p9)
}
  0x1f   : > { %s3505_s5 = smov 256   ;;  %s3506_s6 = smov 16  }
  0x20   : > { %3244 = dma.hbm_to_vmem [thread:$0]  (!%p3637_p11), %s4972_s1, 1792, %s155_s26, [#allocation7], %s3505_s5, %s3505_s5, %s3506_s6  }
  0x21   : > { %s3390_s9 = scalar_lea.vmem %s168_s29, 1792  ;;  %p3398_p2 = scmp.lt.s32.totalorder %s168_s29, %s168_s29 }
  0x22   : > { %p3391_p1 = scmp.ne.s32.totalorder %s168_s29, %s3390_s9  ;;  %p3399_p6 = scmp.lt.s32.totalorder %s3390_s9, %s3390_s9 }
  0x24   : > { %p3393_p13 = pnand %p3391_p1, %p3355_p12  ;;  %p3400_p5 = por %p3399_p6, %p3398_p2 }
  0x26   : > { %p3394_p0 = pneg %p3393_p13 }
  0x28   : > { %p3401_p10 = pnand %p3400_p5, %p3394_p0 }
  0x2a   : > { %3404 = shalt.err (!%p3401_p10)
}
  0x2b   : > { %3247 = dma.hbm_to_vmem [thread:$0]  (!%p3637_p11), %s4973_s2, 1792, %s168_s29, [#allocation7], %s3505_s5, %s3505_s5, %s3506_s6  }
  0x2c   : > { %s3660_s12 = sadd.s32 1, %s3501_s20   ;;  %s29_s13 = sadd.s32 1, %s3497_s19 }
  0x2d   : > { %s26_s14 = ssub.s32 %s3501_s20, %s3660_s12  ;;  %p36_p1 = scmp.ne.s32.totalorder %s3497_s19, %s3493_s18 }
  0x2e   : > { %p27_p2 = scmp.eq.s32.totalorder %s26_s14, 0  ;;  %p37_p6 = scmp.eq.s32.totalorder %s3501_s20, 0 }
  0x2f   : > { %p4984_p12 = scmp.eq.s32.totalorder %s3609_s3, 1  ;;  %p3258_p7 = scmp.lt.s32.totalorder %s3501_s20, 2 }
  0x30   : > { %s3676_s16 = scalar_select %p27_p2, %s3497_s19, %s29_s13  }
  0x31   : > { %p3670_p3 = por %p4984_p12, %p36_p1  ;;  %p38_p9 = por %p37_p6, %p36_p1 }
  0x32   : > { %s184_s21 = sand.u32 1, %s3497_s19   ;;  %s3227_s26 = sshll.u32 %s3501_s20, 7 }
  0x33   : > { %s4985_s15 = scalar_select %p3670_p3, 1, 0 }
  0x34   : > { %s3214_s25 = sshll.u32 %s184_s21, 3  ;;  %s3683_s29 = scalar_lea.hbm %s4971_s0, %s3227_s26 }
  0x35   : > { %s188_s30 = scalar_lea.vmem [#allocation3], %s3214_s25  ;;  %p3687_p11 = pnand %p3258_p7, %p38_p9 }
  0x36   : > { %s195_s5 = sshll.u32 %s188_s30, 4  ;;  %s3691_s7 = scalar_lea.sflag [#allocation4], %s184_s21  ;;  %s3685_s5 = int_to_ptr.vmem [resolvable:$true] %s195_s5 }
  0x37   : > { %s3405_s8 = scalar_lea.hbm %s3683_s29, 128  ;;  %p3407_p0 = pneg %p3687_p11 }
  0x38   : > { %p3406_p13 = scmp.ne.s32.totalorder %s3683_s29, %s3405_s8  ;;  %s3410_s11 = scalar_lea.hbm %s4971_s0, 256 }
  0x39   : > { %p3411_p1 = scmp.lt.s32.totalorder %s3683_s29, %s4971_s0  ;;  %p3412_p2 = scmp.lt.s32.totalorder %s3410_s11, %s3405_s8 }
  0x3a   : > { %p3408_p5 = pnand %p3407_p0, %p3406_p13 }
  0x3b   : > { %p3413_p6 = por %p3412_p2, %p3411_p1 }
  0x3c   : > { %p3409_p10 = pneg %p3408_p5 }
  0x3e   : > { %p3414_p12 = pnand %p3413_p6, %p3409_p10 }
  0x40   : > { %3417 = shalt.err (!%p3414_p12)
}
  0x41   : > { %s3418_s21 = scalar_lea.vmem %s3685_s5, 128  ;;  %s3507_s25 = smov [#allocation3]  }
  0x42   : > { %p3419_p7 = scmp.ne.s32.totalorder %s3685_s5, %s3418_s21  ;;  %s3423_s26 = sshll.u32 %s3507_s25, 4  ;;  %s3424_s26 = int_to_ptr.vmem [resolvable:$false] %s3423_s26 }
  0x43   : > { %s3425_s27 = scalar_lea.vmem %s3424_s26, 256  ;;  %p3426_p5 = scmp.lt.s32.totalorder %s3685_s5, %s3424_s26 }
  0x44   : > { %p3421_p9 = pnand %p3419_p7, %p3407_p0  ;;  %p3427_p3 = scmp.lt.s32.totalorder %s3425_s27, %s3418_s21 }
  0x46   : > { %p3422_p13 = pneg %p3421_p9  ;;  %p3428_p4 = por %p3427_p3, %p3426_p5 }
  0x48   : > { %p3429_p8 = pnand %p3428_p4, %p3422_p13 }
  0x4a   : > { %3432 = shalt.err (!%p3429_p8)
}
  0x4b   : > { %s3508_s28 = smov 32   ;;  %s3509_s30 = smov 2  }
  0x4c   : > { %3251 = dma.hbm_to_vmem [thread:$0]  (!%p3687_p11), %s3683_s29, 128, %s3685_s5, %s3691_s7, %s3508_s28, %s3508_s28, %s3509_s30  }
  0x4d   : > { %p4987_p0 = scmp.ne.s32.totalorder %s4982_s24, 0 }
  0x4e   : > { %s3715_s8 = sand.u32 (!%p4987_p0), 1, %s3493_s18   ;;  %p4988_p4 = scmp.ne.s32.totalorder (!%p4987_p0), %s4980_s22, 0 }
  0x4f   : > { %207 = sbr.rel (%p4987_p0) target bundleno = 655 (0x28f), region = 36  ;;  %s3218_s9 = sshll.u32 (!%p4987_p0), %s3715_s8, 3 }
  0x50   : > { %s210_s10 = scalar_lea.sflag (!%p4987_p0), [#allocation4], %s3715_s8  ;;  %s213_s11 = scalar_lea.vmem (!%p4987_p0), [#allocation3], %s3218_s9 }
  0x54   : > { %3476 = dma.done.wait (%p4988_p4), %s210_s10, 128  }
  0x55   : > { %3478 = vsyncadd (%p4988_p4), %s210_s10, 4294967168  ;;  %p4989_p8 = scmp.eq.s32.totalorder %s3609_s3, 0 }
  0x57   : > { %3480 = dma.done.wait (%p4989_p8), [#allocation7], 3584   ;;  %p4990_p3 = pmov %p4989_p8 }
  0x58   : > { %v250_v0 = vlaneseq  ;;  %vm305_vm1 = vcmask 1040384   ;;  %v246_v5 = vld [vmem:[%s213_s11] sm:$0x3]  ;;  %v247_v6 = vld [vmem:[%s213_s11 + $0x2] sm:$0x3]  ;;  %s3510_s22 = smov 50  }
  0x59   : > { %3482 = vsyncadd (%p4990_p3), [#allocation7], 4294963712  ;;  %v248_v7 = vld [vmem:[%s213_s11 + $0x4] sm:$0x3]  ;;  %v249_v8 = vld [vmem:[%s213_s11 + $0x6] sm:$0x3] }
  0x5a   : > { %v3728_v1 = vshrl.u32 %v250_v0, 7  ;;  %vm3732_vm0 = vcmp.lt.s32.totalorder %v250_v0, 256  ;;  %s3511_s24 = smov 51   ;;  %s3512_s29 = smov 49  }
  0x5b   : > { %v254_v9 = vsel %vm3732_vm0, %v246_v5, -inf  ;;  %v255_v10 = vsel %vm3732_vm0, %v247_v6, -inf  ;;  %v256_v11 = vsel %vm3732_vm0, %v248_v7, -inf  ;;  %v257_v13 = vsel %vm3732_vm0, %v249_v8, -inf  ;;  %s3513_s5 = smov 48   ;;  %s3514_s6 = smov 47  }
  0x5c   : > { %v267_v2 = vsub.s32 0, %v3728_v1  ;;  %v271_v4 = vsub.s32 1, %v3728_v1  ;;  %v258_v14 = vmax.f32 %v254_v9, %v255_v10  ;;  %v259_v17 = vmax.f32 %v256_v11, %v257_v13  ;;  %s3515_s7 = smov 46   ;;  %s3516_s13 = smov 45  }
  0x5d   : > { %s3517_s14 = smov 35   ;;  %s3518_s21 = smov 34   ;;  %v3918_v13 = vand.u32 127, %v250_v0 }
  0x5e   : > { %v268_v12 = vrot.slane %v246_v5, %v267_v2  ;;  %v272_v15 = vrot.slane %v246_v5, %v271_v4  ;;  %v276_v16 = vrot.slane %v247_v6, %v267_v2  ;;  %v280_v18 = vrot.slane %v247_v6, %v271_v4  ;;  %s3519_s25 = smov 33   ;;  %s3520_s26 = smov 32  }
  0x5f   : > { %v284_v19 = vrot.slane %v248_v7, %v267_v2  ;;  %v288_v20 = vrot.slane %v248_v7, %v271_v4  ;;  %v292_v21 = vrot.slane %v249_v8, %v267_v2  ;;  %v3747_v24 = vmax.f32 %v258_v14, %v259_v17  ;;  %s3521_s27 = smov 31   ;;  %s3522_s28 = smov 30  }
  0x60   : > { %v306_v22 = vsel %vm305_vm1, %v268_v12, 0.0  ;;  %v307_v23 = vsel %vm305_vm1, %v276_v16, 0.0  ;;  %v313_v27 = vsel %vm305_vm1, %v272_v15, 0.0  ;;  %v296_v28 = vrot.slane %v249_v8, %v271_v4  ;;  %s3523_s30 = smov 29   ;;  %s3524_s9 = smov 19  }
  0x61   : > { %v308_v25 = vadd.f32 %v307_v23, %v306_v22  ;;  %v309_v26 = vsel %vm305_vm1, %v284_v19, 0.0  ;;  %v311_v29 = vsel %vm305_vm1, %v292_v21, 0.0  ;;  %v314_v30 = vsel %vm305_vm1, %v280_v18, 0.0  ;;  %s3525_s10 = smov 18   ;;  %s3526_s11 = smov 17  }
  0x62   : > { %v316_v31 = vsel %vm305_vm1, %v288_v20, 0.0  ;;  %v315_v33 = vadd.f32 %v314_v30, %v313_v27  ;;  %v3755_v34 = vrot.slane %v3747_v24, %v271_v4  ;;  %v3758_v35 = vrot.slane %v3747_v24, %v267_v2  ;;  %p4993_p10 = scmp.ne.s32.totalorder %s4985_s15, 0 }
  0x63   : > { %v310_v32 = vadd.f32 %v309_v26, %v308_v25  ;;  %v318_v38 = vsel %vm305_vm1, %v296_v28, 0.0  ;;  %v3533_v14 = vmov 1966171168   ;;  %vm340_vm2 = vcmp.lt.s32.totalorder %v3918_v13, 51 }
  0x64   : > { %v317_v37 = vadd.f32 %v316_v31, %v315_v33  ;;  %393 = vrot.lane.b32.xlu1 %v3755_v34, %s3510_s22  ;;  %334 = vrot.lane.b32.xlu0 %v3758_v35, %s3511_s24  ;;  %v354_v15 = vunpack.c.l.s4 %v3533_v14  ;;  %vm395_vm3 = vcmp.lt.s32.totalorder %v3918_v13, 50  ;;  %vm452_vm4 = vcmp.lt.s32.totalorder %v3918_v13, 49 }
  0x65   : > { %v312_v36 = vadd.f32 %v311_v29, %v310_v32  ;;  %vm509_vm5 = vcmp.lt.s32.totalorder %v3918_v13, 48  ;;  %vm566_vm6 = vcmp.lt.s32.totalorder %v3918_v13, 47  ;;  %vm623_vm7 = vcmp.lt.s32.totalorder %v3918_v13, 46 }
  0x66   : > { %v319_v39 = vadd.f32 %v318_v38, %v317_v37  ;;  %v355_v19 = vunpack.c.0.s8 %v354_v15  ;;  %vm680_vm8 = vcmp.lt.s32.totalorder %v3918_v13, 45  ;;  %vm737_vm9 = vcmp.lt.s32.totalorder %v3918_v13, 35 }
  0x67   : > { %v3763_v40 = vmul.f32 0.25, %v312_v36  ;;  %vm794_vm10 = vcmp.lt.s32.totalorder %v3918_v13, 34  ;;  %vm851_vm11 = vcmp.lt.s32.totalorder %v3918_v13, 33  ;;  %vm908_vm12 = vcmp.lt.s32.totalorder %v3918_v13, 32 }
  0x68   : > { %450 = vrot.lane.b32.xlu1 %v3755_v34, %s3512_s29  ;;  %336 = vrot.lane.b32.xlu0 %v3755_v34, %s3511_s24  ;;  %v3767_v41 = vmul.f32 0.25, %v319_v39  ;;  %v3945_v26 = vsub.s32 %v355_v19, %v3728_v1  ;;  %vm965_vm13 = vcmp.lt.s32.totalorder %v3918_v13, 31  ;;  %vm1022_vm14 = vcmp.lt.s32.totalorder %v3918_v13, 30 }
  0x69   : > { %vm1079_vm15 = vcmp.lt.s32.totalorder %v3918_v13, 29  ;;  %vm1136_vm1 = vcmp.lt.s32.totalorder %v3918_v13, 19 }
  0x6c   : > { %343 = vrot.lane.b32.xlu1 %v3763_v40, %s3511_s24  ;;  %391 = vrot.lane.b32.xlu0 %v3758_v35, %s3510_s22 }
  0x70   : > { %345 = vrot.lane.b32.xlu1 %v3767_v41, %s3511_s24  ;;  %448 = vrot.lane.b32.xlu0 %v3758_v35, %s3512_s29  ;;  %s3528_s24 = smov 15  }
  0x74   : > { %400 = vrot.lane.b32.xlu1 %v3767_v41, %s3510_s22  ;;  %398 = vrot.lane.b32.xlu0 %v3763_v40, %s3510_s22  ;;  %s3527_s22 = smov 16  }
  0x78   : > { %457 = vrot.lane.b32.xlu1 %v3767_v41, %s3512_s29  ;;  %455 = vrot.lane.b32.xlu0 %v3763_v40, %s3512_s29  ;;  %s3529_s29 = smov 14  }
  0x7c   : > { %507 = vrot.lane.b32.xlu1 %v3755_v34, %s3513_s5  ;;  %505 = vrot.lane.b32.xlu0 %v3758_v35, %s3513_s5 }
  0x80   : > { %514 = vrot.lane.b32.xlu1 %v3767_v41, %s3513_s5  ;;  %512 = vrot.lane.b32.xlu0 %v3763_v40, %s3513_s5  ;;  %s3530_s5 = smov 13  }
  0x84   : > { %564 = vrot.lane.b32.xlu1 %v3755_v34, %s3514_s6  ;;  %562 = vrot.lane.b32.xlu0 %v3758_v35, %s3514_s6 }
  0x88   : > { %571 = vrot.lane.b32.xlu1 %v3767_v41, %s3514_s6  ;;  %569 = vrot.lane.b32.xlu0 %v3763_v40, %s3514_s6  ;;  %s3531_s6 = smov 3  }
  0x8c   : > { %621 = vrot.lane.b32.xlu1 %v3755_v34, %s3515_s7  ;;  %619 = vrot.lane.b32.xlu0 %v3758_v35, %s3515_s7 }
  0x90   : > { %628 = vrot.lane.b32.xlu1 %v3767_v41, %s3515_s7  ;;  %626 = vrot.lane.b32.xlu0 %v3763_v40, %s3515_s7  ;;  %s3532_s7 = smov 2  }
  0x94   : > { %678 = vrot.lane.b32.xlu1 %v3755_v34, %s3516_s13  ;;  %676 = vrot.lane.b32.xlu0 %v3758_v35, %s3516_s13 }
  0x98   : > { %685 = vrot.lane.b32.xlu1 %v3767_v41, %s3516_s13  ;;  %683 = vrot.lane.b32.xlu0 %v3763_v40, %s3516_s13  ;;  %s3534_s13 = smov 1  }
  0x9c   : > { %735 = vrot.lane.b32.xlu1 %v3755_v34, %s3517_s14  ;;  %733 = vrot.lane.b32.xlu0 %v3758_v35, %s3517_s14 }
  0xa0   : > { %742 = vrot.lane.b32.xlu1 %v3767_v41, %s3517_s14  ;;  %740 = vrot.lane.b32.xlu0 %v3763_v40, %s3517_s14  ;;  %s3535_s14 = smov 127  }
  0xa4   : > { %792 = vrot.lane.b32.xlu1 %v3755_v34, %s3518_s21  ;;  %790 = vrot.lane.b32.xlu0 %v3758_v35, %s3518_s21 }
  0xa8   : > { %799 = vrot.lane.b32.xlu1 %v3767_v41, %s3518_s21  ;;  %797 = vrot.lane.b32.xlu0 %v3763_v40, %s3518_s21  ;;  %s3536_s21 = smov 126  }
  0xac   : > { %849 = vrot.lane.b32.xlu1 %v3755_v34, %s3519_s25  ;;  %847 = vrot.lane.b32.xlu0 %v3758_v35, %s3519_s25 }
  0xb0   : > { %856 = vrot.lane.b32.xlu1 %v3767_v41, %s3519_s25  ;;  %854 = vrot.lane.b32.xlu0 %v3763_v40, %s3519_s25  ;;  %s3537_s25 = smov 125  }
  0xb4   : > { %906 = vrot.lane.b32.xlu1 %v3755_v34, %s3520_s26  ;;  %904 = vrot.lane.b32.xlu0 %v3758_v35, %s3520_s26 }
  0xb8   : > { %913 = vrot.lane.b32.xlu1 %v3767_v41, %s3520_s26  ;;  %911 = vrot.lane.b32.xlu0 %v3763_v40, %s3520_s26  ;;  %s3538_s26 = smov 115  }
  0xbc   : > { %963 = vrot.lane.b32.xlu1 %v3755_v34, %s3521_s27  ;;  %961 = vrot.lane.b32.xlu0 %v3758_v35, %s3521_s27 }
  0xc0   : > { %970 = vrot.lane.b32.xlu1 %v3767_v41, %s3521_s27  ;;  %968 = vrot.lane.b32.xlu0 %v3763_v40, %s3521_s27  ;;  %s3539_s27 = smov 114  }
  0xc4   : > { %1020 = vrot.lane.b32.xlu1 %v3755_v34, %s3522_s28  ;;  %1018 = vrot.lane.b32.xlu0 %v3758_v35, %s3522_s28 }
  0xc8   : > { %1027 = vrot.lane.b32.xlu1 %v3767_v41, %s3522_s28  ;;  %1025 = vrot.lane.b32.xlu0 %v3763_v40, %s3522_s28  ;;  %s3540_s28 = smov 113  }
  0xcc   : > { %1077 = vrot.lane.b32.xlu1 %v3755_v34, %s3523_s30  ;;  %1075 = vrot.lane.b32.xlu0 %v3758_v35, %s3523_s30 }
  0xd0   : > { %1084 = vrot.lane.b32.xlu1 %v3767_v41, %s3523_s30  ;;  %1082 = vrot.lane.b32.xlu0 %v3763_v40, %s3523_s30  ;;  %s3541_s30 = smov 112  }
  0xd4   : > { %1134 = vrot.lane.b32.xlu1 %v3755_v34, %s3524_s9  ;;  %1132 = vrot.lane.b32.xlu0 %v3758_v35, %s3524_s9 }
  0xd6   : > { %v3823_v42 = vpop.permute.xlu1 %393  ;;  %v3825_v43 = vpop.permute.xlu0 %334 }
  0xd8   : > { %1141 = vrot.lane.b32.xlu1 %v3767_v41, %s3524_s9  ;;  %1139 = vrot.lane.b32.xlu0 %v3763_v40, %s3524_s9  ;;  %s3542_s9 = smov 111  }
  0xda   : > { %v3829_v44 = vpop.permute.xlu1 %450  ;;  %v3831_v45 = vpop.permute.xlu0 %336 }
  0xdb   : > { %v341_v20 = vsel %vm340_vm2, %v3825_v43, %v3831_v45  ;;  %v342_v21 = vsel %vm340_vm2, %v3831_v45, %v3825_v43  ;;  %v370_v43 = vld [vmem:[#allocation8] ss:$8 sm:$0x3] }
  0xdc   : > { %1191 = vrot.lane.b32.xlu1 %v3755_v34, %s3525_s10  ;;  %1189 = vrot.lane.b32.xlu0 %v3758_v35, %s3525_s10  ;;  %v352_v27 = vcombine.low %v342_v21, %v341_v20  ;;  %v405_v21 = vld [vmem:[#allocation6 + $0x1] ss:$8 sm:$0x3] }
  0xde   : > { %v3835_v46 = vpop.permute.xlu1 %343  ;;  %v3837_v47 = vpop.permute.xlu0 %391  ;;  %v359_v1 = vrot.slane %v352_v27, %v3945_v26 }
  0xdf   : > { %v396_v28 = vsel %vm395_vm3, %v3837_v47, %v3823_v42  ;;  %v397_v29 = vsel %vm395_vm3, %v3823_v42, %v3837_v47 }
  0xe0   : > { %1198 = vrot.lane.b32.xlu1 %v3767_v41, %s3525_s10  ;;  %1196 = vrot.lane.b32.xlu0 %v3763_v40, %s3525_s10  ;;  %v408_v33 = vcombine.low %v397_v29, %v396_v28  ;;  %s3543_s10 = smov 110  }
  0xe2   : > { %v3841_v48 = vpop.permute.xlu1 %345  ;;  %v3843_v49 = vpop.permute.xlu0 %448  ;;  %v415_v47 = vrot.slane %v408_v33, %v3945_v26 }
  0xe3   : > { %v347_v18 = vsel %vm340_vm2, %v3835_v46, %v3841_v48  ;;  %v348_v0 = vsel %vm340_vm2, %v3841_v48, %v3835_v46  ;;  %v366_v46 = vrot.slane %v359_v1, %v3945_v26  ;;  %v349_v48 = vld [vmem:[#allocation6] ss:$8 sm:$0x3]  ;;  %v453_v15 = vsel %vm452_vm4, %v3843_v49, %v3829_v44 }
  0xe4   : > { %1248 = vrot.lane.b32.xlu1 %v3755_v34, %s3526_s11  ;;  %1246 = vrot.lane.b32.xlu0 %v3758_v35, %s3526_s11  ;;  %v373_v25 = vcombine.low %v348_v0, %v347_v18  ;;  %v454_v18 = vsel %vm452_vm4, %v3829_v44, %v3843_v49  ;;  %v422_v20 = vrot.slane %v415_v47, %v3945_v26  ;;  %vm1193_vm2 = vcmp.lt.s32.totalorder %v3918_v13, 18 }
  0xe5   : > { %v368_v19 = vmul.f32 %v366_v46, %v349_v48 }
  0xe6   : > { %v3847_v50 = vpop.permute.xlu1 %400  ;;  %v3849_v51 = vpop.permute.xlu0 %398  ;;  %v380_v32 = vrot.slane %v373_v25, %v3945_v26  ;;  %v465_v25 = vcombine.low %v454_v18, %v453_v15 }
  0xe7   : > { %v402_v36 = vsel %vm395_vm3, %v3849_v51, %v3847_v50  ;;  %v403_v37 = vsel %vm395_vm3, %v3847_v50, %v3849_v51  ;;  %vm1250_vm3 = vcmp.lt.s32.totalorder %v3918_v13, 17 }
  0xe8   : > { %1255 = vrot.lane.b32.xlu1 %v3767_v41, %s3526_s11  ;;  %1253 = vrot.lane.b32.xlu0 %v3763_v40, %s3526_s11  ;;  %v387_v42 = vrot.slane %v380_v32, %v3945_v26  ;;  %v430_v45 = vcombine.low %v403_v37, %v402_v36  ;;  %v472_v37 = vrot.slane %v465_v25, %v3945_v26  ;;  %s3544_s11 = smov 109  }
  0xea   : > { %v3853_v52 = vpop.permute.xlu1 %457  ;;  %v3855_v53 = vpop.permute.xlu0 %455  ;;  %v389_v14 = vmul.f32 %v387_v42, %v370_v43  ;;  %v437_v0 = vrot.slane %v430_v45, %v3945_v26  ;;  %v479_v15 = vrot.slane %v472_v37, %v3945_v26 }
  0xeb   : > { %v459_v27 = vsel %vm452_vm4, %v3855_v53, %v3853_v52  ;;  %v460_v44 = vsel %vm452_vm4, %v3853_v52, %v3855_v53  ;;  %v424_v52 = vmul.f32 %v422_v20, %v405_v21  ;;  %v427_v53 = vld [vmem:[#allocation8 + $0x1] ss:$8 sm:$0x3]  ;;  %vm1307_vm4 = vcmp.lt.s32.totalorder %v3918_v13, 16 }
  0xec   : > { %1305 = vrot.lane.b32.xlu1 %v3755_v34, %s3527_s22  ;;  %1303 = vrot.lane.b32.xlu0 %v3758_v35, %s3527_s22  ;;  %v390_v29 = vadd.f32 %v389_v14, %v368_v19  ;;  %v444_v32 = vrot.slane %v437_v0, %v3945_v26  ;;  %v487_v36 = vcombine.low %v460_v44, %v459_v27  ;;  %v462_v19 = vld [vmem:[#allocation6 + $0x2] ss:$8 sm:$0x3] }
  0xee   : > { %v3859_v54 = vpop.permute.xlu1 %507  ;;  %v3861_v55 = vpop.permute.xlu0 %505  ;;  %v425_v45 = vadd.f32 %v424_v52, %v390_v29  ;;  %v446_v47 = vmul.f32 %v444_v32, %v427_v53  ;;  %v484_v32 = vld [vmem:[#allocation8 + $0x2] ss:$8 sm:$0x3] }
  0xef   : > { %v510_v1 = vsel %vm509_vm5, %v3861_v55, %v3859_v54  ;;  %v511_v33 = vsel %vm509_vm5, %v3859_v54, %v3861_v55 }
  0xf0   : > { %1312 = vrot.lane.b32.xlu1 %v3767_v41, %s3527_s22  ;;  %1310 = vrot.lane.b32.xlu0 %v3763_v40, %s3527_s22  ;;  %v522_v46 = vcombine.low %v511_v33, %v510_v1  ;;  %v447_v25 = vadd.f32 %v446_v47, %v425_v45  ;;  %v541_v47 = vld [vmem:[#allocation8 + $0x3] ss:$8 sm:$0x3]  ;;  %s3545_s22 = smov 99  }
  0xf2   : > { %v3865_v56 = vpop.permute.xlu1 %514  ;;  %v3867_v57 = vpop.permute.xlu0 %512  ;;  %v529_v20 = vrot.slane %v522_v46, %v3945_v26 }
  0xf3   : > { %v516_v42 = vsel %vm509_vm5, %v3867_v57, %v3865_v56  ;;  %v517_v54 = vsel %vm509_vm5, %v3865_v56, %v3867_v57  ;;  %v494_v56 = vrot.slane %v487_v36, %v3945_v26  ;;  %vm1364_vm5 = vcmp.lt.s32.totalorder %v3918_v13, 15 }
  0xf4   : > { %1362 = vrot.lane.b32.xlu1 %v3755_v34, %s3528_s24  ;;  %1360 = vrot.lane.b32.xlu0 %v3758_v35, %s3528_s24  ;;  %v544_v57 = vcombine.low %v517_v54, %v516_v42  ;;  %v536_v53 = vrot.slane %v529_v20, %v3945_v26  ;;  %v576_v20 = vld [vmem:[#allocation6 + $0x4] ss:$8 sm:$0x3] }
  0xf5   : > { %v501_v27 = vrot.slane %v494_v56, %v3945_v26 }
  0xf6   : > { %v3871_v58 = vpop.permute.xlu1 %564  ;;  %v3873_v59 = vpop.permute.xlu0 %562  ;;  %v551_v44 = vrot.slane %v544_v57, %v3945_v26 }
  0xf7   : > { %v567_v48 = vsel %vm566_vm6, %v3873_v59, %v3871_v58  ;;  %v568_v14 = vsel %vm566_vm6, %v3871_v58, %v3873_v59  ;;  %v503_v45 = vmul.f32 %v501_v27, %v484_v32 }
  0xf8   : > { %1369 = vrot.lane.b32.xlu1 %v3767_v41, %s3528_s24  ;;  %1367 = vrot.lane.b32.xlu0 %v3763_v40, %s3528_s24  ;;  %v579_v21 = vcombine.low %v568_v14, %v567_v48  ;;  %v558_v46 = vrot.slane %v551_v44, %v3945_v26  ;;  %s3546_s24 = smov 98  }
  0xfa   : > { %v3877_v60 = vpop.permute.xlu1 %571  ;;  %v3879_v61 = vpop.permute.xlu0 %569  ;;  %v586_v36 = vrot.slane %v579_v21, %v3945_v26 }
  0xfb   : > { %v573_v58 = vsel %vm566_vm6, %v3879_v61, %v3877_v60  ;;  %v574_v59 = vsel %vm566_vm6, %v3877_v60, %v3879_v61  ;;  %v481_v61 = vmul.f32 %v479_v15, %v462_v19  ;;  %vm1421_vm6 = vcmp.lt.s32.totalorder %v3918_v13, 14 }
  0xfc   : > { %1419 = vrot.lane.b32.xlu1 %v3755_v34, %s3529_s29  ;;  %1417 = vrot.lane.b32.xlu0 %v3758_v35, %s3529_s29  ;;  %v601_v1 = vcombine.low %v574_v59, %v573_v58  ;;  %v593_v19 = vrot.slane %v586_v36, %v3945_v26  ;;  %v560_v59 = vmul.f32 %v558_v46, %v541_v47 }
  0xfd   : > { %v482_v54 = vadd.f32 %v481_v61, %v447_v25 }
  0xfe   : > { %v3883_v62 = vpop.permute.xlu1 %621  ;;  %v3885_v63 = vpop.permute.xlu0 %619  ;;  %v608_v48 = vrot.slane %v601_v1, %v3945_v26  ;;  %v595_v32 = vmul.f32 %v593_v19, %v576_v20  ;;  %v598_v1 = vld [vmem:[#allocation8 + $0x4] ss:$8 sm:$0x3] }
  0xff   : > { %v624_v29 = vsel %vm623_vm7, %v3885_v63, %v3883_v62  ;;  %v625_v60 = vsel %vm623_vm7, %v3883_v62, %v3885_v63  ;;  %v519_v63 = vld [vmem:[#allocation6 + $0x3] ss:$8 sm:$0x3] }
 0x100   : > { %1426 = vrot.lane.b32.xlu1 %v3767_v41, %s3529_s29  ;;  %1424 = vrot.lane.b32.xlu0 %v3763_v40, %s3529_s29  ;;  %v636_v42 = vcombine.low %v625_v60, %v624_v29  ;;  %v538_v15 = vmul.f32 %v536_v53, %v519_v63  ;;  %v615_v27 = vrot.slane %v608_v48, %v3945_v26  ;;  %v655_v48 = vld [vmem:[#allocation8 + $0x5] ss:$8 sm:$0x3]  ;;  %s3547_s29 = smov 97  }
 0x102   : > { %v3889_v2 = vpop.permute.xlu1 %628  ;;  %v3891_v4 = vpop.permute.xlu0 %626  ;;  %v643_v21 = vrot.slane %v636_v42, %v3945_v26 }
 0x103   : > { %v630_v37 = vsel %vm623_vm7, %v3891_v4, %v3889_v2  ;;  %v631_v62 = vsel %vm623_vm7, %v3889_v2, %v3891_v4  ;;  %vm1478_vm7 = vcmp.lt.s32.totalorder %v3918_v13, 13 }
 0x104   : > { %1476 = vrot.lane.b32.xlu1 %v3755_v34, %s3530_s5  ;;  %1474 = vrot.lane.b32.xlu0 %v3758_v35, %s3530_s5  ;;  %v658_v14 = vcombine.low %v631_v62, %v630_v37  ;;  %v650_v36 = vrot.slane %v643_v21, %v3945_v26 }
 0x106   : > { %v3895_v5 = vpop.permute.xlu1 %678  ;;  %v3897_v6 = vpop.permute.xlu0 %676  ;;  %v665_v44 = vrot.slane %v658_v14, %v3945_v26 }
 0x107   : > { %v681_v56 = vsel %vm680_vm8, %v3897_v6, %v3895_v5  ;;  %v682_v2 = vsel %vm680_vm8, %v3895_v5, %v3897_v6  ;;  %v504_v6 = vadd.f32 %v503_v45, %v482_v54  ;;  %v617_v54 = vmul.f32 %v615_v27, %v598_v1 }
 0x108   : > { %1483 = vrot.lane.b32.xlu1 %v3767_v41, %s3530_s5  ;;  %1481 = vrot.lane.b32.xlu0 %v3763_v40, %s3530_s5  ;;  %v693_v25 = vcombine.low %v682_v2, %v681_v56  ;;  %v672_v45 = vrot.slane %v665_v44, %v3945_v26  ;;  %s3548_s5 = smov 96  }
 0x109   : > { %v539_v61 = vadd.f32 %v538_v15, %v504_v6 }
 0x10a   : > { %v3901_v7 = vpop.permute.xlu1 %685  ;;  %v3903_v8 = vpop.permute.xlu0 %683  ;;  %v700_v62 = vrot.slane %v693_v25, %v3945_v26 }
 0x10b   : > { %v687_v58 = vsel %vm680_vm8, %v3903_v8, %v3901_v7  ;;  %v688_v5 = vsel %vm680_vm8, %v3901_v7, %v3903_v8  ;;  %v561_v42 = vadd.f32 %v560_v59, %v539_v61  ;;  %vm1535_vm8 = vcmp.lt.s32.totalorder %v3918_v13, 3 }
 0x10c   : > { %1533 = vrot.lane.b32.xlu1 %v3755_v34, %s3531_s6  ;;  %1531 = vrot.lane.b32.xlu0 %v3758_v35, %s3531_s6  ;;  %v715_v53 = vcombine.low %v688_v5, %v687_v58  ;;  %v707_v19 = vrot.slane %v700_v62, %v3945_v26  ;;  %v674_v58 = vmul.f32 %v672_v45, %v655_v48  ;;  %v690_v5 = vld [vmem:[#allocation6 + $0x6] ss:$8 sm:$0x3] }
 0x10d   : > { %v596_v2 = vadd.f32 %v595_v32, %v561_v42 }
 0x10e   : > { %v3907_v9 = vpop.permute.xlu1 %735  ;;  %v3909_v10 = vpop.permute.xlu0 %733  ;;  %v709_v32 = vmul.f32 %v707_v19, %v690_v5 }
 0x10f   : > { %v738_v29 = vsel %vm737_vm9, %v3909_v10, %v3907_v9  ;;  %v739_v7 = vsel %vm737_vm9, %v3907_v9, %v3909_v10  ;;  %v633_v10 = vld [vmem:[#allocation6 + $0x5] ss:$8 sm:$0x3] }
 0x110   : > { %1540 = vrot.lane.b32.xlu1 %v3767_v41, %s3531_s6  ;;  %1538 = vrot.lane.b32.xlu0 %v3763_v40, %s3531_s6  ;;  %v750_v63 = vcombine.low %v739_v7, %v738_v29  ;;  %v652_v15 = vmul.f32 %v650_v36, %v633_v10  ;;  %s3549_s6 = smov 95  }
 0x112   : > { %v3913_v11 = vpop.permute.xlu1 %742  ;;  %v3915_v12 = vpop.permute.xlu0 %740  ;;  %v757_v20 = vrot.slane %v750_v63, %v3945_v26 }
 0x113   : > { %v744_v37 = vsel %vm737_vm9, %v3915_v12, %v3913_v11  ;;  %v745_v9 = vsel %vm737_vm9, %v3913_v11, %v3915_v12  ;;  %v722_v11 = vrot.slane %v715_v53, %v3945_v26  ;;  %v747_v53 = vld [vmem:[#allocation6 + $0x7] ss:$8 sm:$0x3]  ;;  %vm1592_vm9 = vcmp.lt.s32.totalorder %v3918_v13, 2 }
 0x114   : > { %1590 = vrot.lane.b32.xlu1 %v3755_v34, %s3532_s7  ;;  %1588 = vrot.lane.b32.xlu0 %v3758_v35, %s3532_s7  ;;  %v772_v12 = vcombine.low %v745_v9, %v744_v37  ;;  %v764_v1 = vrot.slane %v757_v20, %v3945_v26 }
 0x115   : > { %v729_v27 = vrot.slane %v722_v11, %v3945_v26 }
 0x116   : > { %v3922_v16 = vpop.permute.xlu1 %792  ;;  %v3924_v17 = vpop.permute.xlu0 %790  ;;  %v779_v44 = vrot.slane %v772_v12, %v3945_v26  ;;  %v766_v11 = vmul.f32 %v764_v1, %v747_v53 }
 0x117   : > { %v795_v14 = vsel %vm794_vm10, %v3924_v17, %v3922_v16  ;;  %v796_v56 = vsel %vm794_vm10, %v3922_v16, %v3924_v17  ;;  %v618_v17 = vadd.f32 %v617_v54, %v596_v2  ;;  %v769_v54 = vld [vmem:[#allocation8 + $0x7] ss:$8 sm:$0x3] }
 0x118   : > { %1597 = vrot.lane.b32.xlu1 %v3767_v41, %s3532_s7  ;;  %1595 = vrot.lane.b32.xlu0 %v3763_v40, %s3532_s7  ;;  %v807_v6 = vcombine.low %v796_v56, %v795_v14  ;;  %v786_v42 = vrot.slane %v779_v44, %v3945_v26  ;;  %s3550_s7 = smov 94  }
 0x119   : > { %v653_v61 = vadd.f32 %v652_v15, %v618_v17 }
 0x11a   : > { %v3937_v22 = vpop.permute.xlu1 %799  ;;  %v3939_v23 = vpop.permute.xlu0 %797  ;;  %v814_v36 = vrot.slane %v807_v6, %v3945_v26  ;;  %v788_v20 = vmul.f32 %v786_v42, %v769_v54 }
 0x11b   : > { %v801_v21 = vsel %vm794_vm10, %v3939_v23, %v3937_v22  ;;  %v802_v16 = vsel %vm794_vm10, %v3937_v22, %v3939_v23  ;;  %v712_v23 = vld [vmem:[#allocation8 + $0x6] ss:$8 sm:$0x3]  ;;  %v675_v62 = vadd.f32 %v674_v58, %v653_v61  ;;  %vm1649_vm10 = vcmp.lt.s32.totalorder %v3918_v13, 1 }
 0x11c   : > { %1647 = vrot.lane.b32.xlu1 %v3755_v34, %s3534_s13  ;;  %1645 = vrot.lane.b32.xlu0 %v3758_v35, %s3534_s13  ;;  %v829_v7 = vcombine.low %v802_v16, %v801_v21  ;;  %v731_v63 = vmul.f32 %v729_v27, %v712_v23  ;;  %v821_v14 = vrot.slane %v814_v36, %v3945_v26  ;;  %v804_v21 = vld [vmem:[#allocation6 + $0x10] ss:$8 sm:$0x3] }
 0x11e   : > { %v3955_v30 = vpop.permute.xlu1 %849  ;;  %v3957_v31 = vpop.permute.xlu0 %847  ;;  %v836_v45 = vrot.slane %v829_v7, %v3945_v26  ;;  %v823_v44 = vmul.f32 %v821_v14, %v804_v21  ;;  %v861_v7 = vld [vmem:[#allocation6 + $0x11] ss:$8 sm:$0x3] }
 0x11f   : > { %v852_v29 = vsel %vm851_vm11, %v3957_v31, %v3955_v30  ;;  %v853_v22 = vsel %vm851_vm11, %v3955_v30, %v3957_v31 }
 0x120   : > { %1654 = vrot.lane.b32.xlu1 %v3767_v41, %s3534_s13  ;;  %1652 = vrot.lane.b32.xlu0 %v3763_v40, %s3534_s13  ;;  %v864_v37 = vcombine.low %v853_v22, %v852_v29  ;;  %v843_v17 = vrot.slane %v836_v45, %v3945_v26  ;;  %s3551_s13 = smov 93  }
 0x122   : > { %v3971_v38 = vpop.permute.xlu1 %856  ;;  %v3973_v39 = vpop.permute.xlu0 %854  ;;  %v871_v56 = vrot.slane %v864_v37, %v3945_v26 }
 0x123   : > { %v858_v30 = vsel %vm851_vm11, %v3973_v39, %v3971_v38  ;;  %v859_v31 = vsel %vm851_vm11, %v3971_v38, %v3973_v39  ;;  %v710_v39 = vadd.f32 %v709_v32, %v675_v62  ;;  %v883_v62 = vld [vmem:[#allocation8 + $0x11] ss:$8 sm:$0x3]  ;;  %vm1732_vm11 = vcmp.lt.s32.totalorder %v3918_v13, 127 }
 0x124   : > { %1730 = vrot.lane.b32.xlu1 %v3755_v34, %s3535_s14  ;;  %1728 = vrot.lane.b32.xlu0 %v3758_v35, %s3535_s14  ;;  %v886_v12 = vcombine.low %v859_v31, %v858_v30  ;;  %v878_v29 = vrot.slane %v871_v56, %v3945_v26  ;;  %v940_v56 = vld [vmem:[#allocation8 + $0x12] ss:$8 sm:$0x3] }
 0x125   : > { %v732_v19 = vadd.f32 %v731_v63, %v710_v39 }
 0x126   : > { %v3981_v50 = vpop.permute.xlu1 %906  ;;  %v3983_v51 = vpop.permute.xlu0 %904  ;;  %v893_v5 = vrot.slane %v886_v12, %v3945_v26  ;;  %v880_v31 = vmul.f32 %v878_v29, %v861_v7 }
 0x127   : > { %v909_v48 = vsel %vm908_vm12, %v3983_v51, %v3981_v50  ;;  %v910_v38 = vsel %vm908_vm12, %v3981_v50, %v3983_v51  ;;  %v767_v27 = vadd.f32 %v766_v11, %v732_v19 }
 0x128   : > { %1737 = vrot.lane.b32.xlu1 %v3767_v41, %s3535_s14  ;;  %1735 = vrot.lane.b32.xlu0 %v3763_v40, %s3535_s14  ;;  %v921_v16 = vcombine.low %v910_v38, %v909_v48  ;;  %v900_v36 = vrot.slane %v893_v5, %v3945_v26  ;;  %s3552_s14 = smov 83  }
 0x129   : > { %v789_v1 = vadd.f32 %v788_v20, %v767_v27 }
 0x12a   : > { %v4006_v49 = vpop.permute.xlu1 %913  ;;  %v4008_v28 = vpop.permute.xlu0 %911  ;;  %v902_v12 = vmul.f32 %v900_v36, %v883_v62 }
 0x12b   : > { %v915_v2 = vsel %vm908_vm12, %v4008_v28, %v4006_v49  ;;  %v916_v50 = vsel %vm908_vm12, %v4006_v49, %v4008_v28  ;;  %v826_v28 = vld [vmem:[#allocation8 + $0x10] ss:$8 sm:$0x3]  ;;  %vm1789_vm12 = vcmp.lt.s32.totalorder %v3918_v13, 126 }
 0x12c   : > { %1787 = vrot.lane.b32.xlu1 %v3755_v34, %s3536_s21  ;;  %1785 = vrot.lane.b32.xlu0 %v3758_v35, %s3536_s21  ;;  %v943_v6 = vcombine.low %v916_v50, %v915_v2  ;;  %v845_v53 = vmul.f32 %v843_v17, %v826_v28 }
 0x12e   : > { %v4031_v55 = vpop.permute.xlu1 %963  ;;  %v4033_v43 = vpop.permute.xlu0 %961  ;;  %v950_v37 = vrot.slane %v943_v6, %v3945_v26 }
 0x12f   : > { %v966_v58 = vsel %vm965_vm13, %v4033_v43, %v4031_v55  ;;  %v967_v49 = vsel %vm965_vm13, %v4031_v55, %v4033_v43  ;;  %v928_v55 = vrot.slane %v921_v16, %v3945_v26 }
 0x130   : > { %1794 = vrot.lane.b32.xlu1 %v3767_v41, %s3536_s21  ;;  %1792 = vrot.lane.b32.xlu0 %v3763_v40, %s3536_s21  ;;  %v978_v43 = vcombine.low %v967_v49, %v966_v58  ;;  %v957_v14 = vrot.slane %v950_v37, %v3945_v26  ;;  %v975_v58 = vld [vmem:[#allocation6 + $0x13] ss:$8 sm:$0x3]  ;;  %s3553_s21 = smov 82  }
 0x131   : > { %v935_v45 = vrot.slane %v928_v55, %v3945_v26 }
 0x132   : > { %v4048_v18 = vpop.permute.xlu1 %970  ;;  %v4050_v0 = vpop.permute.xlu0 %968  ;;  %v985_v48 = vrot.slane %v978_v43, %v3945_v26  ;;  %v959_v5 = vmul.f32 %v957_v14, %v940_v56  ;;  %v1089_v14 = vld [vmem:[#allocation6 + $0x15] ss:$8 sm:$0x3] }
 0x133   : > { %v972_v61 = vsel %vm965_vm13, %v4050_v0, %v4048_v18  ;;  %v973_v32 = vsel %vm965_vm13, %v4048_v18, %v4050_v0  ;;  %v824_v0 = vadd.f32 %v823_v44, %v789_v1  ;;  %vm1846_vm13 = vcmp.lt.s32.totalorder %v3918_v13, 125 }
 0x134   : > { %1844 = vrot.lane.b32.xlu1 %v3755_v34, %s3537_s25  ;;  %1842 = vrot.lane.b32.xlu0 %v3758_v35, %s3537_s25  ;;  %v1000_v63 = vcombine.low %v973_v32, %v972_v61  ;;  %v992_v17 = vrot.slane %v985_v48, %v3945_v26  ;;  %v997_v61 = vld [vmem:[#allocation8 + $0x13] ss:$8 sm:$0x3] }
 0x135   : > { %v846_v11 = vadd.f32 %v845_v53, %v824_v0 }
 0x136   : > { %v4074_v33 = vpop.permute.xlu1 %1020  ;;  %v4076_v52 = vpop.permute.xlu0 %1018  ;;  %v1007_v2 = vrot.slane %v1000_v63, %v3945_v26  ;;  %v994_v43 = vmul.f32 %v992_v17, %v975_v58  ;;  %v1054_v63 = vld [vmem:[#allocation8 + $0x14] ss:$8 sm:$0x3] }
 0x137   : > { %v1023_v30 = vsel %vm1022_vm14, %v4076_v52, %v4074_v33  ;;  %v1024_v18 = vsel %vm1022_vm14, %v4074_v33, %v4076_v52  ;;  %v918_v52 = vld [vmem:[#allocation6 + $0x12] ss:$8 sm:$0x3]  ;;  %v881_v21 = vadd.f32 %v880_v31, %v846_v11 }
 0x138   : > { %1851 = vrot.lane.b32.xlu1 %v3767_v41, %s3537_s25  ;;  %1849 = vrot.lane.b32.xlu0 %v3763_v40, %s3537_s25  ;;  %v1035_v39 = vcombine.low %v1024_v18, %v1023_v30  ;;  %v937_v16 = vmul.f32 %v935_v45, %v918_v52  ;;  %v1014_v27 = vrot.slane %v1007_v2, %v3945_v26  ;;  %s3554_s25 = smov 81  }
 0x13a   : > { %v4100_v4 = vpop.permute.xlu1 %1027  ;;  %v4102_v57 = vpop.permute.xlu0 %1025  ;;  %v1042_v49 = vrot.slane %v1035_v39, %v3945_v26  ;;  %v1016_v18 = vmul.f32 %v1014_v27, %v997_v61 }
 0x13b   : > { %v1029_v38 = vsel %vm1022_vm14, %v4102_v57, %v4100_v4  ;;  %v1030_v33 = vsel %vm1022_vm14, %v4100_v4, %v4102_v57  ;;  %vm1903_vm14 = vcmp.lt.s32.totalorder %v3918_v13, 115 }
 0x13c   : > { %1901 = vrot.lane.b32.xlu1 %v3755_v34, %s3538_s26  ;;  %1899 = vrot.lane.b32.xlu0 %v3758_v35, %s3538_s26  ;;  %v1057_v50 = vcombine.low %v1030_v33, %v1029_v38  ;;  %v1049_v1 = vrot.slane %v1042_v49, %v3945_v26 }
 0x13e   : > { %v4127_v8 = vpop.permute.xlu1 %1077  ;;  %v4129_v60 = vpop.permute.xlu0 %1075  ;;  %v1064_v44 = vrot.slane %v1057_v50, %v3945_v26 }
 0x13f   : > { %v1080_v19 = vsel %vm1079_vm15, %v4129_v60, %v4127_v8  ;;  %v1081_v4 = vsel %vm1079_vm15, %v4127_v8, %v4129_v60  ;;  %v903_v60 = vadd.f32 %v902_v12, %v881_v21 }
 0x140   : > { %1908 = vrot.lane.b32.xlu1 %v3767_v41, %s3538_s26  ;;  %1906 = vrot.lane.b32.xlu0 %v3763_v40, %s3538_s26  ;;  %v1092_v6 = vcombine.low %v1081_v4, %v1080_v19  ;;  %v1071_v0 = vrot.slane %v1064_v44, %v3945_v26  ;;  %s3555_s26 = smov 80  }
 0x141   : > { %v938_v55 = vadd.f32 %v937_v16, %v903_v60 }
 0x142   : > { %v4145_v46 = vpop.permute.xlu1 %1084  ;;  %v4147_v47 = vpop.permute.xlu0 %1082  ;;  %v1099_v36 = vrot.slane %v1092_v6, %v3945_v26  ;;  %v1073_v12 = vmul.f32 %v1071_v0, %v1054_v63 }
 0x143   : > { %v1086_v28 = vsel %vm1079_vm15, %v4147_v47, %v4145_v46  ;;  %v1087_v8 = vsel %vm1079_vm15, %v4145_v46, %v4147_v47  ;;  %v960_v30 = vadd.f32 %v959_v5, %v938_v55  ;;  %vm1960_vm15 = vcmp.lt.s32.totalorder %v3918_v13, 114 }
 0x144   : > { %1958 = vrot.lane.b32.xlu1 %v3755_v34, %s3539_s27  ;;  %1956 = vrot.lane.b32.xlu0 %v3758_v35, %s3539_s27  ;;  %v1114_v32 = vcombine.low %v1087_v8, %v1086_v28  ;;  %v1106_v52 = vrot.slane %v1099_v36, %v3945_v26  ;;  %v1146_v28 = vld [vmem:[#allocation6 + $0x16] ss:$8 sm:$0x3] }
 0x145   : > { %v995_v38 = vadd.f32 %v994_v43, %v960_v30  ;;  %v1203_v30 = vld [vmem:[#allocation6 + $0x17] ss:$8 sm:$0x3] }
 0x146   : > { %v4171_v59 = vpop.permute.xlu1 %1134  ;;  %v4173_v25 = vpop.permute.xlu0 %1132  ;;  %v1121_v45 = vrot.slane %v1114_v32, %v3945_v26  ;;  %v1108_v58 = vmul.f32 %v1106_v52, %v1089_v14 }
 0x147   : > { %v1137_v29 = vsel %vm1136_vm1, %v4173_v25, %v4171_v59  ;;  %v1138_v46 = vsel %vm1136_vm1, %v4171_v59, %v4173_v25  ;;  %v1032_v25 = vld [vmem:[#allocation6 + $0x14] ss:$8 sm:$0x3] }
 0x148   : > { %1965 = vrot.lane.b32.xlu1 %v3767_v41, %s3539_s27  ;;  %1963 = vrot.lane.b32.xlu0 %v3763_v40, %s3539_s27  ;;  %v1149_v37 = vcombine.low %v1138_v46, %v1137_v29  ;;  %v1051_v33 = vmul.f32 %v1049_v1, %v1032_v25  ;;  %v1128_v19 = vrot.slane %v1121_v45, %v3945_v26  ;;  %v1168_v46 = vld [vmem:[#allocation8 + $0x16] ss:$8 sm:$0x3]  ;;  %s3556_s27 = smov 79  }
 0x14a   : > { %v4198_v9 = vpop.permute.xlu1 %1141  ;;  %v4200_v10 = vpop.permute.xlu0 %1139  ;;  %v1156_v39 = vrot.slane %v1149_v37, %v3945_v26 }
 0x14b   : > { %v1143_v53 = vsel %vm1136_vm1, %v4200_v10, %v4198_v9  ;;  %v1144_v59 = vsel %vm1136_vm1, %v4198_v9, %v4200_v10  ;;  %vm2017_vm1 = vcmp.lt.s32.totalorder %v3918_v13, 113 }
 0x14c   : > { %2015 = vrot.lane.b32.xlu1 %v3755_v34, %s3540_s28  ;;  %2013 = vrot.lane.b32.xlu0 %v3758_v35, %s3540_s28  ;;  %v1171_v9 = vcombine.low %v1144_v59, %v1143_v53  ;;  %v1163_v49 = vrot.slane %v1156_v39, %v3945_v26  ;;  %v1260_v39 = vld [vmem:[#allocation6 + $0x20] ss:$8 sm:$0x3] }
 0x14e   : > { %v4225_v51 = vpop.permute.xlu1 %1191  ;;  %v4227_v15 = vpop.permute.xlu0 %1189  ;;  %v1178_v4 = vrot.slane %v1171_v9, %v3945_v26  ;;  %v1225_v9 = vld [vmem:[#allocation8 + $0x17] ss:$8 sm:$0x3] }
 0x14f   : > { %v1194_v10 = vsel %vm1193_vm2, %v4227_v15, %v4225_v51  ;;  %v1195_v48 = vsel %vm1193_vm2, %v4225_v51, %v4227_v15  ;;  %v1017_v15 = vadd.f32 %v1016_v18, %v995_v38 }
 0x150   : > { %2022 = vrot.lane.b32.xlu1 %v3767_v41, %s3540_s28  ;;  %2020 = vrot.lane.b32.xlu0 %v3763_v40, %s3540_s28  ;;  %v1206_v56 = vcombine.low %v1195_v48, %v1194_v10  ;;  %v1185_v29 = vrot.slane %v1178_v4, %v3945_v26  ;;  %s3557_s28 = smov 78  }
 0x151   : > { %v1052_v17 = vadd.f32 %v1051_v33, %v1017_v15 }
 0x152   : > { %v4243_v22 = vpop.permute.xlu1 %1198  ;;  %v4245_v23 = vpop.permute.xlu0 %1196  ;;  %v1213_v8 = vrot.slane %v1206_v56, %v3945_v26  ;;  %v1187_v37 = vmul.f32 %v1185_v29, %v1168_v46 }
 0x153   : > { %v1200_v11 = vsel %vm1193_vm2, %v4245_v23, %v4243_v22  ;;  %v1201_v51 = vsel %vm1193_vm2, %v4243_v22, %v4245_v23  ;;  %v1111_v23 = vld [vmem:[#allocation8 + $0x15] ss:$8 sm:$0x3]  ;;  %v1074_v27 = vadd.f32 %v1073_v12, %v1052_v17  ;;  %vm2074_vm2 = vcmp.lt.s32.totalorder %v3918_v13, 112 }
 0x154   : > { %2072 = vrot.lane.b32.xlu1 %v3755_v34, %s3541_s30  ;;  %2070 = vrot.lane.b32.xlu0 %v3758_v35, %s3541_s30  ;;  %v1228_v16 = vcombine.low %v1201_v51, %v1200_v11  ;;  %v1130_v44 = vmul.f32 %v1128_v19, %v1111_v23  ;;  %v1220_v1 = vrot.slane %v1213_v8, %v3945_v26  ;;  %v1282_v23 = vld [vmem:[#allocation8 + $0x20] ss:$8 sm:$0x3] }
 0x156   : > { %v4269_v42 = vpop.permute.xlu1 %1248  ;;  %v4271_v54 = vpop.permute.xlu0 %1246  ;;  %v1235_v55 = vrot.slane %v1228_v16, %v3945_v26  ;;  %v1222_v48 = vmul.f32 %v1220_v1, %v1203_v30 }
 0x157   : > { %v1251_v21 = vsel %vm1250_vm3, %v4271_v54, %v4269_v42  ;;  %v1252_v22 = vsel %vm1250_vm3, %v4269_v42, %v4271_v54 }
 0x158   : > { %2079 = vrot.lane.b32.xlu1 %v3767_v41, %s3541_s30  ;;  %2077 = vrot.lane.b32.xlu0 %v3763_v40, %s3541_s30  ;;  %v1263_v60 = vcombine.low %v1252_v22, %v1251_v21  ;;  %v1242_v0 = vrot.slane %v1235_v55, %v3945_v26  ;;  %s3558_s30 = smov 77  }
 0x15a   : > { %v4295_v57 = vpop.permute.xlu1 %1255  ;;  %v4297_v20 = vpop.permute.xlu0 %1253  ;;  %v1270_v53 = vrot.slane %v1263_v60, %v3945_v26  ;;  %v1244_v56 = vmul.f32 %v1242_v0, %v1225_v9 }
 0x15b   : > { %v1257_v42 = vsel %vm1250_vm3, %v4297_v20, %v4295_v57  ;;  %v1258_v54 = vsel %vm1250_vm3, %v4295_v57, %v4297_v20  ;;  %v1109_v57 = vadd.f32 %v1108_v58, %v1074_v27  ;;  %v1165_v20 = vmul.f32 %v1163_v49, %v1146_v28 }
 0x15c   : > { %2129 = vrot.lane.b32.xlu1 %v3755_v34, %s3542_s9  ;;  %2127 = vrot.lane.b32.xlu0 %v3758_v35, %s3542_s9  ;;  %v1285_v32 = vcombine.low %v1258_v54, %v1257_v42  ;;  %v1277_v38 = vrot.slane %v1270_v53, %v3945_v26  ;;  %v1317_v42 = vld [vmem:[#allocation6 + $0x21] ss:$8 sm:$0x3]  ;;  %vm2131_vm3 = vcmp.lt.s32.totalorder %v3918_v13, 111 }
 0x15d   : > { %v1131_v36 = vadd.f32 %v1130_v44, %v1109_v57 }
 0x15e   : > { %v4322_v47 = vpop.permute.xlu1 %1305  ;;  %v4324_v7 = vpop.permute.xlu0 %1303  ;;  %v1279_v22 = vmul.f32 %v1277_v38, %v1260_v39 }
 0x15f   : > { %v1308_v43 = vsel %vm1307_vm4, %v4324_v7, %v4322_v47  ;;  %v1309_v61 = vsel %vm1307_vm4, %v4322_v47, %v4324_v7  ;;  %v1166_v10 = vadd.f32 %v1165_v20, %v1131_v36 }
 0x160   : > { %2136 = vrot.lane.b32.xlu1 %v3767_v41, %s3542_s9  ;;  %2134 = vrot.lane.b32.xlu0 %v3763_v40, %s3542_s9  ;;  %v1320_v18 = vcombine.low %v1309_v61, %v1308_v43  ;;  %s3096_s9 = sld [smem:[#allocation2]] }
 0x161   : > { %v1188_v14 = vadd.f32 %v1187_v37, %v1166_v10 }
 0x162   : > { %v1313_v31 = vpop.permute.xlu1 %1312  ;;  %v1311_v62 = vpop.permute.xlu0 %1310  ;;  %v1327_v11 = vrot.slane %v1320_v18, %v3945_v26 }
 0x163   : > { %v1314_v59 = vsel %vm1307_vm4, %v1311_v62, %v1313_v31  ;;  %v1315_v47 = vsel %vm1307_vm4, %v1313_v31, %v1311_v62  ;;  %v1292_v31 = vrot.slane %v1285_v32, %v3945_v26  ;;  %v1223_v21 = vadd.f32 %v1222_v48, %v1188_v14  ;;  %v1339_v32 = vld [vmem:[#allocation8 + $0x21] ss:$8 sm:$0x3] }
 0x164   : > { %2186 = vrot.lane.b32.xlu1 %v3755_v34, %s3543_s10  ;;  %2184 = vrot.lane.b32.xlu0 %v3758_v35, %s3543_s10  ;;  %v1342_v62 = vcombine.low %v1315_v47, %v1314_v59  ;;  %v1334_v49 = vrot.slane %v1327_v11, %v3945_v26  ;;  %vm2188_vm4 = vcmp.lt.s32.totalorder %v3918_v13, 110 }
 0x166   : > { %v1363_v2 = vpop.permute.xlu1 %1362  ;;  %v1361_v50 = vpop.permute.xlu0 %1360  ;;  %v1336_v20 = vmul.f32 %v1334_v49, %v1317_v42  ;;  %v1488_v49 = vld [vmem:[#allocation6 + $0x24] ss:$8 sm:$0x3] }
 0x167   : > { %v1365_v63 = vsel %vm1364_vm5, %v1361_v50, %v1363_v2  ;;  %v1366_v45 = vsel %vm1364_vm5, %v1363_v2, %v1361_v50  ;;  %v1299_v2 = vrot.slane %v1292_v31, %v3945_v26  ;;  %v1349_v50 = vrot.slane %v1342_v62, %v3945_v26 }
 0x168   : > { %2193 = vrot.lane.b32.xlu1 %v3767_v41, %s3543_s10  ;;  %2191 = vrot.lane.b32.xlu0 %v3763_v40, %s3543_s10  ;;  %v1377_v51 = vcombine.low %v1366_v45, %v1365_v63  ;;  %v1396_v45 = vld [vmem:[#allocation8 + $0x22] ss:$8 sm:$0x3]  ;;  %s3221_s10 = sshll.u32 %s3715_s8, 1 }
 0x169   : > { %v1356_v27 = vrot.slane %v1349_v50, %v3945_v26 }
 0x16a   : > { %v1370_v5 = vpop.permute.xlu1 %1369  ;;  %v1368_v6 = vpop.permute.xlu0 %1367  ;;  %v1384_v28 = vrot.slane %v1377_v51, %v3945_v26 }
 0x16b   : > { %v1371_v15 = vsel %vm1364_vm5, %v1368_v6, %v1370_v5  ;;  %v1372_v12 = vsel %vm1364_vm5, %v1370_v5, %v1368_v6  ;;  %v1245_v5 = vadd.f32 %v1244_v56, %v1223_v21  ;;  %v1301_v6 = vmul.f32 %v1299_v2, %v1282_v23  ;;  %v1453_v56 = vld [vmem:[#allocation8 + $0x23] ss:$8 sm:$0x3] }
 0x16c   : > { %2243 = vrot.lane.b32.xlu1 %v3755_v34, %s3544_s11  ;;  %2241 = vrot.lane.b32.xlu0 %v3758_v35, %s3544_s11  ;;  %v1399_v16 = vcombine.low %v1372_v12, %v1371_v15  ;;  %v1391_v1 = vrot.slane %v1384_v28, %v3945_v26  ;;  %v1358_v37 = vmul.f32 %v1356_v27, %v1339_v32  ;;  %v1510_v27 = vld [vmem:[#allocation8 + $0x24] ss:$8 sm:$0x3]  ;;  %vm2245_vm5 = vcmp.lt.s32.totalorder %v3918_v13, 109 }
 0x16d   : > { %v1280_v57 = vadd.f32 %v1279_v22, %v1245_v5 }
 0x16e   : > { %v1420_v7 = vpop.permute.xlu1 %1419  ;;  %v1418_v25 = vpop.permute.xlu0 %1417  ;;  %v1406_v44 = vrot.slane %v1399_v16, %v3945_v26 }
 0x16f   : > { %v1422_v19 = vsel %vm1421_vm6, %v1418_v25, %v1420_v7  ;;  %v1423_v4 = vsel %vm1421_vm6, %v1420_v7, %v1418_v25  ;;  %v1374_v7 = vld [vmem:[#allocation6 + $0x22] ss:$8 sm:$0x3]  ;;  %v1302_v36 = vadd.f32 %v1301_v6, %v1280_v57 }
 0x170   : > { %2250 = vrot.lane.b32.xlu1 %v3767_v41, %s3544_s11  ;;  %2248 = vrot.lane.b32.xlu0 %v3763_v40, %s3544_s11  ;;  %v1434_v54 = vcombine.low %v1423_v4, %v1422_v19  ;;  %v1413_v30 = vrot.slane %v1406_v44, %v3945_v26  ;;  %v1393_v48 = vmul.f32 %v1391_v1, %v1374_v7  ;;  %s3228_s11 = sshll.u32 %s3609_s3, 5 }
 0x171   : > { %v1337_v10 = vadd.f32 %v1336_v20, %v1302_v36 }
 0x172   : > { %v1427_v33 = vpop.permute.xlu1 %1426  ;;  %v1425_v52 = vpop.permute.xlu0 %1424  ;;  %v1441_v53 = vrot.slane %v1434_v54, %v3945_v26  ;;  %v1415_v51 = vmul.f32 %v1413_v30, %v1396_v45 }
 0x173   : > { %v1428_v8 = vsel %vm1421_vm6, %v1425_v52, %v1427_v33  ;;  %v1429_v60 = vsel %vm1421_vm6, %v1427_v33, %v1425_v52  ;;  %v1431_v33 = vld [vmem:[#allocation6 + $0x23] ss:$8 sm:$0x3]  ;;  %v1359_v11 = vadd.f32 %v1358_v37, %v1337_v10  ;;  %vm2302_vm6 = vcmp.lt.s32.totalorder %v3918_v13, 99 }
 0x174   : > { %2300 = vrot.lane.b32.xlu1 %v3755_v34, %s3545_s22  ;;  %2298 = vrot.lane.b32.xlu0 %v3758_v35, %s3545_s22  ;;  %v1456_v29 = vcombine.low %v1429_v60, %v1428_v8  ;;  %v1448_v38 = vrot.slane %v1441_v53, %v3945_v26 }
 0x175   : > { %v1394_v4 = vadd.f32 %v1393_v48, %v1359_v11 }
 0x176   : > { %v1477_v17 = vpop.permute.xlu1 %1476  ;;  %v1475_v58 = vpop.permute.xlu0 %1474  ;;  %v1463_v18 = vrot.slane %v1456_v29, %v3945_v26  ;;  %v1450_v21 = vmul.f32 %v1448_v38, %v1431_v33 }
 0x177   : > { %v1479_v46 = vsel %vm1478_vm7, %v1475_v58, %v1477_v17  ;;  %v1480_v55 = vsel %vm1478_vm7, %v1477_v17, %v1475_v58  ;;  %v1416_v17 = vadd.f32 %v1415_v51, %v1394_v4 }
 0x178   : > { %2307 = vrot.lane.b32.xlu1 %v3767_v41, %s3545_s22  ;;  %2305 = vrot.lane.b32.xlu0 %v3763_v40, %s3545_s22  ;;  %v1491_v25 = vcombine.low %v1480_v55, %v1479_v46  ;;  %v1470_v15 = vrot.slane %v1463_v18, %v3945_v26  ;;  %s245_s22 = scalar_lea.vmem [#allocation9], %s3221_s10 }
 0x179   : > { %v1451_v6 = vadd.f32 %v1450_v21, %v1416_v17 }
 0x17a   : > { %v1484_v43 = vpop.permute.xlu1 %1483  ;;  %v1482_v61 = vpop.permute.xlu0 %1481  ;;  %v1498_v52 = vrot.slane %v1491_v25, %v3945_v26  ;;  %v1472_v58 = vmul.f32 %v1470_v15, %v1453_v56 }
 0x17b   : > { %v1485_v59 = vsel %vm1478_vm7, %v1482_v61, %v1484_v43  ;;  %v1486_v47 = vsel %vm1478_vm7, %v1484_v43, %v1482_v61  ;;  %v1545_v43 = vld [vmem:[#allocation6 + $0x25] ss:$8 sm:$0x3]  ;;  %vm2359_vm7 = vcmp.lt.s32.totalorder %v3918_v13, 98 }
 0x17c   : > { %2357 = vrot.lane.b32.xlu1 %v3755_v34, %s3546_s24  ;;  %2355 = vrot.lane.b32.xlu0 %v3758_v35, %s3546_s24  ;;  %v1513_v9 = vcombine.low %v1486_v47, %v1485_v59  ;;  %v1505_v23 = vrot.slane %v1498_v52, %v3945_v26  ;;  %v1473_v55 = vadd.f32 %v1472_v58, %v1451_v6  ;;  %v1567_v47 = vld [vmem:[#allocation8 + $0x25] ss:$8 sm:$0x3]  ;;  %v1624_v52 = vld [vmem:[#allocation8 + $0x26] ss:$8 sm:$0x3] }
 0x17e   : > { %v1534_v0 = vpop.permute.xlu1 %1533  ;;  %v1532_v63 = vpop.permute.xlu0 %1531  ;;  %v1520_v2 = vrot.slane %v1513_v9, %v3945_v26  ;;  %v1507_v29 = vmul.f32 %v1505_v23, %v1488_v49  ;;  %v1681_v49 = vld [vmem:[#allocation8 + $0x27] ss:$8 sm:$0x3] }
 0x17f   : > { %v1536_v31 = vsel %vm1535_vm8, %v1532_v63, %v1534_v0  ;;  %v1537_v62 = vsel %vm1535_vm8, %v1534_v0, %v1532_v63  ;;  %v1710_v63 = vcombine.low %v3763_v40, %v3767_v41 }
 0x180   : > { %2364 = vrot.lane.b32.xlu1 %v3767_v41, %s3546_s24  ;;  %2362 = vrot.lane.b32.xlu0 %v3763_v40, %s3546_s24  ;;  %v1548_v39 = vcombine.low %v1537_v62, %v1536_v31  ;;  %v1527_v60 = vrot.slane %v1520_v2, %v3945_v26  ;;  %v1508_v25 = vadd.f32 %v1507_v29, %v1473_v55  ;;  %v1602_v31 = vld [vmem:[#allocation6 + $0x26] ss:$8 sm:$0x3]  ;;  %s3120_s24 = sshll.u32 %s245_s22, 4  ;;  %s3121_s24 = int_to_ptr.vmem [resolvable:$true] %s3120_s24 }
 0x181   : > { %v1717_v56 = vrot.slane %v1710_v63, %v3945_v26 }
 0x182   : > { %v1541_v12 = vpop.permute.xlu1 %1540  ;;  %v1539_v14 = vpop.permute.xlu0 %1538  ;;  %v1555_v16 = vrot.slane %v1548_v39, %v3945_v26  ;;  %v1529_v32 = vmul.f32 %v1527_v60, %v1510_v27 }
 0x183   : > { %v1542_v50 = vsel %vm1535_vm8, %v1539_v14, %v1541_v12  ;;  %v1543_v19 = vsel %vm1535_vm8, %v1541_v12, %v1539_v14  ;;  %v1659_v14 = vld [vmem:[#allocation6 + $0x27] ss:$8 sm:$0x3]  ;;  %vm2416_vm8 = vcmp.lt.s32.totalorder %v3918_v13, 97 }
 0x184   : > { %v1570_v22 = vcombine.low %v1543_v19, %v1542_v50  ;;  %2414 = vrot.lane.b32.xlu1 %v3755_v34, %s3547_s29  ;;  %2412 = vrot.lane.b32.xlu0 %v3758_v35, %s3547_s29  ;;  %v1562_v46 = vrot.slane %v1555_v16, %v3945_v26  ;;  %v1530_v45 = vadd.f32 %v1529_v32, %v1508_v25 }
 0x186   : > { %v1591_v28 = vpop.permute.xlu1 %1590  ;;  %v1589_v8 = vpop.permute.xlu0 %1588  ;;  %v1577_v42 = vrot.slane %v1570_v22, %v3945_v26  ;;  %v1564_v36 = vmul.f32 %v1562_v46, %v1545_v43 }
 0x187   : > { %v1593_v54 = vsel %vm1592_vm9, %v1589_v8, %v1591_v28  ;;  %v1594_v5 = vsel %vm1592_vm9, %v1591_v28, %v1589_v8  ;;  %v1703_v28 = vld [vmem:[#allocation6 + $0x30] ss:$8 sm:$0x3]  ;;  %v1724_v8 = vrot.slane %v1717_v56, %v3945_v26 }
 0x188   : > { %v1605_v44 = vcombine.low %v1594_v5, %v1593_v54  ;;  %2421 = vrot.lane.b32.xlu1 %v3767_v41, %s3547_s29  ;;  %2419 = vrot.lane.b32.xlu0 %v3763_v40, %s3547_s29  ;;  %v1584_v1 = vrot.slane %v1577_v42, %v3945_v26  ;;  %v1565_v33 = vadd.f32 %v1564_v36, %v1530_v45  ;;  %v1707_v5 = vld [vmem:[#allocation8 + $0x30] ss:$8 sm:$0x3] }
 0x189   : > { %v1704_v29 = vmul.f32 %v1703_v28, %v3747_v24  ;;  %v1856_v28 = vld [vmem:[#allocation6 + $0x33] ss:$8 sm:$0x3] }
 0x18a   : > { %v1612_v61 = vrot.slane %v1605_v44, %v3945_v26  ;;  %v1598_v57 = vpop.permute.xlu1 %1597  ;;  %v1596_v20 = vpop.permute.xlu0 %1595  ;;  %v1586_v9 = vmul.f32 %v1584_v1, %v1567_v47 }
 0x18b   : > { %v1599_v53 = vsel %vm1592_vm9, %v1596_v20, %v1598_v57  ;;  %v1600_v59 = vsel %vm1592_vm9, %v1598_v57, %v1596_v20  ;;  %v1726_v57 = vmul.f32 %v1724_v8, %v1707_v5  ;;  %vm2473_vm9 = vcmp.lt.s32.totalorder %v3918_v13, 96 }
 0x18c   : > { %v1627_v7 = vcombine.low %v1600_v59, %v1599_v53  ;;  %2471 = vrot.lane.b32.xlu1 %v3755_v34, %s3548_s5  ;;  %2469 = vrot.lane.b32.xlu0 %v3758_v35, %s3548_s5  ;;  %v1619_v37 = vrot.slane %v1612_v61, %v3945_v26  ;;  %v1587_v12 = vadd.f32 %v1586_v9, %v1565_v33  ;;  %v1742_v53 = vld [vmem:[#allocation6 + $0x31] ss:$8 sm:$0x3]  ;;  %v1799_v33 = vld [vmem:[#allocation6 + $0x32] ss:$8 sm:$0x3] }
 0x18e   : > { %v1634_v30 = vrot.slane %v1627_v7, %v3945_v26  ;;  %v1648_v18 = vpop.permute.xlu1 %1647  ;;  %v1646_v0 = vpop.permute.xlu0 %1645  ;;  %v1621_v39 = vmul.f32 %v1619_v37, %v1602_v31 }
 0x18f   : > { %v1650_v62 = vsel %vm1649_vm10, %v1646_v0, %v1648_v18  ;;  %v1651_v10 = vsel %vm1649_vm10, %v1648_v18, %v1646_v0 }
 0x190   : > { %v1641_v48 = vrot.slane %v1634_v30, %v3945_v26  ;;  %v1662_v38 = vcombine.low %v1651_v10, %v1650_v62  ;;  %2478 = vrot.lane.b32.xlu1 %v3767_v41, %s3548_s5  ;;  %2476 = vrot.lane.b32.xlu0 %v3763_v40, %s3548_s5  ;;  %v1622_v22 = vadd.f32 %v1621_v39, %v1587_v12  ;;  %v1764_v30 = vld [vmem:[#allocation8 + $0x31] ss:$8 sm:$0x3] }
 0x192   : > { %v1669_v11 = vrot.slane %v1662_v38, %v3945_v26  ;;  %v1655_v51 = vpop.permute.xlu1 %1654  ;;  %v1653_v15 = vpop.permute.xlu0 %1652  ;;  %v1643_v19 = vmul.f32 %v1641_v48, %v1624_v52 }
 0x193   : > { %v1656_v2 = vsel %vm1649_vm10, %v1653_v15, %v1655_v51  ;;  %v1657_v50 = vsel %vm1649_vm10, %v1655_v51, %v1653_v15  ;;  %vm2530_vm10 = vcmp.lt.s32.totalorder %v3918_v13, 95 }
 0x194   : > { %v1676_v4 = vrot.slane %v1669_v11, %v3945_v26  ;;  %v1684_v21 = vcombine.low %v1657_v50, %v1656_v2  ;;  %2528 = vrot.lane.b32.xlu1 %v3755_v34, %s3549_s6  ;;  %2526 = vrot.lane.b32.xlu0 %v3758_v35, %s3549_s6  ;;  %v1644_v54 = vadd.f32 %v1643_v19, %v1622_v22  ;;  %v1821_v50 = vld [vmem:[#allocation8 + $0x32] ss:$8 sm:$0x3] }
 0x196   : > { %v1678_v23 = vmul.f32 %v1676_v4, %v1659_v14  ;;  %v1691_v16 = vrot.slane %v1684_v21, %v3945_v26  ;;  %v1731_v17 = vpop.permute.xlu1 %1730  ;;  %v1729_v58 = vpop.permute.xlu0 %1728 }
 0x197   : > { %v1733_v60 = vsel %vm1732_vm11, %v1729_v58, %v1731_v17  ;;  %v1734_v42 = vsel %vm1732_vm11, %v1731_v17, %v1729_v58 }
 0x198   : > { %v1698_v6 = vrot.slane %v1691_v16, %v3945_v26  ;;  %v1745_v27 = vcombine.low %v1733_v60, %v1734_v42  ;;  %2535 = vrot.lane.b32.xlu1 %v3767_v41, %s3549_s6  ;;  %2533 = vrot.lane.b32.xlu0 %v3763_v40, %s3549_s6  ;;  %v1679_v44 = vadd.f32 %v1678_v23, %v1644_v54  ;;  %s4932_s6 = scalar_lea.hbm %s4975_s4, %s3228_s11 }
 0x19a   : > { %v1700_v46 = vmul.f32 %v1698_v6, %v1681_v49  ;;  %v1752_v55 = vrot.slane %v1745_v27, %v3945_v26  ;;  %v1738_v43 = vpop.permute.xlu1 %1737  ;;  %v1736_v61 = vpop.permute.xlu0 %1735 }
 0x19b   : > { %v1739_v20 = vsel %vm1732_vm11, %v1736_v61, %v1738_v43  ;;  %v1740_v32 = vsel %vm1732_vm11, %v1738_v43, %v1736_v61  ;;  %vm2587_vm11 = vcmp.lt.s32.totalorder %v3918_v13, 94 }
 0x19c   : > { %v1701_v1 = vadd.f32 %v1700_v46, %v1679_v44  ;;  %v1759_v59 = vrot.slane %v1752_v55, %v3945_v26  ;;  %v1767_v47 = vcombine.low %v1739_v20, %v1740_v32  ;;  %2585 = vrot.lane.b32.xlu1 %v3755_v34, %s3550_s7  ;;  %2583 = vrot.lane.b32.xlu0 %v3758_v35, %s3550_s7  ;;  %v1878_v46 = vld [vmem:[#allocation8 + $0x33] ss:$8 sm:$0x3] }
 0x19e   : > { %v1705_v24 = vadd.f32 %v1704_v29, %v1701_v1  ;;  %v1774_v7 = vrot.slane %v1767_v47, %v3945_v26  ;;  %v1788_v25 = vpop.permute.xlu1 %1787  ;;  %v1786_v36 = vpop.permute.xlu0 %1785  ;;  %v1761_v37 = vmul.f32 %v1759_v59, %v1742_v53  ;;  %v1913_v47 = vld [vmem:[#allocation6 + $0x34] ss:$8 sm:$0x3] }
 0x19f   : > { %v1790_v18 = vsel %vm1789_vm12, %v1786_v36, %v1788_v25  ;;  %v1791_v0 = vsel %vm1789_vm12, %v1788_v25, %v1786_v36 }
 0x1a0   : > { %v1727_v63 = vadd.f32 %v1726_v57, %v1705_v24  ;;  %v1781_v45 = vrot.slane %v1774_v7, %v3945_v26  ;;  %v1802_v9 = vcombine.low %v1790_v18, %v1791_v0  ;;  %2592 = vrot.lane.b32.xlu1 %v3767_v41, %s3550_s7  ;;  %2590 = vrot.lane.b32.xlu0 %v3763_v40, %s3550_s7  ;;  %s3106_s7 = scalar_lea.sflag [#allocation5], %s3715_s8 }
 0x1a2   : > { %v1762_v31 = vadd.f32 %v1761_v37, %v1727_v63  ;;  %v1783_v62 = vmul.f32 %v1781_v45, %v1764_v30  ;;  %v1809_v10 = vrot.slane %v1802_v9, %v3945_v26  ;;  %v1795_v48 = vpop.permute.xlu1 %1794  ;;  %v1793_v38 = vpop.permute.xlu0 %1792  ;;  %v1935_v45 = vld [vmem:[#allocation8 + $0x34] ss:$8 sm:$0x3] }
 0x1a3   : > { %v1796_v52 = vsel %vm1789_vm12, %v1793_v38, %v1795_v48  ;;  %v1797_v39 = vsel %vm1789_vm12, %v1795_v48, %v1793_v38  ;;  %vm2644_vm12 = vcmp.lt.s32.totalorder %v3918_v13, 93 }
 0x1a4   : > { %v1784_v11 = vadd.f32 %v1783_v62, %v1762_v31  ;;  %v1816_v51 = vrot.slane %v1809_v10, %v3945_v26  ;;  %v1824_v15 = vcombine.low %v1796_v52, %v1797_v39  ;;  %2642 = vrot.lane.b32.xlu1 %v3755_v34, %s3551_s13  ;;  %2640 = vrot.lane.b32.xlu0 %v3758_v35, %s3551_s13 }
 0x1a6   : > { %v1818_v12 = vmul.f32 %v1816_v51, %v1799_v33  ;;  %v1831_v14 = vrot.slane %v1824_v15, %v3945_v26  ;;  %v1845_v56 = vpop.permute.xlu1 %1844  ;;  %v1843_v2 = vpop.permute.xlu0 %1842 }
 0x1a7   : > { %v1847_v19 = vsel %vm1846_vm13, %v1843_v2, %v1845_v56  ;;  %v1848_v4 = vsel %vm1846_vm13, %v1845_v56, %v1843_v2 }
 0x1a8   : > { %v1819_v21 = vadd.f32 %v1818_v12, %v1784_v11  ;;  %v1838_v22 = vrot.slane %v1831_v14, %v3945_v26  ;;  %v1859_v23 = vcombine.low %v1847_v19, %v1848_v4  ;;  %2649 = vrot.lane.b32.xlu1 %v3767_v41, %s3551_s13  ;;  %2647 = vrot.lane.b32.xlu0 %v3763_v40, %s3551_s13  ;;  %v1970_v11 = vld [vmem:[#allocation6 + $0x35] ss:$8 sm:$0x3]  ;;  %s3433_s13 = scalar_lea.vmem %s3121_s24, 32 }
 0x1a9   : > { %p3434_p11 = scmp.ne.s32.totalorder %s3121_s24, %s3433_s13 }
 0x1aa   : > { %v1840_v16 = vmul.f32 %v1838_v22, %v1821_v50  ;;  %v1866_v17 = vrot.slane %v1859_v23, %v3945_v26  ;;  %v1852_v58 = vpop.permute.xlu1 %1851  ;;  %v1850_v49 = vpop.permute.xlu0 %1849 }
 0x1ab   : > { %v1853_v8 = vsel %vm1846_vm13, %v1850_v49, %v1852_v58  ;;  %v1854_v60 = vsel %vm1846_vm13, %v1852_v58, %v1850_v49  ;;  %vm2701_vm13 = vcmp.lt.s32.totalorder %v3918_v13, 83  ;;  %p3435_p1 = pnand %p3434_p11, %p4993_p10 }
 0x1ac   : > { %v1841_v42 = vadd.f32 %v1840_v16, %v1819_v21  ;;  %v1873_v54 = vrot.slane %v1866_v17, %v3945_v26  ;;  %v1881_v5 = vcombine.low %v1853_v8, %v1854_v60  ;;  %2699 = vrot.lane.b32.xlu1 %v3755_v34, %s3552_s14  ;;  %2697 = vrot.lane.b32.xlu0 %v3758_v35, %s3552_s14  ;;  %v1992_v21 = vld [vmem:[#allocation8 + $0x35] ss:$8 sm:$0x3] }
 0x1ad   : > { %p3436_p2 = pneg %p3435_p1 }
 0x1ae   : > { %v1875_v6 = vmul.f32 %v1873_v54, %v1856_v28  ;;  %v1888_v27 = vrot.slane %v1881_v5, %v3945_v26  ;;  %v1902_v44 = vpop.permute.xlu1 %1901  ;;  %v1900_v29 = vpop.permute.xlu0 %1899 }
 0x1af   : > { %v1904_v55 = vsel %vm1903_vm14, %v1900_v29, %v1902_v44  ;;  %v1905_v43 = vsel %vm1903_vm14, %v1902_v44, %v1900_v29 }
 0x1b0   : > { %v1876_v61 = vadd.f32 %v1875_v6, %v1841_v42  ;;  %v1895_v57 = vrot.slane %v1888_v27, %v3945_v26  ;;  %v1916_v20 = vcombine.low %v1904_v55, %v1905_v43  ;;  %2706 = vrot.lane.b32.xlu1 %v3767_v41, %s3552_s14  ;;  %2704 = vrot.lane.b32.xlu0 %v3763_v40, %s3552_s14  ;;  %v2027_v42 = vld [vmem:[#allocation6 + $0x36] ss:$8 sm:$0x3]  ;;  %s3559_s14 = smov [#allocation9]  }
 0x1b1   : > { %s3437_s3 = sshll.u32 %s3559_s14, 4  ;;  %s3438_s3 = int_to_ptr.vmem [resolvable:$false] %s3437_s3 }
 0x1b2   : > { %v1897_v32 = vmul.f32 %v1895_v57, %v1878_v46  ;;  %v1923_v1 = vrot.slane %v1916_v20, %v3945_v26  ;;  %v1909_v53 = vpop.permute.xlu1 %1908  ;;  %v1907_v59 = vpop.permute.xlu0 %1906  ;;  %p3440_p6 = scmp.lt.s32.totalorder %s3121_s24, %s3438_s3 }
 0x1b3   : > { %v1910_v24 = vsel %vm1903_vm14, %v1907_v59, %v1909_v53  ;;  %v1911_v7 = vsel %vm1903_vm14, %v1909_v53, %v1907_v59  ;;  %vm2758_vm14 = vcmp.lt.s32.totalorder %v3918_v13, 82 }
 0x1b4   : > { %v1898_v25 = vadd.f32 %v1897_v32, %v1876_v61  ;;  %v1930_v36 = vrot.slane %v1923_v1, %v3945_v26  ;;  %v1938_v37 = vcombine.low %v1910_v24, %v1911_v7  ;;  %2756 = vrot.lane.b32.xlu1 %v3755_v34, %s3553_s21  ;;  %2754 = vrot.lane.b32.xlu0 %v3758_v35, %s3553_s21  ;;  %v2049_v61 = vld [vmem:[#allocation8 + $0x36] ss:$8 sm:$0x3] }
 0x1b6   : > { %v1932_v30 = vmul.f32 %v1930_v36, %v1913_v47  ;;  %v1945_v18 = vrot.slane %v1938_v37, %v3945_v26  ;;  %v1959_v0 = vpop.permute.xlu1 %1958  ;;  %v1957_v63 = vpop.permute.xlu0 %1956 }
 0x1b7   : > { %v1961_v9 = vsel %vm1960_vm15, %v1957_v63, %v1959_v0  ;;  %v1962_v31 = vsel %vm1960_vm15, %v1959_v0, %v1957_v63 }
 0x1b8   : > { %v1933_v62 = vadd.f32 %v1932_v30, %v1898_v25  ;;  %v1952_v10 = vrot.slane %v1945_v18, %v3945_v26  ;;  %v1973_v48 = vcombine.low %v1961_v9, %v1962_v31  ;;  %2763 = vrot.lane.b32.xlu1 %v3767_v41, %s3553_s21  ;;  %2761 = vrot.lane.b32.xlu0 %v3763_v40, %s3553_s21  ;;  %v2084_v25 = vld [vmem:[#allocation6 + $0x37] ss:$8 sm:$0x3]  ;;  %s3439_s21 = scalar_lea.vmem %s3438_s3, 64 }
 0x1b9   : > { %p3441_p12 = scmp.lt.s32.totalorder %s3439_s21, %s3433_s13 }
 0x1ba   : > { %v1954_v38 = vmul.f32 %v1952_v10, %v1935_v45  ;;  %v1980_v33 = vrot.slane %v1973_v48, %v3945_v26  ;;  %v1966_v52 = vpop.permute.xlu1 %1965  ;;  %v1964_v39 = vpop.permute.xlu0 %1963 }
 0x1bb   : > { %v1967_v51 = vsel %vm1960_vm15, %v1964_v39, %v1966_v52  ;;  %v1968_v15 = vsel %vm1960_vm15, %v1966_v52, %v1964_v39  ;;  %vm2815_vm15 = vcmp.lt.s32.totalorder %v3918_v13, 81  ;;  %p3442_p7 = por %p3441_p12, %p3440_p6 }
 0x1bc   : > { %v1955_v12 = vadd.f32 %v1954_v38, %v1933_v62  ;;  %v1987_v14 = vrot.slane %v1980_v33, %v3945_v26  ;;  %v1995_v56 = vcombine.low %v1967_v51, %v1968_v15  ;;  %2813 = vrot.lane.b32.xlu1 %v3755_v34, %s3554_s25  ;;  %2811 = vrot.lane.b32.xlu0 %v3758_v35, %s3554_s25  ;;  %v2106_v62 = vld [vmem:[#allocation8 + $0x37] ss:$8 sm:$0x3] }
 0x1bd   : > { %p3443_p9 = pnand %p3442_p7, %p3436_p2 }
 0x1be   : > { %v1989_v2 = vmul.f32 %v1987_v14, %v1970_v11  ;;  %v2002_v50 = vrot.slane %v1995_v56, %v3945_v26  ;;  %v2016_v19 = vpop.permute.xlu1 %2015  ;;  %v2014_v4 = vpop.permute.xlu0 %2013 }
 0x1bf   : > { %v2018_v22 = vsel %vm2017_vm1, %v2014_v4, %v2016_v19  ;;  %v2019_v23 = vsel %vm2017_vm1, %v2016_v19, %v2014_v4 }
 0x1c0   : > { %v1990_v16 = vadd.f32 %v1989_v2, %v1955_v12  ;;  %v2009_v17 = vrot.slane %v2002_v50, %v3945_v26  ;;  %v2030_v58 = vcombine.low %v2018_v22, %v2019_v23  ;;  %2820 = vrot.lane.b32.xlu1 %v3767_v41, %s3554_s25  ;;  %2818 = vrot.lane.b32.xlu0 %v3763_v40, %s3554_s25  ;;  %v2141_v12 = vld [vmem:[#allocation6 + $0x40] ss:$8 sm:$0x3] }
 0x1c2   : > { %v2011_v49 = vmul.f32 %v2009_v17, %v1992_v21  ;;  %v2037_v28 = vrot.slane %v2030_v58, %v3945_v26  ;;  %v2023_v8 = vpop.permute.xlu1 %2022  ;;  %v2021_v60 = vpop.permute.xlu0 %2020 }
 0x1c3   : > { %v2024_v54 = vsel %vm2017_vm1, %v2021_v60, %v2023_v8  ;;  %v2025_v5 = vsel %vm2017_vm1, %v2023_v8, %v2021_v60  ;;  %vm2872_vm1 = vcmp.lt.s32.totalorder %v3918_v13, 80 }
 0x1c4   : > { %v2012_v6 = vadd.f32 %v2011_v49, %v1990_v16  ;;  %v2044_v27 = vrot.slane %v2037_v28, %v3945_v26  ;;  %v2052_v44 = vcombine.low %v2024_v54, %v2025_v5  ;;  %2870 = vrot.lane.b32.xlu1 %v3755_v34, %s3555_s26  ;;  %2868 = vrot.lane.b32.xlu0 %v3758_v35, %s3555_s26  ;;  %v2163_v16 = vld [vmem:[#allocation8 + $0x40] ss:$8 sm:$0x3] }
 0x1c6   : > { %v2046_v29 = vmul.f32 %v2044_v27, %v2027_v42  ;;  %v2059_v46 = vrot.slane %v2052_v44, %v3945_v26  ;;  %v2073_v55 = vpop.permute.xlu1 %2072  ;;  %v2071_v43 = vpop.permute.xlu0 %2070 }
 0x1c7   : > { %v2075_v57 = vsel %vm2074_vm2, %v2071_v43, %v2073_v55  ;;  %v2076_v20 = vsel %vm2074_vm2, %v2073_v55, %v2071_v43 }
 0x1c8   : > { %v2047_v32 = vadd.f32 %v2046_v29, %v2012_v6  ;;  %v2066_v1 = vrot.slane %v2059_v46, %v3945_v26  ;;  %v2087_v53 = vcombine.low %v2075_v57, %v2076_v20  ;;  %2877 = vrot.lane.b32.xlu1 %v3767_v41, %s3555_s26  ;;  %2875 = vrot.lane.b32.xlu0 %v3763_v40, %s3555_s26 }
 0x1ca   : > { %v2068_v59 = vmul.f32 %v2066_v1, %v2049_v61  ;;  %v2094_v47 = vrot.slane %v2087_v53, %v3945_v26  ;;  %v2080_v24 = vpop.permute.xlu1 %2079  ;;  %v2078_v7 = vpop.permute.xlu0 %2077 }
 0x1cb   : > { %v2081_v36 = vsel %vm2074_vm2, %v2078_v7, %v2080_v24  ;;  %v2082_v37 = vsel %vm2074_vm2, %v2080_v24, %v2078_v7  ;;  %vm2929_vm2 = vcmp.lt.s32.totalorder %v3918_v13, 79 }
 0x1cc   : > { %v2069_v30 = vadd.f32 %v2068_v59, %v2047_v32  ;;  %v2101_v18 = vrot.slane %v2094_v47, %v3945_v26  ;;  %v2109_v0 = vcombine.low %v2081_v36, %v2082_v37  ;;  %2927 = vrot.lane.b32.xlu1 %v3755_v34, %s3556_s27  ;;  %2925 = vrot.lane.b32.xlu0 %v3758_v35, %s3556_s27 }
 0x1ce   : > { %v2103_v63 = vmul.f32 %v2101_v18, %v2084_v25  ;;  %v2116_v45 = vrot.slane %v2109_v0, %v3945_v26  ;;  %v2130_v9 = vpop.permute.xlu1 %2129  ;;  %v2128_v31 = vpop.permute.xlu0 %2127 }
 0x1cf   : > { %v2132_v10 = vsel %vm2131_vm3, %v2128_v31, %v2130_v9  ;;  %v2133_v48 = vsel %vm2131_vm3, %v2130_v9, %v2128_v31 }
 0x1d0   : > { %v2104_v38 = vadd.f32 %v2103_v63, %v2069_v30  ;;  %v2123_v33 = vrot.slane %v2116_v45, %v3945_v26  ;;  %v2144_v52 = vcombine.low %v2132_v10, %v2133_v48  ;;  %2934 = vrot.lane.b32.xlu1 %v3767_v41, %s3556_s27  ;;  %2932 = vrot.lane.b32.xlu0 %v3763_v40, %s3556_s27 }
 0x1d2   : > { %v2125_v39 = vmul.f32 %v2123_v33, %v2106_v62  ;;  %v2151_v11 = vrot.slane %v2144_v52, %v3945_v26  ;;  %v2137_v51 = vpop.permute.xlu1 %2136  ;;  %v2135_v15 = vpop.permute.xlu0 %2134 }
 0x1d3   : > { %v2138_v14 = vsel %vm2131_vm3, %v2135_v15, %v2137_v51  ;;  %v2139_v56 = vsel %vm2131_vm3, %v2137_v51, %v2135_v15  ;;  %vm2986_vm3 = vcmp.lt.s32.totalorder %v3918_v13, 78 }
 0x1d4   : > { %v2126_v2 = vadd.f32 %v2125_v39, %v2104_v38  ;;  %v2158_v50 = vrot.slane %v2151_v11, %v3945_v26  ;;  %v2166_v19 = vcombine.low %v2138_v14, %v2139_v56  ;;  %2984 = vrot.lane.b32.xlu1 %v3755_v34, %s3557_s28  ;;  %2982 = vrot.lane.b32.xlu0 %v3758_v35, %s3557_s28  ;;  %v2198_v14 = vld [vmem:[#allocation6 + $0x41] ss:$8 sm:$0x3] }
 0x1d6   : > { %v2160_v4 = vmul.f32 %v2158_v50, %v2141_v12  ;;  %v2173_v21 = vrot.slane %v2166_v19, %v3945_v26  ;;  %v2187_v22 = vpop.permute.xlu1 %2186  ;;  %v2185_v23 = vpop.permute.xlu0 %2184 }
 0x1d7   : > { %v2189_v59 = vsel %vm2188_vm4, %v2185_v23, %v2187_v22  ;;  %v2190_v47 = vsel %vm2188_vm4, %v2187_v22, %v2185_v23 }
 0x1d8   : > { %v2161_v17 = vadd.f32 %v2160_v4, %v2126_v2  ;;  %v2180_v58 = vrot.slane %v2173_v21, %v3945_v26  ;;  %2991 = vrot.lane.b32.xlu1 %v3767_v41, %s3557_s28  ;;  %2989 = vrot.lane.b32.xlu0 %v3763_v40, %s3557_s28  ;;  %v2201_v37 = vcombine.low %v2189_v59, %v2190_v47  ;;  %v2220_v21 = vld [vmem:[#allocation8 + $0x41] ss:$8 sm:$0x3] }
 0x1da   : > { %v2182_v49 = vmul.f32 %v2180_v58, %v2163_v16  ;;  %v2194_v28 = vpop.permute.xlu1 %2193  ;;  %v2192_v8 = vpop.permute.xlu0 %2191  ;;  %v2208_v9 = vrot.slane %v2201_v37, %v3945_v26 }
 0x1db   : > { %v2195_v25 = vsel %vm2188_vm4, %v2192_v8, %v2194_v28  ;;  %v2196_v36 = vsel %vm2188_vm4, %v2194_v28, %v2192_v8  ;;  %vm3043_vm4 = vcmp.lt.s32.totalorder %v3918_v13, 77 }
 0x1dc   : > { %v4652_v60 = vadd.f32 %v2182_v49, %v2161_v17  ;;  %3041 = vrot.lane.b32.xlu1 %v3755_v34, %s3558_s30  ;;  %3039 = vrot.lane.b32.xlu0 %v3758_v35, %s3558_s30  ;;  %v2223_v30 = vcombine.low %v2195_v25, %v2196_v36  ;;  %v2215_v51 = vrot.slane %v2208_v9, %v3945_v26 }
 0x1de   : > { %v2244_v42 = vpop.permute.xlu1 %2243  ;;  %v2242_v54 = vpop.permute.xlu0 %2241  ;;  %v2230_v48 = vrot.slane %v2223_v30, %v3945_v26  ;;  %v2217_v58 = vmul.f32 %v2215_v51, %v2198_v14 }
 0x1df   : > { %v2246_v18 = vsel %vm2245_vm5, %v2242_v54, %v2244_v42  ;;  %v2247_v0 = vsel %vm2245_vm5, %v2244_v42, %v2242_v54 }
 0x1e0   : > { %3048 = vrot.lane.b32.xlu1 %v3767_v41, %s3558_s30  ;;  %3046 = vrot.lane.b32.xlu0 %v3763_v40, %s3558_s30  ;;  %v2258_v10 = vcombine.low %v2246_v18, %v2247_v0  ;;  %v2237_v50 = vrot.slane %v2230_v48, %v3945_v26 }
 0x1e2   : > { %v2251_v5 = vpop.permute.xlu1 %2250  ;;  %v2249_v6 = vpop.permute.xlu0 %2248  ;;  %v2265_v56 = vrot.slane %v2258_v10, %v3945_v26  ;;  %v2239_v54 = vmul.f32 %v2237_v50, %v2220_v21 }
 0x1e3   : > { %v2252_v31 = vsel %vm2245_vm5, %v2249_v6, %v2251_v5  ;;  %v2253_v62 = vsel %vm2245_vm5, %v2251_v5, %v2249_v6  ;;  %v2255_v5 = vld [vmem:[#allocation6 + $0x42] ss:$8 sm:$0x3] }
 0x1e4   : > { %v2280_v11 = vcombine.low %v2252_v31, %v2253_v62  ;;  %v2272_v49 = vrot.slane %v2265_v56, %v3945_v26  ;;  %v2334_v62 = vld [vmem:[#allocation8 + $0x43] ss:$8 sm:$0x3] }
 0x1e6   : > { %v2301_v27 = vpop.permute.xlu1 %2300  ;;  %v2299_v44 = vpop.permute.xlu0 %2298  ;;  %v2287_v22 = vrot.slane %v2280_v11, %v3945_v26  ;;  %v2274_v47 = vmul.f32 %v2272_v49, %v2255_v5 }
 0x1e7   : > { %v2303_v38 = vsel %vm2302_vm6, %v2299_v44, %v2301_v27  ;;  %v2304_v33 = vsel %vm2302_vm6, %v2301_v27, %v2299_v44 }
 0x1e8   : > { %v2315_v2 = vcombine.low %v2303_v38, %v2304_v33 }
 0x1ea   : > { %v2308_v29 = vpop.permute.xlu1 %2307  ;;  %v2306_v46 = vpop.permute.xlu0 %2305  ;;  %v2322_v28 = vrot.slane %v2315_v2, %v3945_v26  ;;  %v2369_v2 = vld [vmem:[#allocation6 + $0x44] ss:$8 sm:$0x3] }
 0x1eb   : > { %v2309_v15 = vsel %vm2302_vm6, %v2306_v46, %v2308_v29  ;;  %v2310_v12 = vsel %vm2302_vm6, %v2308_v29, %v2306_v46  ;;  %v2294_v29 = vrot.slane %v2287_v22, %v3945_v26 }
 0x1ec   : > { %v2337_v23 = vcombine.low %v2309_v15, %v2310_v12  ;;  %v2329_v25 = vrot.slane %v2322_v28, %v3945_v26 }
 0x1ee   : > { %v2358_v55 = vpop.permute.xlu1 %2357  ;;  %v2356_v43 = vpop.permute.xlu0 %2355  ;;  %v2344_v46 = vrot.slane %v2337_v23, %v3945_v26 }
 0x1ef   : > { %v2360_v16 = vsel %vm2359_vm7, %v2356_v43, %v2358_v55  ;;  %v2361_v17 = vsel %vm2359_vm7, %v2358_v55, %v2356_v43 }
 0x1f0   : > { %v2372_v6 = vcombine.low %v2360_v16, %v2361_v17  ;;  %v2351_v31 = vrot.slane %v2344_v46, %v3945_v26  ;;  %v2391_v16 = vld [vmem:[#allocation8 + $0x44] ss:$8 sm:$0x3] }
 0x1f2   : > { %v2365_v61 = vpop.permute.xlu1 %2364  ;;  %v2363_v57 = vpop.permute.xlu0 %2362  ;;  %v2353_v56 = vmul.f32 %v2351_v31, %v2334_v62 }
 0x1f3   : > { %v2366_v8 = vsel %vm2359_vm7, %v2363_v57, %v2365_v61  ;;  %v2367_v42 = vsel %vm2359_vm7, %v2365_v61, %v2363_v57  ;;  %v2218_v61 = vadd.f32 %v2217_v58, %v4652_v60  ;;  %v2277_v57 = vld [vmem:[#allocation8 + $0x42] ss:$8 sm:$0x3]  ;;  %v2379_v60 = vrot.slane %v2372_v6, %v3945_v26 }
 0x1f4   : > { %v2394_v59 = vcombine.low %v2366_v8, %v2367_v42  ;;  %v2296_v9 = vmul.f32 %v2294_v29, %v2277_v57 }
 0x1f5   : > { %v2240_v0 = vadd.f32 %v2239_v54, %v2218_v61  ;;  %v2386_v11 = vrot.slane %v2379_v60, %v3945_v26 }
 0x1f6   : > { %v4658_v20 = vpop.permute.xlu1 %2414  ;;  %v2413_v34 = vpop.permute.xlu0 %2412  ;;  %v2401_v10 = vrot.slane %v2394_v59, %v3945_v26 }
 0x1f7   : > { %v2417_v55 = vsel %vm2416_vm8, %v2413_v34, %v4658_v20  ;;  %v2418_v43 = vsel %vm2416_vm8, %v4658_v20, %v2413_v34  ;;  %v2312_v20 = vld [vmem:[#allocation6 + $0x43] ss:$8 sm:$0x3]  ;;  %v2275_v38 = vadd.f32 %v2274_v47, %v2240_v0  ;;  %v2388_v58 = vmul.f32 %v2386_v11, %v2369_v2  ;;  %v2562_v2 = vld [vmem:[#allocation8 + $0x47] ss:$8 sm:$0x3] }
 0x1f8   : > { %v2429_v34 = vcombine.low %v2417_v55, %v2418_v43  ;;  %v2331_v33 = vmul.f32 %v2329_v25, %v2312_v20  ;;  %v2408_v21 = vrot.slane %v2401_v10, %v3945_v26  ;;  %v2448_v55 = vld [vmem:[#allocation8 + $0x45] ss:$8 sm:$0x3] }
 0x1fa   : > { %v4660_v35 = vpop.permute.xlu1 %2421  ;;  %v4662_v32 = vpop.permute.xlu0 %2419  ;;  %v2436_v51 = vrot.slane %v2429_v34, %v3945_v26  ;;  %v2410_v29 = vmul.f32 %v2408_v21, %v2391_v16  ;;  %v2483_v34 = vld [vmem:[#allocation6 + $0x46] ss:$8 sm:$0x3] }
 0x1fb   : > { %v2423_v36 = vsel %vm2416_vm8, %v4662_v32, %v4660_v35  ;;  %v2424_v37 = vsel %vm2416_vm8, %v4660_v35, %v4662_v32 }
 0x1fc   : > { %v2451_v48 = vcombine.low %v2423_v36, %v2424_v37  ;;  %v2443_v49 = vrot.slane %v2436_v51, %v3945_v26 }
 0x1fe   : > { %v4664_v41 = vpop.permute.xlu1 %2471  ;;  %v4666_v40 = vpop.permute.xlu0 %2469  ;;  %v2458_v22 = vrot.slane %v2451_v48, %v3945_v26 }
 0x1ff   : > { %v2474_v35 = vsel %vm2473_vm9, %v4666_v40, %v4664_v41  ;;  %v2475_v32 = vsel %vm2473_vm9, %v4664_v41, %v4666_v40  ;;  %v2297_v40 = vadd.f32 %v2296_v9, %v2275_v38 }
 0x200   : > { %v2486_v50 = vcombine.low %v2474_v35, %v2475_v32  ;;  %v2465_v46 = vrot.slane %v2458_v22, %v3945_v26 }
 0x202   : > { %v4669_v1 = vpop.permute.xlu1 %2478  ;;  %v4671_v53 = vpop.permute.xlu0 %2476  ;;  %v2493_v54 = vrot.slane %v2486_v50, %v3945_v26  ;;  %v2467_v60 = vmul.f32 %v2465_v46, %v2448_v55 }
 0x203   : > { %v2480_v15 = vsel %vm2473_vm9, %v4671_v53, %v4669_v1  ;;  %v2481_v12 = vsel %vm2473_vm9, %v4669_v1, %v4671_v53  ;;  %v2332_v53 = vadd.f32 %v2331_v33, %v2297_v40 }
 0x204   : > { %v2508_v17 = vcombine.low %v2480_v15, %v2481_v12  ;;  %v2500_v36 = vrot.slane %v2493_v54, %v3945_v26 }
 0x205   : > { %v2354_v6 = vadd.f32 %v2353_v56, %v2332_v53 }
 0x206   : > { %v4673_v24 = vpop.permute.xlu1 %2528  ;;  %v4675_v7 = vpop.permute.xlu0 %2526  ;;  %v2515_v43 = vrot.slane %v2508_v17, %v3945_v26  ;;  %v2502_v38 = vmul.f32 %v2500_v36, %v2483_v34 }
 0x207   : > { %v2531_v23 = vsel %vm2530_vm10, %v4675_v7, %v4673_v24  ;;  %v2532_v1 = vsel %vm2530_vm10, %v4673_v24, %v4675_v7  ;;  %v2426_v7 = vld [vmem:[#allocation6 + $0x45] ss:$8 sm:$0x3] }
 0x208   : > { %v2543_v5 = vcombine.low %v2531_v23, %v2532_v1  ;;  %v2445_v59 = vmul.f32 %v2443_v49, %v2426_v7  ;;  %v2522_v9 = vrot.slane %v2515_v43, %v3945_v26  ;;  %v2597_v7 = vld [vmem:[#allocation6 + $0x50] ss:$8 sm:$0x3]  ;;  %v2619_v43 = vld [vmem:[#allocation8 + $0x50] ss:$8 sm:$0x3] }
 0x20a   : > { %v4678_v63 = vpop.permute.xlu1 %2535  ;;  %v4680_v45 = vpop.permute.xlu0 %2533  ;;  %v2550_v37 = vrot.slane %v2543_v5, %v3945_v26 }
 0x20b   : > { %v2537_v28 = vsel %vm2530_vm10, %v4680_v45, %v4678_v63  ;;  %v2538_v8 = vsel %vm2530_vm10, %v4678_v63, %v4680_v45  ;;  %v2389_v45 = vadd.f32 %v2388_v58, %v2354_v6 }
 0x20c   : > { %v2565_v61 = vcombine.low %v2537_v28, %v2538_v8  ;;  %v2557_v33 = vrot.slane %v2550_v37, %v3945_v26 }
 0x20e   : > { %v4685_v52 = vpop.permute.xlu1 %2585  ;;  %v4687_v39 = vpop.permute.xlu0 %2583  ;;  %v2572_v31 = vrot.slane %v2565_v61, %v3945_v26 }
 0x20f   : > { %v2588_v57 = vsel %vm2587_vm11, %v4687_v39, %v4685_v52  ;;  %v2589_v63 = vsel %vm2587_vm11, %v4685_v52, %v4687_v39  ;;  %v2411_v39 = vadd.f32 %v2410_v29, %v2389_v45  ;;  %v2654_v45 = vld [vmem:[#allocation6 + $0x51] ss:$8 sm:$0x3] }
 0x210   : > { %v2600_v0 = vcombine.low %v2588_v57, %v2589_v63  ;;  %v2579_v56 = vrot.slane %v2572_v31, %v3945_v26 }
 0x211   : > { %v2446_v48 = vadd.f32 %v2445_v59, %v2411_v39  ;;  %v2676_v39 = vld [vmem:[#allocation8 + $0x51] ss:$8 sm:$0x3] }
 0x212   : > { %v4693_v19 = vpop.permute.xlu1 %2592  ;;  %v4695_v4 = vpop.permute.xlu0 %2590  ;;  %v2607_v51 = vrot.slane %v2600_v0, %v3945_v26  ;;  %v2581_v8 = vmul.f32 %v2579_v56, %v2562_v2  ;;  %v2733_v56 = vld [vmem:[#allocation8 + $0x52] ss:$8 sm:$0x3] }
 0x213   : > { %v2594_v20 = vsel %vm2587_vm11, %v4695_v4, %v4693_v19  ;;  %v2595_v52 = vsel %vm2587_vm11, %v4693_v19, %v4695_v4  ;;  %v2505_v19 = vld [vmem:[#allocation8 + $0x46] ss:$8 sm:$0x3]  ;;  %v2468_v12 = vadd.f32 %v2467_v60, %v2446_v48 }
 0x214   : > { %v2622_v4 = vcombine.low %v2594_v20, %v2595_v52  ;;  %v2524_v40 = vmul.f32 %v2522_v9, %v2505_v19  ;;  %v2614_v16 = vrot.slane %v2607_v51, %v3945_v26 }
 0x215   : > { %v2503_v1 = vadd.f32 %v2502_v38, %v2468_v12  ;;  %v2711_v38 = vld [vmem:[#allocation6 + $0x52] ss:$8 sm:$0x3] }
 0x216   : > { %v4709_v27 = vpop.permute.xlu1 %2642  ;;  %v4711_v44 = vpop.permute.xlu0 %2640  ;;  %v2629_v50 = vrot.slane %v2622_v4, %v3945_v26 }
 0x217   : > { %v2645_v62 = vsel %vm2644_vm12, %v4711_v44, %v4709_v27  ;;  %v2646_v10 = vsel %vm2644_vm12, %v4709_v27, %v4711_v44  ;;  %v2540_v44 = vld [vmem:[#allocation6 + $0x47] ss:$8 sm:$0x3]  ;;  %v2525_v28 = vadd.f32 %v2524_v40, %v2503_v1 }
 0x218   : > { %v2657_v15 = vcombine.low %v2645_v62, %v2646_v10  ;;  %v2559_v53 = vmul.f32 %v2557_v33, %v2540_v44 }
 0x21a   : > { %v4733_v30 = vpop.permute.xlu1 %2649  ;;  %v4735_v18 = vpop.permute.xlu0 %2647  ;;  %v2664_v17 = vrot.slane %v2657_v15, %v3945_v26  ;;  %v2560_v55 = vadd.f32 %v2559_v53, %v2525_v28 }
 0x21b   : > { %v2651_v11 = vsel %vm2644_vm12, %v4735_v18, %v4733_v30  ;;  %v2652_v27 = vsel %vm2644_vm12, %v4733_v30, %v4735_v18 }
 0x21c   : > { %v2679_v21 = vcombine.low %v2651_v11, %v2652_v27 }
 0x21e   : > { %v4758_v14 = vpop.permute.xlu1 %2699  ;;  %v4760_v41 = vpop.permute.xlu0 %2697  ;;  %v2686_v54 = vrot.slane %v2679_v21, %v3945_v26 }
 0x21f   : > { %v2702_v22 = vsel %vm2701_vm13, %v4760_v41, %v4758_v14  ;;  %v2703_v30 = vsel %vm2701_vm13, %v4758_v14, %v4760_v41  ;;  %v2636_v41 = vrot.slane %v2629_v50, %v3945_v26 }
 0x220   : > { %v2714_v14 = vcombine.low %v2702_v22, %v2703_v30  ;;  %v2693_v37 = vrot.slane %v2686_v54, %v3945_v26 }
 0x221   : > { %v2638_v36 = vmul.f32 %v2636_v41, %v2619_v43 }
 0x222   : > { %v2707_v42 = vpop.permute.xlu1 %2706  ;;  %v2705_v24 = vpop.permute.xlu0 %2704  ;;  %v2721_v59 = vrot.slane %v2714_v14, %v3945_v26 }
 0x223   : > { %v2708_v58 = vsel %vm2701_vm13, %v2705_v24, %v2707_v42  ;;  %v2709_v49 = vsel %vm2701_vm13, %v2707_v42, %v2705_v24  ;;  %v2616_v42 = vmul.f32 %v2614_v16, %v2597_v7  ;;  %v2671_v24 = vrot.slane %v2664_v17, %v3945_v26  ;;  %v2790_v7 = vld [vmem:[#allocation8 + $0x53] ss:$8 sm:$0x3] }
 0x224   : > { %v2736_v61 = vcombine.low %v2708_v58, %v2709_v49  ;;  %v2728_v10 = vrot.slane %v2721_v59, %v3945_v26 }
 0x225   : > { %v2673_v62 = vmul.f32 %v2671_v24, %v2654_v45  ;;  %v2825_v24 = vld [vmem:[#allocation6 + $0x54] ss:$8 sm:$0x3] }
 0x226   : > { %v2757_v47 = vpop.permute.xlu1 %2756  ;;  %v2755_v25 = vpop.permute.xlu0 %2754  ;;  %v2743_v60 = vrot.slane %v2736_v61, %v3945_v26  ;;  %v2730_v50 = vmul.f32 %v2728_v10, %v2711_v38 }
 0x227   : > { %v2759_v5 = vsel %vm2758_vm14, %v2755_v25, %v2757_v47  ;;  %v2760_v6 = vsel %vm2758_vm14, %v2757_v47, %v2755_v25  ;;  %v2582_v25 = vadd.f32 %v2581_v8, %v2560_v55 }
 0x228   : > { %v2771_v47 = vcombine.low %v2759_v5, %v2760_v6  ;;  %v2750_v44 = vrot.slane %v2743_v60, %v3945_v26 }
 0x229   : > { %v2617_v31 = vadd.f32 %v2616_v42, %v2582_v25 }
 0x22a   : > { %v2764_v35 = vpop.permute.xlu1 %2763  ;;  %v2762_v32 = vpop.permute.xlu0 %2761  ;;  %v2778_v48 = vrot.slane %v2771_v47, %v3945_v26  ;;  %v2752_v58 = vmul.f32 %v2750_v44, %v2733_v56  ;;  %v2939_v44 = vld [vmem:[#allocation6 + $0x56] ss:$8 sm:$0x3] }
 0x22b   : > { %v2765_v57 = vsel %vm2758_vm14, %v2762_v32, %v2764_v35  ;;  %v2766_v63 = vsel %vm2758_vm14, %v2764_v35, %v2762_v32  ;;  %v2639_v35 = vadd.f32 %v2638_v36, %v2617_v31  ;;  %v2695_v32 = vmul.f32 %v2693_v37, %v2676_v39  ;;  %v2847_v36 = vld [vmem:[#allocation8 + $0x54] ss:$8 sm:$0x3] }
 0x22c   : > { %v2793_v34 = vcombine.low %v2765_v57, %v2766_v63  ;;  %v2785_v21 = vrot.slane %v2778_v48, %v3945_v26 }
 0x22d   : > { %v2674_v40 = vadd.f32 %v2673_v62, %v2639_v35 }
 0x22e   : > { %v2814_v18 = vpop.permute.xlu1 %2813  ;;  %v2812_v23 = vpop.permute.xlu0 %2811  ;;  %v2800_v51 = vrot.slane %v2793_v34, %v3945_v26 }
 0x22f   : > { %v2816_v0 = vsel %vm2815_vm15, %v2812_v23, %v2814_v18  ;;  %v2817_v9 = vsel %vm2815_vm15, %v2814_v18, %v2812_v23  ;;  %v2696_v18 = vadd.f32 %v2695_v32, %v2674_v40  ;;  %v2768_v23 = vld [vmem:[#allocation6 + $0x53] ss:$8 sm:$0x3] }
 0x230   : > { %v2828_v33 = vcombine.low %v2816_v0, %v2817_v9  ;;  %v2807_v49 = vrot.slane %v2800_v51, %v3945_v26  ;;  %v2787_v5 = vmul.f32 %v2785_v21, %v2768_v23  ;;  %v2882_v0 = vld [vmem:[#allocation6 + $0x55] ss:$8 sm:$0x3] }
 0x231   : > { %v2731_v54 = vadd.f32 %v2730_v50, %v2696_v18  ;;  %v2961_v50 = vld [vmem:[#allocation8 + $0x56] ss:$8 sm:$0x3] }
 0x232   : > { %v2821_v29 = vpop.permute.xlu1 %2820  ;;  %v2819_v46 = vpop.permute.xlu0 %2818  ;;  %v2835_v1 = vrot.slane %v2828_v33, %v3945_v26  ;;  %v2809_v42 = vmul.f32 %v2807_v49, %v2790_v7  ;;  %v3018_v7 = vld [vmem:[#allocation8 + $0x57] ss:$8 sm:$0x3] }
 0x233   : > { %v2822_v19 = vsel %vm2815_vm15, %v2819_v46, %v2821_v29  ;;  %v2823_v4 = vsel %vm2815_vm15, %v2821_v29, %v2819_v46  ;;  %v2753_v61 = vadd.f32 %v2752_v58, %v2731_v54 }
 0x234   : > { %v2850_v2 = vcombine.low %v2822_v19, %v2823_v4  ;;  %v2842_v6 = vrot.slane %v2835_v1, %v3945_v26  ;;  %v2904_v4 = vld [vmem:[#allocation8 + $0x55] ss:$8 sm:$0x3] }
 0x235   : > { %v2788_v25 = vadd.f32 %v2787_v5, %v2753_v61 }
 0x236   : > { %v2871_v20 = vpop.permute.xlu1 %2870  ;;  %v2869_v52 = vpop.permute.xlu0 %2868  ;;  %v2857_v14 = vrot.slane %v2850_v2, %v3945_v26  ;;  %v2844_v37 = vmul.f32 %v2842_v6, %v2825_v24 }
 0x237   : > { %v2873_v15 = vsel %vm2872_vm1, %v2869_v52, %v2871_v20  ;;  %v2874_v12 = vsel %vm2872_vm1, %v2871_v20, %v2869_v52  ;;  %v2810_v34 = vadd.f32 %v2809_v42, %v2788_v25 }
 0x238   : > { %v2885_v53 = vcombine.low %v2873_v15, %v2874_v12  ;;  %v2864_v45 = vrot.slane %v2857_v14, %v3945_v26 }
 0x239   : > { %v2845_v35 = vadd.f32 %v2844_v37, %v2810_v34 }
 0x23a   : > { %v2878_v11 = vpop.permute.xlu1 %2877  ;;  %v2876_v27 = vpop.permute.xlu0 %2875  ;;  %v2892_v29 = vrot.slane %v2885_v53, %v3945_v26  ;;  %v2866_v62 = vmul.f32 %v2864_v45, %v2847_v36  ;;  %v2996_v53 = vld [vmem:[#allocation6 + $0x57] ss:$8 sm:$0x3] }
 0x23b   : > { %v2879_v22 = vsel %vm2872_vm1, %v2876_v27, %v2878_v11  ;;  %v2880_v30 = vsel %vm2872_vm1, %v2878_v11, %v2876_v27 }
 0x23c   : > { %v2907_v41 = vcombine.low %v2879_v22, %v2880_v30  ;;  %v2899_v20 = vrot.slane %v2892_v29, %v3945_v26  ;;  %v2867_v12 = vadd.f32 %v2866_v62, %v2845_v35  ;;  %v3053_v29 = vld [vmem:[#allocation6 + $0x60] ss:$8 sm:$0x3] }
 0x23e   : > { %v2928_v16 = vpop.permute.xlu1 %2927  ;;  %v2926_v17 = vpop.permute.xlu0 %2925  ;;  %v2914_v59 = vrot.slane %v2907_v41, %v3945_v26  ;;  %v2901_v32 = vmul.f32 %v2899_v20, %v2882_v0  ;;  %v3097_v20 = vstv %s3096_s9 }
 0x23f   : > { %v2930_v28 = vsel %vm2929_vm2, %v2926_v17, %v2928_v16  ;;  %v2931_v8 = vsel %vm2929_vm2, %v2928_v16, %v2926_v17 }
 0x240   : > { %v2942_v46 = vcombine.low %v2930_v28, %v2931_v8  ;;  %v2921_v10 = vrot.slane %v2914_v59, %v3945_v26  ;;  %v2902_v21 = vadd.f32 %v2901_v32, %v2867_v12  ;;  %v3075_v59 = vld [vmem:[#allocation8 + $0x60] ss:$8 sm:$0x3] }
 0x242   : > { %v2935_v55 = vpop.permute.xlu1 %2934  ;;  %v2933_v43 = vpop.permute.xlu0 %2932  ;;  %v2949_v52 = vrot.slane %v2942_v46, %v3945_v26  ;;  %v2923_v40 = vmul.f32 %v2921_v10, %v2904_v4 }
 0x243   : > { %v2936_v57 = vsel %vm2929_vm2, %v2933_v43, %v2935_v55  ;;  %v2937_v63 = vsel %vm2929_vm2, %v2935_v55, %v2933_v43 }
 0x244   : > { %v2964_v47 = vcombine.low %v2936_v57, %v2937_v63  ;;  %v2956_v38 = vrot.slane %v2949_v52, %v3945_v26  ;;  %v2924_v58 = vadd.f32 %v2923_v40, %v2902_v21 }
 0x246   : > { %v2985_v39 = vpop.permute.xlu1 %2984  ;;  %v2983_v60 = vpop.permute.xlu0 %2982  ;;  %v2971_v48 = vrot.slane %v2964_v47, %v3945_v26  ;;  %v2958_v22 = vmul.f32 %v2956_v38, %v2939_v44 }
 0x247   : > { %v2987_v9 = vsel %vm2986_vm3, %v2983_v60, %v2985_v39  ;;  %v2988_v31 = vsel %vm2986_vm3, %v2985_v39, %v2983_v60 }
 0x248   : > { %v2999_v19 = vcombine.low %v2987_v9, %v2988_v31  ;;  %v2978_v56 = vrot.slane %v2971_v48, %v3945_v26  ;;  %v2959_v14 = vadd.f32 %v2958_v22, %v2924_v58 }
 0x24a   : > { %v3006_v33 = vrot.slane %v2999_v19, %v3945_v26  ;;  %v2992_v11 = vpop.permute.xlu1 %2991  ;;  %v2990_v27 = vpop.permute.xlu0 %2989  ;;  %v2980_v49 = vmul.f32 %v2978_v56, %v2961_v50 }
 0x24b   : > { %v2993_v51 = vsel %vm2986_vm3, %v2990_v27, %v2992_v11  ;;  %v2994_v15 = vsel %vm2986_vm3, %v2992_v11, %v2990_v27 }
 0x24c   : > { %v3021_v2 = vcombine.low %v2993_v51, %v2994_v15  ;;  %v3013_v30 = vrot.slane %v3006_v33, %v3945_v26  ;;  %v2981_v43 = vadd.f32 %v2980_v49, %v2959_v14 }
 0x24e   : > { %v3028_v18 = vrot.slane %v3021_v2, %v3945_v26  ;;  %v3042_v23 = vpop.permute.xlu1 %3041  ;;  %v3040_v1 = vpop.permute.xlu0 %3039  ;;  %v3015_v41 = vmul.f32 %v3013_v30, %v2996_v53 }
 0x24f   : > { %v3044_v16 = vsel %vm3043_vm4, %v3040_v1, %v3042_v23  ;;  %v3045_v17 = vsel %vm3043_vm4, %v3042_v23, %v3040_v1 }
 0x250   : > { %v3035_v28 = vrot.slane %v3028_v18, %v3945_v26  ;;  %v3056_v8 = vcombine.low %v3044_v16, %v3045_v17  ;;  %v3016_v57 = vadd.f32 %v3015_v41, %v2981_v43 }
 0x252   : > { %v3063_v54 = vrot.slane %v3056_v8, %v3945_v26  ;;  %v3049_v5 = vpop.permute.xlu1 %3048  ;;  %v3047_v6 = vpop.permute.xlu0 %3046  ;;  %v3037_v61 = vmul.f32 %v3035_v28, %v3018_v7 }
 0x253   : > { %v3050_v46 = vsel %vm3043_vm4, %v3047_v6, %v3049_v5  ;;  %v3051_v55 = vsel %vm3043_vm4, %v3049_v5, %v3047_v6 }
 0x254   : > { %v3070_v42 = vrot.slane %v3063_v54, %v3945_v26  ;;  %v3078_v24 = vcombine.low %v3050_v46, %v3051_v55  ;;  %v3038_v47 = vadd.f32 %v3037_v61, %v3016_v57 }
 0x256   : > { %v3072_v63 = vmul.f32 %v3070_v42, %v3053_v29  ;;  %v3085_v45 = vrot.slane %v3078_v24, %v3945_v26 }
 0x258   : > { %v3092_v25 = vrot.slane %v3085_v45, %v3945_v26  ;;  %v3073_v36 = vadd.f32 %v3072_v63, %v3038_v47 }
 0x25a   : > { %v3094_v37 = vmul.f32 %v3092_v25, %v3075_v59 }
 0x25c   : > { %v3095_v13 = vadd.f32 %v3094_v37, %v3073_v36 }
 0x25e   : > { %v3098_v52 = vadd.f32 %v3097_v20, %v3095_v13 }
 0x260   : > { %v3099_v39 = vsub.f32 0.0, %v3098_v52 }
 0x262   : > { %v3100_v60 = vmul.f32 1.442695, %v3099_v39 }
 0x264   : > { %3349 = vpow2.f32 %v3100_v60 }
 0x271   : > { %v3350_v34 = vpop.eup %3349 }
 0x272   : > { %v3102_v0 = vadd.f32 1.0, %v3350_v34 }
 0x274   : > { %3351 = vrcp.f32 %v3102_v0 }
 0x281   : > { %v3352_v26 = vpop.eup %3351 }
 0x282   : > { %3104 = vst.msk [vmem:[%s245_s22] sm:$0x3] %vm3732_vm0, %v3352_v26 }
 0x283   : > { %3446 = shalt.err (!%p3443_p9)
}
 0x284   : > { %s3447_s25 = scalar_lea.hbm %s4932_s6, 32  ;;  %s3451_s27 = scalar_lea.hbm %s4975_s4, 64 }
 0x285   : > { %p3448_p13 = scmp.ne.s32.totalorder %s4932_s6, %s3447_s25  ;;  %p3452_p4 = scmp.lt.s32.totalorder %s4932_s6, %s4975_s4 }
 0x286   : > { %p3453_p8 = scmp.lt.s32.totalorder %s3451_s27, %s3447_s25 }
 0x287   : > { %p3449_p5 = pnand %p3448_p13, %p4993_p10 }
 0x288   : > { %p3454_p3 = por %p3453_p8, %p3452_p4 }
 0x289   : > { %p3450_p0 = pneg %p3449_p5 }
 0x28b   : > { %p3455_p11 = pnand %p3454_p3, %p3450_p0 }
 0x28d   : > { %3458 = shalt.err (!%p3455_p11)
}
 0x28e   : > { %3239 = dma.vmem_to_hbm [thread:$0]  (%p4993_p10), %s3121_s24, 32, %s4932_s6, %s3106_s7  }
 0x28f PF: > { %s3132_s9 = sand.u32 1, %s3489_s17   ;;  %p4994_p1 = scmp.ne.s32.totalorder %s4981_s23, 0 }
 0x290   : > { %p4995_p2 = scmp.ge.s32.totalorder %s3501_s20, 2  ;;  %s3133_s10 = scalar_lea.sflag [#allocation5], %s3132_s9 }
 0x292   : > { %p3253_p6 = pnand %p4995_p2, %p4994_p1 }
 0x294   : > { %p3254_p12 = pneg %p3253_p6 }
 0x296   : > { %3484 = dma.done.wait (%p3254_p12), %s3133_s10, 32  }
 0x297   : > { %3486 = vsyncadd (%p3254_p12), %s3133_s10, 4294967264  ;;  %p19_p7 = scmp.ge.s32.totalorder %s3660_s12, 4   ;;  %s4996_s17 = smov %s3493_s18 }
 0x298   : > { %s4997_s18 = smov %s3497_s19  ;;  %s4998_s19 = smov %s3676_s16 }
 0x299   : > { %s4999_s20 = smov %s3660_s12  ;;  %21 = sbr.rel (!%p19_p7) target bundleno = 8 (0x8), region = 185 }
 0x29e   :  { %3138 = vsyncpa [#allocation4], 1 }
 0x29f   :  { %3140 = vsyncpa [#allocation4 + $0x1], 1 }
 0x2a0   :  { %3141 = vsyncpa [#allocation7], 1 }
 0x2a1   :  { %3142 = vsyncpa [#allocation5], 1 }
 0x2a2   :  { %3144 = vsyncpa [#allocation5 + $0x1], 1 }

</bundles_post_ra>
